<compile_context>
chip_gen: v6e
topology: v6e:2x2x1
jax: 0.10.0
libtpu: 0.0.40
codegen_flags: <defaults>
</compile_context>

<pallas_src>
import functools

import numpy as np
import jax
import jax.numpy as jnp
from jax import lax
from jax.experimental import pallas as pl
from jax.experimental.pallas import tpu as pltpu


# --------------------------------------------------------------------------
# Pallas kernels: K-accumulating (TM,TK)@(TK,TN) matmul + fused epilogue
# --------------------------------------------------------------------------

def _mm_kernel(p_ref, w_ref, b_ref, m_ref, o_ref, acc_ref):
    """acc += p@w ; on last K step: out = (acc + bias), ReLU on masked columns."""
    k = pl.program_id(2)

    @pl.when(k == 0)
    def _():
        acc_ref[...] = jnp.zeros_like(acc_ref)

    acc_ref[...] += jnp.dot(p_ref[...], w_ref[...],
                            preferred_element_type=jnp.float32)

    @pl.when(k == pl.num_programs(2) - 1)
    def _():
        z = acc_ref[...] + b_ref[...]
        # per-column ReLU mask: lets one call serve conv1 (+ReLU) and the
        # linear downsample identity columns at once.  VPU epilogue is free
        # under the MXU/DMA critical path.
        z = jnp.where(m_ref[...] > 0.5, jnp.maximum(z, 0.0), z)
        o_ref[...] = z.astype(o_ref.dtype)


def _mm_res_kernel(p_ref, w_ref, b_ref, r_ref, o_ref, acc_ref):
    """acc += p@w ; on last K step: out = relu(acc + bias + residual)."""
    k = pl.program_id(2)

    @pl.when(k == 0)
    def _():
        acc_ref[...] = jnp.zeros_like(acc_ref)

    acc_ref[...] += jnp.dot(p_ref[...], w_ref[...],
                            preferred_element_type=jnp.float32)

    @pl.when(k == pl.num_programs(2) - 1)
    def _():
        z = acc_ref[...] + b_ref[...] + r_ref[...].astype(jnp.float32)
        o_ref[...] = jnp.maximum(z, 0.0).astype(o_ref.dtype)


# --------------------------------------------------------------------------
# Tile selection / chip probing
# --------------------------------------------------------------------------

def _round_up(v, m):
    return ((v + m - 1) // m) * m


@functools.lru_cache(maxsize=1)
def _chip_generation():
    """Best-effort chip generation (5 / 6 / 7) for tile-size selection."""
    try:
        name = str(getattr(pltpu.get_tpu_info(), "chip_version", "")).lower()
    except Exception:
        return 6
    for gen in (7, 6, 5, 4):
        if str(gen) in name:
            return gen
    return 6


def _choose_m_tiles(m, gen):
    """Return (m_pad, tm).  Small M: pad to a 32-multiple, split into 2
    parallel tiles (keeps both v7x TensorCores busy, minimal padding waste).
    Large M: 128/256 tiles, whichever wastes less padding."""
    if m <= 16:
        return 16, 16
    if m <= 512:
        m_pad = _round_up(m, 32)
        return m_pad, m_pad // 2
    tiles = (256, 128) if gen >= 6 else (128,)
    tm = min(tiles, key=lambda t: (_round_up(m, t), -t))
    return _round_up(m, tm), tm


def _choose_k_tiles(k):
    """Return (k_pad, tk).  Single K block up to 1024; beyond that tile at 512
    so the BlockSpec pipeline has >=2 steps and VMEM stays bounded on v7x."""
    k_pad = _round_up(k, 128)
    tk = k_pad if k_pad <= 1024 else 512
    return _round_up(k_pad, tk), tk


def _choose_n_tile(n_pad, gen):
    if gen >= 6 and n_pad >= 256 and n_pad % 256 == 0:
        return 256
    return 128


def _vmem_limit_bytes(tm, tk, tn, kind, out_itemsize):
    """Explicit VMEM budget; only passed when the double-buffered block set
    would exceed the 32 MiB scoped default (never at this model scale)."""
    need = 2 * (tm * tk * 2)               # patches, double buffered, bf16
    need += 2 * (tk * tn * 2)              # weights
    need += 2 * (tm * tn * out_itemsize)   # output
    need += 4 * (tn * 4)                   # bias + relu-mask rows
    if kind == "res":
        need += 2 * (tm * tn * 2)          # residual (bf16)
    need += tm * tn * 4                    # f32 accumulator scratch
    need = int(need * 1.5)                 # headroom for Mosaic internals
    if need <= (32 << 20):
        return None
    return min(need, 64 << 20)


@functools.lru_cache(maxsize=None)
def _build_mm(m_pad, k_pad, n_pad, tm, tk, tn, kind, out_dtype_name):
    out_dtype = jnp.dtype(out_dtype_name)
    grid = (m_pad // tm, n_pad // tn, k_pad // tk)

    p_spec = pl.BlockSpec((tm, tk), lambda i, j, k: (i, k))
    w_spec = pl.BlockSpec((tk, tn), lambda i, j, k: (k, j))
    b_spec = pl.BlockSpec((1, tn), lambda i, j, k: (0, j))
    o_spec = pl.BlockSpec((tm, tn), lambda i, j, k: (i, j))

    if kind == "res":
        kernel = _mm_res_kernel
        in_specs = [p_spec, w_spec, b_spec,
                    pl.BlockSpec((tm, tn), lambda i, j, k: (i, j))]
    else:
        kernel = _mm_kernel
        in_specs = [p_spec, w_spec, b_spec,
                    pl.BlockSpec((1, tn), lambda i, j, k: (0, j))]

    return pl.pallas_call(
        kernel,
        out_shape=jax.ShapeDtypeStruct((m_pad, n_pad), out_dtype),
        grid=grid,
        in_specs=in_specs,
        out_specs=o_spec,
        scratch_shapes=[pltpu.VMEM((tm, tn), jnp.float32)],
        compiler_params=pltpu.CompilerParams(
            dimension_semantics=("parallel", "parallel", "arbitrary"),
            vmem_limit_bytes=_vmem_limit_bytes(tm, tk, tn, kind,
                                               out_dtype.itemsize)),
    )


def matmul_bias_act(p, w, bias, relu=True, residual=None,
                    out_dtype=jnp.bfloat16):
    """y = epilogue((p @ w) + bias); p:(M,K) w:(K,N) bias:(N,).

    relu:  True  -> ReLU on all N columns
           False -> no ReLU
           int r -> ReLU only on the first r columns (merged conv1+downsample)
    residual: fused `relu(acc + bias + residual)` epilogue.
    Inputs are padded to lane-dense tiles, cast to bf16 for the MXU; output is
    `out_dtype` and sliced back to (M, N).
    """
    m, k = p.shape
    n = w.shape[1]
    gen = _chip_generation()

    k_pad, tk = _choose_k_tiles(k)
    n_pad = _round_up(n, 128)
    tn = _choose_n_tile(n_pad, gen)
    m_pad, tm = _choose_m_tiles(m, gen)

    p_p = jnp.pad(p.astype(jnp.bfloat16), ((0, m_pad - m), (0, k_pad - k)))
    w_p = jnp.pad(w.astype(jnp.bfloat16), ((0, k_pad - k), (0, n_pad - n)))
    b_p = jnp.pad(bias.astype(jnp.float32), (0, n_pad - n)).reshape(1, n_pad)

    dname = jnp.dtype(out_dtype).name
    if residual is not None:
        r_p = jnp.pad(residual.astype(jnp.bfloat16),
                      ((0, m_pad - m), (0, n_pad - n)))
        out = _build_mm(m_pad, k_pad, n_pad, tm, tk, tn, "res", dname)(
            p_p, w_p, b_p, r_p)
    else:
        if relu is True:
            relu_cols = n
        elif relu is False:
            relu_cols = 0
        else:
            relu_cols = int(relu)
        mask = (jnp.arange(n_pad) < relu_cols).astype(jnp.float32)
        mask = mask.reshape(1, n_pad)
        out = _build_mm(m_pad, k_pad, n_pad, tm, tk, tn, "plain", dname)(
            p_p, w_p, b_p, mask)
    return out[:m, :n]


# --------------------------------------------------------------------------
# Conv / BN folding / pooling / resize wrappers (NHWC glue inside one jit)
# --------------------------------------------------------------------------

def fold_conv_bn(w_oihw, bn, eps=1e-5):
    """Fold eval-mode BN into the conv: returns (K,Cout) weight with the BN
    scale baked in, plus the per-channel bias."""
    cout = w_oihw.shape[0]
    scale = bn["gamma"] / jnp.sqrt(bn["var"] + eps)
    bias = bn["beta"] - bn["mean"] * scale
    wmat = jnp.transpose(w_oihw, (2, 3, 1, 0)).reshape(-1, cout) * scale[None, :]
    return wmat, bias


def conv_matrix(w_oihw):
    cout = w_oihw.shape[0]
    return jnp.transpose(w_oihw, (2, 3, 1, 0)).reshape(-1, cout)


def conv2d(x, wmat, bias, kh, kw, stride=1, padding=0, dilation=1,
           relu=True, residual=None, out_dtype=jnp.bfloat16):
    """Conv2d + bias (+ column-masked ReLU) (+ fused residual add+ReLU).

    x is NHWC.  `relu` may be True / False / int (see matmul_bias_act).
    When `residual` is given, the epilogue is always relu(acc+bias+residual)."""
    if residual is not None:
        assert relu is True, "residual epilogue always applies ReLU"
    n, h, w, cin = x.shape
    cout = wmat.shape[1]
    oh = (h + 2 * padding - dilation * (kh - 1) - 1) // stride + 1
    ow = (w + 2 * padding - dilation * (kw - 1) - 1) // stride + 1

    if kh == 1 and kw == 1 and padding == 0:
        xs = x if stride == 1 else x[:, ::stride, ::stride, :][:, :oh, :ow, :]
        p = xs.reshape(n * oh * ow, cin)
    else:
        xp = x
        if padding > 0:
            xp = jnp.pad(x, ((0, 0), (padding, padding),
                             (padding, padding), (0, 0)))
        patches = []
        for i in range(kh):
            for j in range(kw):
                h0 = i * dilation
                w0 = j * dilation
                patches.append(
                    xp[:, h0:h0 + stride * (oh - 1) + 1:stride,
                           w0:w0 + stride * (ow - 1) + 1:stride, :])
        p = jnp.concatenate(patches, axis=-1).reshape(n * oh * ow, kh * kw * cin)

    r = None
    if residual is not None:
        r = residual.reshape(n * oh * ow, cout)

    y = matmul_bias_act(p, wmat, bias, relu, residual=r, out_dtype=out_dtype)
    return y.reshape(n, oh, ow, cout)


def max_pool_3x3_s2_p1(x):  # NHWC
    return lax.reduce_window(
        x, jnp.asarray(-jnp.inf, x.dtype), lax.max,
        window_dimensions=(1, 3, 3, 1),
        window_strides=(1, 2, 2, 1),
        padding=[(0, 0), (1, 1), (1, 1), (0, 0)])


@functools.lru_cache(maxsize=None)
def _pool_matrix(in_size, out_size):
    """PyTorch AdaptiveAvgPool2d window weights as a (out_size, in_size) matrix."""
    m = np.zeros((out_size, in_size), np.float32)
    for i in range(out_size):
        s = (i * in_size) // out_size
        e = -(-((i + 1) * in_size) // out_size)
        m[i, s:e] = 1.0 / (e - s)
    return jnp.asarray(m)


def adaptive_avg_pool(x, out_size):  # NHWC
    _, h, w, _ = x.shape
    mh = _pool_matrix(h, out_size)
    mw = _pool_matrix(w, out_size)
    y = jnp.einsum("oh,nhwc->nowc", mh, x)
    return jnp.einsum("pw,nowc->nopc", mw, y)


@functools.lru_cache(maxsize=None)
def _interp_matrix(in_size, out_size):
    """Bilinear (align_corners=True) interpolation matrix (out_size, in_size)."""
    if in_size == 1:
        return jnp.ones((out_size, 1), jnp.float32)
    if out_size == 1:
        m = np.zeros((1, in_size), np.float32)
        m[0, 0] = 1.0
        return jnp.asarray(m)
    src = np.arange(out_size, dtype=np.float64) * (in_size - 1) / (out_size - 1)
    lo = np.floor(src).astype(np.int64)
    hi = np.minimum(lo + 1, in_size - 1)
    w_hi = (src - lo).astype(np.float32)
    w_lo = 1.0 - w_hi
    m = np.zeros((out_size, in_size), np.float32)
    m[np.arange(out_size), lo] += w_lo
    m[np.arange(out_size), hi] += w_hi
    return jnp.asarray(m)


def bilinear_resize(x, out_h, out_w):  # NHWC
    _, h, w, _ = x.shape
    mh = _interp_matrix(h, out_h)
    mw = _interp_matrix(w, out_w)
    y = jnp.einsum("oh,nhwc->nowc", mh, x)
    y = jnp.einsum("pw,nowc->nopc", mw, y)
    return y


# --------------------------------------------------------------------------
# Deterministic parameter init (shapes per PSPNet.__init__, widths scaled /16)
# --------------------------------------------------------------------------

class KeyGen:
    def __init__(self, seed):
        self.key = jax.random.PRNGKey(seed)

    def __call__(self):
        self.key, sub = jax.random.split(self.key)
        return sub


def init_conv(kg, cout, cin, kh, kw, bias=False):
    fan_in = cin * kh * kw
    w = jax.random.normal(kg(), (cout, cin, kh, kw), jnp.float32) * np.sqrt(2.0 / fan_in)
    p = {"w": w}
    if bias:
        p["b"] = jax.random.normal(kg(), (cout,), jnp.float32) * 0.01
    return p


def init_bn(kg, c):
    return {
        "gamma": 1.0 + 0.1 * jax.random.normal(kg(), (c,), jnp.float32),
        "beta": 0.05 * jax.random.normal(kg(), (c,), jnp.float32),
        "mean": 0.05 * jax.random.normal(kg(), (c,), jnp.float32),
        "var": 1.0 + 0.1 * jax.random.uniform(kg(), (c,), jnp.float32),
    }


def init_bottleneck(kg, inplanes, planes, stride, dilation, downsample):
    p = {
        "conv1": init_conv(kg, planes, inplanes, 1, 1), "bn1": init_bn(kg, planes),
        "conv2": init_conv(kg, planes, planes, 3, 3), "bn2": init_bn(kg, planes),
        "conv3": init_conv(kg, planes * 4, planes, 1, 1), "bn3": init_bn(kg, planes * 4),
        "stride": stride, "dilation": dilation,
    }
    if downsample:
        p["ds_conv"] = init_conv(kg, planes * 4, inplanes, 1, 1)
        p["ds_bn"] = init_bn(kg, planes * 4)
    return p


def init_layer(kg, inplanes, planes, blocks, stride, dilation):
    downsample = (stride != 1) or (inplanes != planes * 4)
    layer = [init_bottleneck(kg, inplanes, planes, stride, dilation, downsample)]
    for _ in range(1, blocks):
        layer.append(init_bottleneck(kg, planes * 4, planes, 1, dilation, False))
    return layer


def init_pspnet(kg, classes=21, bins=(1, 2, 3, 6), base=4):
    params = {}
    # deep-stem layer0 of the PSPNet ResNet: 3x3(s2) -> 3x3 -> 3x3
    params["stem"] = {
        "conv1": init_conv(kg, base, 3, 3, 3), "bn1": init_bn(kg, base),
        "conv2": init_conv(kg, base, base, 3, 3), "bn2": init_bn(kg, base),
        "conv3": init_conv(kg, 2 * base, base, 3, 3), "bn3": init_bn(kg, 2 * base),
    }
    # ResNet-50 block counts (3, 4, 6, 3); layer3/4 dilated with stride 1
    params["layer1"] = init_layer(kg, 2 * base, base, 3, stride=1, dilation=1)
    params["layer2"] = init_layer(kg, 4 * base, 2 * base, 4, stride=2, dilation=1)
    params["layer3"] = init_layer(kg, 8 * base, 4 * base, 6, stride=1, dilation=2)
    params["layer4"] = init_layer(kg, 16 * base, 8 * base, 3, stride=1, dilation=4)

    fea_dim = 32 * base                       # scaled analogue of 2048
    red_dim = fea_dim // len(bins)
    params["ppm"] = [{"bin": b,
                      "conv": init_conv(kg, red_dim, fea_dim, 1, 1),
                      "bn": init_bn(kg, red_dim)} for b in bins]
    fea_dim *= 2
    mid = 8 * base                            # scaled analogue of 512
    params["cls"] = {
        "conv1": init_conv(kg, mid, fea_dim, 3, 3), "bn1": init_bn(kg, mid),
        "conv2": init_conv(kg, classes, mid, 1, 1, bias=True),
    }
    return params


# --------------------------------------------------------------------------
# Forward pass (eval mode, NHWC / bf16 activations internally)
# --------------------------------------------------------------------------

def bottleneck_forward(p, x):
    stride, dil = p["stride"], p["dilation"]
    planes = p["bn1"]["gamma"].shape[0]

    w1, b1 = fold_conv_bn(p["conv1"]["w"], p["bn1"])
    if "ds_conv" in p:
        # conv1 (ReLU) and downsample (linear identity) share the same input:
        # one merged matmul with a per-column ReLU mask.  conv1 is stride 1;
        # the 1x1 downsample's stride is a spatial subsample of the result.
        wd, bd = fold_conv_bn(p["ds_conv"]["w"], p["ds_bn"])
        w_cat = jnp.concatenate([w1, wd], axis=1)
        b_cat = jnp.concatenate([b1, bd], axis=0)
        y = conv2d(x, w_cat, b_cat, 1, 1, relu=planes)
        out = y[..., :planes]
        identity = y[..., planes:]
        if stride != 1:
            identity = identity[:, ::stride, ::stride, :]
    else:
        out = conv2d(x, w1, b1, 1, 1, relu=True)
        identity = x

    w2, b2 = fold_conv_bn(p["conv2"]["w"], p["bn2"])
    out = conv2d(out, w2, b2, 3, 3, stride=stride, padding=dil,
                 dilation=dil, relu=True)

    # conv3 + BN + residual add + ReLU fused into one Pallas epilogue
    w3, b3 = fold_conv_bn(p["conv3"]["w"], p["bn3"])
    out = conv2d(out, w3, b3, 1, 1, relu=True, residual=identity)
    return out


def ppm_forward(ppm_params, x):
    n, h, w, c = x.shape
    # All four branch convs are 1x1 over the same fea_dim: run ONE matmul over
    # the concatenated pooled rows against the concatenated weight columns,
    # then slice each branch's (rows, cols) block back out.
    pooled, row_sizes = [], []
    wms, bs, red_dims = [], [], []
    for p in ppm_params:
        b = p["bin"]
        pooled.append(adaptive_avg_pool(x, b).reshape(n * b * b, c))
        row_sizes.append(n * b * b)
        wm, bb = fold_conv_bn(p["conv"]["w"], p["bn"])
        wms.append(wm)
        bs.append(bb)
        red_dims.append(p["conv"]["w"].shape[0])

    p_all = jnp.concatenate(pooled, axis=0)
    w_all = jnp.concatenate(wms, axis=1)
    b_all = jnp.concatenate(bs, axis=0)
    y = matmul_bias_act(p_all, w_all, b_all, relu=True)

    outs = [x]
    row0, col0 = 0, 0
    for p, rows, red in zip(ppm_params, row_sizes, red_dims):
        b = p["bin"]
        yb = y[row0:row0 + rows, col0:col0 + red].reshape(n, b, b, red)
        outs.append(bilinear_resize(yb, h, w))
        row0 += rows
        col0 += red
    return jnp.concatenate(outs, axis=-1)


def cls_forward(p, x, classes):
    wm, b = fold_conv_bn(p["conv1"]["w"], p["bn1"])
    x = conv2d(x, wm, b, 3, 3, padding=1, relu=True)
    # Dropout2d(p=0.1) is identity in eval mode.
    wm2 = conv_matrix(p["conv2"]["w"])
    x = conv2d(x, wm2, p["conv2"]["b"], 1, 1, relu=False,
               out_dtype=jnp.float32)
    return x


def pspnet_forward(params, x_nchw, classes, zoom_factor=8):
    n, c, hh, ww = x_nchw.shape
    assert (hh - 1) % 8 == 0 and (ww - 1) % 8 == 0
    h = (hh - 1) // 8 * zoom_factor + 1
    w = (ww - 1) // 8 * zoom_factor + 1

    # NCHW -> NHWC once; bf16 activations through the backbone.
    x = jnp.transpose(x_nchw, (0, 2, 3, 1)).astype(jnp.bfloat16)

    # layer0: conv-bn-relu x3 + maxpool
    stem = params["stem"]
    ws, bs = fold_conv_bn(stem["conv1"]["w"], stem["bn1"])
    x = conv2d(x, ws, bs, 3, 3, stride=2, padding=1, relu=True)
    ws, bs = fold_conv_bn(stem["conv2"]["w"], stem["bn2"])
    x = conv2d(x, ws, bs, 3, 3, stride=1, padding=1, relu=True)
    ws, bs = fold_conv_bn(stem["conv3"]["w"], stem["bn3"])
    x = conv2d(x, ws, bs, 3, 3, stride=1, padding=1, relu=True)
    x = max_pool_3x3_s2_p1(x)

    for blk in params["layer1"]:
        x = bottleneck_forward(blk, x)
    for blk in params["layer2"]:
        x = bottleneck_forward(blk, x)
    for blk in params["layer3"]:
        x = bottleneck_forward(blk, x)
    # TODO(synk): x at this point would feed the aux head in training mode.
    for blk in params["layer4"]:
        x = bottleneck_forward(blk, x)

    x = ppm_forward(params["ppm"], x)
    x = cls_forward(params["cls"], x, classes)

    if zoom_factor != 1:
        x = bilinear_resize(x, h, w)

    return jnp.transpose(x, (0, 3, 1, 2)).astype(jnp.float32)   # NHWC -> NCHW


# --------------------------------------------------------------------------

if __name__ == "__main__":
    classes = 21
    kg = KeyGen(42)
    params = init_pspnet(kg, classes=classes, bins=(1, 2, 3, 6), base=4)

    x = jax.random.normal(jax.random.PRNGKey(0), (2, 3, 33, 33), jnp.float32)

    # Single jit over the whole forward; params are closed over (static ints
    # like stride/dilation/bin stay Python values).
    forward = jax.jit(functools.partial(pspnet_forward, params,
                                        classes=classes, zoom_factor=8))

    out = forward(x)
    out = jax.block_until_ready(out)

    assert out.shape == (2, classes, 33, 33), out.shape
    assert out.dtype == jnp.float32
    assert bool(jnp.all(jnp.isfinite(out)))
    print("KERNEL_OK")
</pallas_src>

<mosaic_0001>
module attributes {stable_mosaic.version = 11 : i64} {
  func.func @_mm_kernel(%arg0: i32, %arg1: i32, %arg2: i32, %arg3: memref<128x128xbf16, #tpu.memory_space<vmem>>, %arg4: memref<128x128xbf16, #tpu.memory_space<vmem>>, %arg5: memref<1x128xf32, #tpu.memory_space<vmem>>, %arg6: memref<1x128xf32, #tpu.memory_space<vmem>>, %arg7: memref<128x128xbf16, #tpu.memory_space<vmem>>, %arg8: memref<128x128xf32, #tpu.memory_space<vmem>>) attributes {dimension_semantics = [#tpu.dimension_semantics<parallel>, #tpu.dimension_semantics<parallel>, #tpu.dimension_semantics<arbitrary>], iteration_bounds = array<i64: 5, 1, 1>, scalar_prefetch = 0 : i64, scratch_operands = 1 : i64, tpu.core_type = #tpu.core_type<tc>, window_params = [{transform_indices = @transform_0, window_bounds = array<i64: 128, 128>}, {transform_indices = @transform_1, window_bounds = array<i64: 128, 128>}, {transform_indices = @transform_2, window_bounds = array<i64: 1, 128>}, {transform_indices = @transform_3, window_bounds = array<i64: 1, 128>}, {transform_indices = @transform_4, window_bounds = array<i64: 128, 128>}]} {
    %c0_i32 = arith.constant 0 : i32
    %0 = arith.cmpi eq, %arg2, %c0_i32 : i32
    %1 = arith.extui %0 : i1 to i32
    %c0_i32_0 = arith.constant 0 : i32
    %2 = arith.cmpi ne, %1, %c0_i32_0 : i32
    scf.if %2 {
      %cst_10 = arith.constant 0.000000e+00 : f32
      %12 = vector.broadcast %cst_10 : f32 to vector<128x128xf32>
      %c0_11 = arith.constant 0 : index
      %c0_12 = arith.constant 0 : index
      %13 = vector.load %arg8[%c0_11, %c0_12] : memref<128x128xf32, #tpu.memory_space<vmem>>, vector<128x128xf32>
      tpu.vector_store %arg8[%c0_11, %c0_12], %12 {strides = array<i32>} : memref<128x128xf32, #tpu.memory_space<vmem>>, vector<128x128xf32>,
    } else {
    }
    %c0 = arith.constant 0 : index
    %c0_1 = arith.constant 0 : index
    %3 = vector.load %arg8[%c0, %c0_1] : memref<128x128xf32, #tpu.memory_space<vmem>>, vector<128x128xf32>
    %c0_2 = arith.constant 0 : index
    %c0_3 = arith.constant 0 : index
    %4 = vector.load %arg3[%c0_2, %c0_3] : memref<128x128xbf16, #tpu.memory_space<vmem>>, vector<128x128xbf16>
    %c0_4 = arith.constant 0 : index
    %c0_5 = arith.constant 0 : index
    %5 = vector.load %arg4[%c0_4, %c0_5] : memref<128x128xbf16, #tpu.memory_space<vmem>>, vector<128x128xbf16>
    %cst = arith.constant dense<0.000000e+00> : vector<128x128xf32>
    %6 = tpu.matmul %4, %5, %cst {dimension_numbers = #tpu.dot_dimension_numbers<[1], [0], [0], [1], [0, 0, 1, 1], [], []>} : vector<128x128xbf16>, vector<128x128xbf16>, vector<128x128xf32> -> vector<128x128xf32>
    %7 = arith.addf %3, %6 : vector<128x128xf32>
    %c0_6 = arith.constant 0 : index
    %c0_7 = arith.constant 0 : index
    %8 = vector.load %arg8[%c0_6, %c0_7] : memref<128x128xf32, #tpu.memory_space<vmem>>, vector<128x128xf32>
    tpu.vector_store %arg8[%c0_6, %c0_7], %7 {strides = array<i32>} : memref<128x128xf32, #tpu.memory_space<vmem>>, vector<128x128xf32>,
    %c0_i32_8 = arith.constant 0 : i32
    %9 = arith.cmpi eq, %arg2, %c0_i32_8 : i32
    %10 = arith.extui %9 : i1 to i32
    %c0_i32_9 = arith.constant 0 : i32
    %11 = arith.cmpi ne, %10, %c0_i32_9 : i32
    scf.if %11 {
      %c0_10 = arith.constant 0 : index
      %c0_11 = arith.constant 0 : index
      %12 = vector.load %arg8[%c0_10, %c0_11] : memref<128x128xf32, #tpu.memory_space<vmem>>, vector<128x128xf32>
      %c0_12 = arith.constant 0 : index
      %c0_13 = arith.constant 0 : index
      %13 = vector.load %arg5[%c0_12, %c0_13] : memref<1x128xf32, #tpu.memory_space<vmem>>, vector<1x128xf32>
      %14 = vector.broadcast %13 : vector<1x128xf32> to vector<128x128xf32>
      %15 = arith.addf %12, %14 : vector<128x128xf32>
      %c0_14 = arith.constant 0 : index
      %c0_15 = arith.constant 0 : index
      %16 = vector.load %arg6[%c0_14, %c0_15] : memref<1x128xf32, #tpu.memory_space<vmem>>, vector<1x128xf32>
      %cst_16 = arith.constant 5.000000e-01 : f32
      %17 = vector.broadcast %cst_16 : f32 to vector<1x128xf32>
      %18 = arith.cmpf ogt, %16, %17 : vector<1x128xf32>
      %cst_17 = arith.constant 0.000000e+00 : f32
      %19 = vector.broadcast %cst_17 : f32 to vector<128x128xf32>
      %20 = arith.maximumf %15, %19 : vector<128x128xf32>
      %21 = vector.shape_cast %18 : vector<1x128xi1> to vector<1x128xi1>
      %22 = vector.broadcast %21 : vector<1x128xi1> to vector<128x128xi1>
      %23 = arith.select %22, %20, %15 : vector<128x128xi1>, vector<128x128xf32>
      %24 = arith.truncf %23 : vector<128x128xf32> to vector<128x128xbf16>
      %c0_18 = arith.constant 0 : index
      %c0_19 = arith.constant 0 : index
      %25 = vector.load %arg7[%c0_18, %c0_19] : memref<128x128xbf16, #tpu.memory_space<vmem>>, vector<128x128xbf16>
      tpu.vector_store %arg7[%c0_18, %c0_19], %24 {strides = array<i32>} : memref<128x128xbf16, #tpu.memory_space<vmem>>, vector<128x128xbf16>,
    } else {
    }
    return
  }
  func.func @transform_0(%arg0: i32, %arg1: i32, %arg2: i32) -> (i32, i32) {
    %c0_i32 = arith.constant 0 : i32
    return %arg0, %arg2 : i32, i32
  }
  func.func @transform_1(%arg0: i32, %arg1: i32, %arg2: i32) -> (i32, i32) {
    %c0_i32 = arith.constant 0 : i32
    return %arg2, %arg1 : i32, i32
  }
  func.func @transform_2(%arg0: i32, %arg1: i32, %arg2: i32) -> (i32, i32) {
    %c0_i32 = arith.constant 0 : i32
    %c0_i32_0 = arith.constant 0 : i32
    return %c0_i32, %arg1 : i32, i32
  }
  func.func @transform_3(%arg0: i32, %arg1: i32, %arg2: i32) -> (i32, i32) {
    %c0_i32 = arith.constant 0 : i32
    %c0_i32_0 = arith.constant 0 : i32
    return %c0_i32, %arg1 : i32, i32
  }
  func.func @transform_4(%arg0: i32, %arg1: i32, %arg2: i32) -> (i32, i32) {
    %c0_i32 = arith.constant 0 : i32
    return %arg0, %arg1 : i32, i32
  }
}

module attributes {stable_mosaic.version = 11 : i64} {
  func.func @_mm_kernel(%arg0: i32, %arg1: i32, %arg2: i32, %arg3: memref<96x128xbf16, #tpu.memory_space<vmem>>, %arg4: memref<128x128xbf16, #tpu.memory_space<vmem>>, %arg5: memref<1x128xf32, #tpu.memory_space<vmem>>, %arg6: memref<1x128xf32, #tpu.memory_space<vmem>>, %arg7: memref<96x128xbf16, #tpu.memory_space<vmem>>, %arg8: memref<96x128xf32, #tpu.memory_space<vmem>>) attributes {dimension_semantics = [#tpu.dimension_semantics<parallel>, #tpu.dimension_semantics<parallel>, #tpu.dimension_semantics<arbitrary>], iteration_bounds = array<i64: 2, 1, 1>, scalar_prefetch = 0 : i64, scratch_operands = 1 : i64, tpu.core_type = #tpu.core_type<tc>, window_params = [{transform_indices = @transform_0, window_bounds = array<i64: 96, 128>}, {transform_indices = @transform_1, window_bounds = array<i64: 128, 128>}, {transform_indices = @transform_2, window_bounds = array<i64: 1, 128>}, {transform_indices = @transform_3, window_bounds = array<i64: 1, 128>}, {transform_indices = @transform_4, window_bounds = array<i64: 96, 128>}]} {
    %c0_i32 = arith.constant 0 : i32
    %0 = arith.cmpi eq, %arg2, %c0_i32 : i32
    %1 = arith.extui %0 : i1 to i32
    %c0_i32_0 = arith.constant 0 : i32
    %2 = arith.cmpi ne, %1, %c0_i32_0 : i32
    scf.if %2 {
      %cst_10 = arith.constant 0.000000e+00 : f32
      %12 = vector.broadcast %cst_10 : f32 to vector<96x128xf32>
      %c0_11 = arith.constant 0 : index
      %c0_12 = arith.constant 0 : index
      %13 = vector.load %arg8[%c0_11, %c0_12] : memref<96x128xf32, #tpu.memory_space<vmem>>, vector<96x128xf32>
      tpu.vector_store %arg8[%c0_11, %c0_12], %12 {strides = array<i32>} : memref<96x128xf32, #tpu.memory_space<vmem>>, vector<96x128xf32>,
    } else {
    }
    %c0 = arith.constant 0 : index
    %c0_1 = arith.constant 0 : index
    %3 = vector.load %arg8[%c0, %c0_1] : memref<96x128xf32, #tpu.memory_space<vmem>>, vector<96x128xf32>
    %c0_2 = arith.constant 0 : index
    %c0_3 = arith.constant 0 : index
    %4 = vector.load %arg3[%c0_2, %c0_3] : memref<96x128xbf16, #tpu.memory_space<vmem>>, vector<96x128xbf16>
    %c0_4 = arith.constant 0 : index
    %c0_5 = arith.constant 0 : index
    %5 = vector.load %arg4[%c0_4, %c0_5] : memref<128x128xbf16, #tpu.memory_space<vmem>>, vector<128x128xbf16>
    %cst = arith.constant dense<0.000000e+00> : vector<96x128xf32>
    %6 = tpu.matmul %4, %5, %cst {dimension_numbers = #tpu.dot_dimension_numbers<[1], [0], [0], [1], [0, 0, 1, 1], [], []>} : vector<96x128xbf16>, vector<128x128xbf16>, vector<96x128xf32> -> vector<96x128xf32>
    %7 = arith.addf %3, %6 : vector<96x128xf32>
    %c0_6 = arith.constant 0 : index
    %c0_7 = arith.constant 0 : index
    %8 = vector.load %arg8[%c0_6, %c0_7] : memref<96x128xf32, #tpu.memory_space<vmem>>, vector<96x128xf32>
    tpu.vector_store %arg8[%c0_6, %c0_7], %7 {strides = array<i32>} : memref<96x128xf32, #tpu.memory_space<vmem>>, vector<96x128xf32>,
    %c0_i32_8 = arith.constant 0 : i32
    %9 = arith.cmpi eq, %arg2, %c0_i32_8 : i32
    %10 = arith.extui %9 : i1 to i32
    %c0_i32_9 = arith.constant 0 : i32
    %11 = arith.cmpi ne, %10, %c0_i32_9 : i32
    scf.if %11 {
      %c0_10 = arith.constant 0 : index
      %c0_11 = arith.constant 0 : index
      %12 = vector.load %arg8[%c0_10, %c0_11] : memref<96x128xf32, #tpu.memory_space<vmem>>, vector<96x128xf32>
      %c0_12 = arith.constant 0 : index
      %c0_13 = arith.constant 0 : index
      %13 = vector.load %arg5[%c0_12, %c0_13] : memref<1x128xf32, #tpu.memory_space<vmem>>, vector<1x128xf32>
      %14 = vector.broadcast %13 : vector<1x128xf32> to vector<96x128xf32>
      %15 = arith.addf %12, %14 : vector<96x128xf32>
      %c0_14 = arith.constant 0 : index
      %c0_15 = arith.constant 0 : index
      %16 = vector.load %arg6[%c0_14, %c0_15] : memref<1x128xf32, #tpu.memory_space<vmem>>, vector<1x128xf32>
      %cst_16 = arith.constant 5.000000e-01 : f32
      %17 = vector.broadcast %cst_16 : f32 to vector<1x128xf32>
      %18 = arith.cmpf ogt, %16, %17 : vector<1x128xf32>
      %cst_17 = arith.constant 0.000000e+00 : f32
      %19 = vector.broadcast %cst_17 : f32 to vector<96x128xf32>
      %20 = arith.maximumf %15, %19 : vector<96x128xf32>
      %21 = vector.shape_cast %18 : vector<1x128xi1> to vector<1x128xi1>
      %22 = vector.broadcast %21 : vector<1x128xi1> to vector<96x128xi1>
      %23 = arith.select %22, %20, %15 : vector<96x128xi1>, vector<96x128xf32>
      %24 = arith.truncf %23 : vector<96x128xf32> to vector<96x128xbf16>
      %c0_18 = arith.constant 0 : index
      %c0_19 = arith.constant 0 : index
      %25 = vector.load %arg7[%c0_18, %c0_19] : memref<96x128xbf16, #tpu.memory_space<vmem>>, vector<96x128xbf16>
      tpu.vector_store %arg7[%c0_18, %c0_19], %24 {strides = array<i32>} : memref<96x128xbf16, #tpu.memory_space<vmem>>, vector<96x128xbf16>,
    } else {
    }
    return
  }
  func.func @transform_0(%arg0: i32, %arg1: i32, %arg2: i32) -> (i32, i32) {
    %c0_i32 = arith.constant 0 : i32
    return %arg0, %arg2 : i32, i32
  }
  func.func @transform_1(%arg0: i32, %arg1: i32, %arg2: i32) -> (i32, i32) {
    %c0_i32 = arith.constant 0 : i32
    return %arg2, %arg1 : i32, i32
  }
  func.func @transform_2(%arg0: i32, %arg1: i32, %arg2: i32) -> (i32, i32) {
    %c0_i32 = arith.constant 0 : i32
    %c0_i32_0 = arith.constant 0 : i32
    return %c0_i32, %arg1 : i32, i32
  }
  func.func @transform_3(%arg0: i32, %arg1: i32, %arg2: i32) -> (i32, i32) {
    %c0_i32 = arith.constant 0 : i32
    %c0_i32_0 = arith.constant 0 : i32
    return %c0_i32, %arg1 : i32, i32
  }
  func.func @transform_4(%arg0: i32, %arg1: i32, %arg2: i32) -> (i32, i32) {
    %c0_i32 = arith.constant 0 : i32
    return %arg0, %arg1 : i32, i32
  }
}

module attributes {stable_mosaic.version = 11 : i64} {
  func.func @_mm_res_kernel(%arg0: i32, %arg1: i32, %arg2: i32, %arg3: memref<96x128xbf16, #tpu.memory_space<vmem>>, %arg4: memref<128x128xbf16, #tpu.memory_space<vmem>>, %arg5: memref<1x128xf32, #tpu.memory_space<vmem>>, %arg6: memref<96x128xbf16, #tpu.memory_space<vmem>>, %arg7: memref<96x128xbf16, #tpu.memory_space<vmem>>, %arg8: memref<96x128xf32, #tpu.memory_space<vmem>>) attributes {dimension_semantics = [#tpu.dimension_semantics<parallel>, #tpu.dimension_semantics<parallel>, #tpu.dimension_semantics<arbitrary>], iteration_bounds = array<i64: 2, 1, 1>, scalar_prefetch = 0 : i64, scratch_operands = 1 : i64, tpu.core_type = #tpu.core_type<tc>, window_params = [{transform_indices = @transform_0, window_bounds = array<i64: 96, 128>}, {transform_indices = @transform_1, window_bounds = array<i64: 128, 128>}, {transform_indices = @transform_2, window_bounds = array<i64: 1, 128>}, {transform_indices = @transform_3, window_bounds = array<i64: 96, 128>}, {transform_indices = @transform_4, window_bounds = array<i64: 96, 128>}]} {
    %c0_i32 = arith.constant 0 : i32
    %0 = arith.cmpi eq, %arg2, %c0_i32 : i32
    %1 = arith.extui %0 : i1 to i32
    %c0_i32_0 = arith.constant 0 : i32
    %2 = arith.cmpi ne, %1, %c0_i32_0 : i32
    scf.if %2 {
      %cst_10 = arith.constant 0.000000e+00 : f32
      %12 = vector.broadcast %cst_10 : f32 to vector<96x128xf32>
      %c0_11 = arith.constant 0 : index
      %c0_12 = arith.constant 0 : index
      %13 = vector.load %arg8[%c0_11, %c0_12] : memref<96x128xf32, #tpu.memory_space<vmem>>, vector<96x128xf32>
      tpu.vector_store %arg8[%c0_11, %c0_12], %12 {strides = array<i32>} : memref<96x128xf32, #tpu.memory_space<vmem>>, vector<96x128xf32>,
    } else {
    }
    %c0 = arith.constant 0 : index
    %c0_1 = arith.constant 0 : index
    %3 = vector.load %arg8[%c0, %c0_1] : memref<96x128xf32, #tpu.memory_space<vmem>>, vector<96x128xf32>
    %c0_2 = arith.constant 0 : index
    %c0_3 = arith.constant 0 : index
    %4 = vector.load %arg3[%c0_2, %c0_3] : memref<96x128xbf16, #tpu.memory_space<vmem>>, vector<96x128xbf16>
    %c0_4 = arith.constant 0 : index
    %c0_5 = arith.constant 0 : index
    %5 = vector.load %arg4[%c0_4, %c0_5] : memref<128x128xbf16, #tpu.memory_space<vmem>>, vector<128x128xbf16>
    %cst = arith.constant dense<0.000000e+00> : vector<96x128xf32>
    %6 = tpu.matmul %4, %5, %cst {dimension_numbers = #tpu.dot_dimension_numbers<[1], [0], [0], [1], [0, 0, 1, 1], [], []>} : vector<96x128xbf16>, vector<128x128xbf16>, vector<96x128xf32> -> vector<96x128xf32>
    %7 = arith.addf %3, %6 : vector<96x128xf32>
    %c0_6 = arith.constant 0 : index
    %c0_7 = arith.constant 0 : index
    %8 = vector.load %arg8[%c0_6, %c0_7] : memref<96x128xf32, #tpu.memory_space<vmem>>, vector<96x128xf32>
    tpu.vector_store %arg8[%c0_6, %c0_7], %7 {strides = array<i32>} : memref<96x128xf32, #tpu.memory_space<vmem>>, vector<96x128xf32>,
    %c0_i32_8 = arith.constant 0 : i32
    %9 = arith.cmpi eq, %arg2, %c0_i32_8 : i32
    %10 = arith.extui %9 : i1 to i32
    %c0_i32_9 = arith.constant 0 : i32
    %11 = arith.cmpi ne, %10, %c0_i32_9 : i32
    scf.if %11 {
      %c0_10 = arith.constant 0 : index
      %c0_11 = arith.constant 0 : index
      %12 = vector.load %arg8[%c0_10, %c0_11] : memref<96x128xf32, #tpu.memory_space<vmem>>, vector<96x128xf32>
      %c0_12 = arith.constant 0 : index
      %c0_13 = arith.constant 0 : index
      %13 = vector.load %arg5[%c0_12, %c0_13] : memref<1x128xf32, #tpu.memory_space<vmem>>, vector<1x128xf32>
      %14 = vector.broadcast %13 : vector<1x128xf32> to vector<96x128xf32>
      %15 = arith.addf %12, %14 : vector<96x128xf32>
      %c0_14 = arith.constant 0 : index
      %c0_15 = arith.constant 0 : index
      %16 = vector.load %arg6[%c0_14, %c0_15] : memref<96x128xbf16, #tpu.memory_space<vmem>>, vector<96x128xbf16>
      %17 = arith.extf %16 : vector<96x128xbf16> to vector<96x128xf32>
      %18 = arith.addf %15, %17 : vector<96x128xf32>
      %cst_16 = arith.constant 0.000000e+00 : f32
      %19 = vector.broadcast %cst_16 : f32 to vector<96x128xf32>
      %20 = arith.maximumf %18, %19 : vector<96x128xf32>
      %21 = arith.truncf %20 : vector<96x128xf32> to vector<96x128xbf16>
      %c0_17 = arith.constant 0 : index
      %c0_18 = arith.constant 0 : index
      %22 = vector.load %arg7[%c0_17, %c0_18] : memref<96x128xbf16, #tpu.memory_space<vmem>>, vector<96x128xbf16>
      tpu.vector_store %arg7[%c0_17, %c0_18], %21 {strides = array<i32>} : memref<96x128xbf16, #tpu.memory_space<vmem>>, vector<96x128xbf16>,
    } else {
    }
    return
  }
  func.func @transform_0(%arg0: i32, %arg1: i32, %arg2: i32) -> (i32, i32) {
    %c0_i32 = arith.constant 0 : i32
    return %arg0, %arg2 : i32, i32
  }
  func.func @transform_1(%arg0: i32, %arg1: i32, %arg2: i32) -> (i32, i32) {
    %c0_i32 = arith.constant 0 : i32
    return %arg2, %arg1 : i32, i32
  }
  func.func @transform_2(%arg0: i32, %arg1: i32, %arg2: i32) -> (i32, i32) {
    %c0_i32 = arith.constant 0 : i32
    %c0_i32_0 = arith.constant 0 : i32
    return %c0_i32, %arg1 : i32, i32
  }
  func.func @transform_3(%arg0: i32, %arg1: i32, %arg2: i32) -> (i32, i32) {
    %c0_i32 = arith.constant 0 : i32
    return %arg0, %arg1 : i32, i32
  }
  func.func @transform_4(%arg0: i32, %arg1: i32, %arg2: i32) -> (i32, i32) {
    %c0_i32 = arith.constant 0 : i32
    return %arg0, %arg1 : i32, i32
  }
}

module attributes {stable_mosaic.version = 11 : i64} {
  func.func @_mm_kernel(%arg0: i32, %arg1: i32, %arg2: i32, %arg3: memref<32x128xbf16, #tpu.memory_space<vmem>>, %arg4: memref<128x128xbf16, #tpu.memory_space<vmem>>, %arg5: memref<1x128xf32, #tpu.memory_space<vmem>>, %arg6: memref<1x128xf32, #tpu.memory_space<vmem>>, %arg7: memref<32x128xbf16, #tpu.memory_space<vmem>>, %arg8: memref<32x128xf32, #tpu.memory_space<vmem>>) attributes {dimension_semantics = [#tpu.dimension_semantics<parallel>, #tpu.dimension_semantics<parallel>, #tpu.dimension_semantics<arbitrary>], iteration_bounds = array<i64: 2, 1, 1>, scalar_prefetch = 0 : i64, scratch_operands = 1 : i64, tpu.core_type = #tpu.core_type<tc>, window_params = [{transform_indices = @transform_0, window_bounds = array<i64: 32, 128>}, {transform_indices = @transform_1, window_bounds = array<i64: 128, 128>}, {transform_indices = @transform_2, window_bounds = array<i64: 1, 128>}, {transform_indices = @transform_3, window_bounds = array<i64: 1, 128>}, {transform_indices = @transform_4, window_bounds = array<i64: 32, 128>}]} {
    %c0_i32 = arith.constant 0 : i32
    %0 = arith.cmpi eq, %arg2, %c0_i32 : i32
    %1 = arith.extui %0 : i1 to i32
    %c0_i32_0 = arith.constant 0 : i32
    %2 = arith.cmpi ne, %1, %c0_i32_0 : i32
    scf.if %2 {
      %cst_10 = arith.constant 0.000000e+00 : f32
      %12 = vector.broadcast %cst_10 : f32 to vector<32x128xf32>
      %c0_11 = arith.constant 0 : index
      %c0_12 = arith.constant 0 : index
      %13 = vector.load %arg8[%c0_11, %c0_12] : memref<32x128xf32, #tpu.memory_space<vmem>>, vector<32x128xf32>
      tpu.vector_store %arg8[%c0_11, %c0_12], %12 {strides = array<i32>} : memref<32x128xf32, #tpu.memory_space<vmem>>, vector<32x128xf32>,
    } else {
    }
    %c0 = arith.constant 0 : index
    %c0_1 = arith.constant 0 : index
    %3 = vector.load %arg8[%c0, %c0_1] : memref<32x128xf32, #tpu.memory_space<vmem>>, vector<32x128xf32>
    %c0_2 = arith.constant 0 : index
    %c0_3 = arith.constant 0 : index
    %4 = vector.load %arg3[%c0_2, %c0_3] : memref<32x128xbf16, #tpu.memory_space<vmem>>, vector<32x128xbf16>
    %c0_4 = arith.constant 0 : index
    %c0_5 = arith.constant 0 : index
    %5 = vector.load %arg4[%c0_4, %c0_5] : memref<128x128xbf16, #tpu.memory_space<vmem>>, vector<128x128xbf16>
    %cst = arith.constant dense<0.000000e+00> : vector<32x128xf32>
    %6 = tpu.matmul %4, %5, %cst {dimension_numbers = #tpu.dot_dimension_numbers<[1], [0], [0], [1], [0, 0, 1, 1], [], []>} : vector<32x128xbf16>, vector<128x128xbf16>, vector<32x128xf32> -> vector<32x128xf32>
    %7 = arith.addf %3, %6 : vector<32x128xf32>
    %c0_6 = arith.constant 0 : index
    %c0_7 = arith.constant 0 : index
    %8 = vector.load %arg8[%c0_6, %c0_7] : memref<32x128xf32, #tpu.memory_space<vmem>>, vector<32x128xf32>
    tpu.vector_store %arg8[%c0_6, %c0_7], %7 {strides = array<i32>} : memref<32x128xf32, #tpu.memory_space<vmem>>, vector<32x128xf32>,
    %c0_i32_8 = arith.constant 0 : i32
    %9 = arith.cmpi eq, %arg2, %c0_i32_8 : i32
    %10 = arith.extui %9 : i1 to i32
    %c0_i32_9 = arith.constant 0 : i32
    %11 = arith.cmpi ne, %10, %c0_i32_9 : i32
    scf.if %11 {
      %c0_10 = arith.constant 0 : index
      %c0_11 = arith.constant 0 : index
      %12 = vector.load %arg8[%c0_10, %c0_11] : memref<32x128xf32, #tpu.memory_space<vmem>>, vector<32x128xf32>
      %c0_12 = arith.constant 0 : index
      %c0_13 = arith.constant 0 : index
      %13 = vector.load %arg5[%c0_12, %c0_13] : memref<1x128xf32, #tpu.memory_space<vmem>>, vector<1x128xf32>
      %14 = vector.broadcast %13 : vector<1x128xf32> to vector<32x128xf32>
      %15 = arith.addf %12, %14 : vector<32x128xf32>
      %c0_14 = arith.constant 0 : index
      %c0_15 = arith.constant 0 : index
      %16 = vector.load %arg6[%c0_14, %c0_15] : memref<1x128xf32, #tpu.memory_space<vmem>>, vector<1x128xf32>
      %cst_16 = arith.constant 5.000000e-01 : f32
      %17 = vector.broadcast %cst_16 : f32 to vector<1x128xf32>
      %18 = arith.cmpf ogt, %16, %17 : vector<1x128xf32>
      %cst_17 = arith.constant 0.000000e+00 : f32
      %19 = vector.broadcast %cst_17 : f32 to vector<32x128xf32>
      %20 = arith.maximumf %15, %19 : vector<32x128xf32>
      %21 = vector.shape_cast %18 : vector<1x128xi1> to vector<1x128xi1>
      %22 = vector.broadcast %21 : vector<1x128xi1> to vector<32x128xi1>
      %23 = arith.select %22, %20, %15 : vector<32x128xi1>, vector<32x128xf32>
      %24 = arith.truncf %23 : vector<32x128xf32> to vector<32x128xbf16>
      %c0_18 = arith.constant 0 : index
      %c0_19 = arith.constant 0 : index
      %25 = vector.load %arg7[%c0_18, %c0_19] : memref<32x128xbf16, #tpu.memory_space<vmem>>, vector<32x128xbf16>
      tpu.vector_store %arg7[%c0_18, %c0_19], %24 {strides = array<i32>} : memref<32x128xbf16, #tpu.memory_space<vmem>>, vector<32x128xbf16>,
    } else {
    }
    return
  }
  func.func @transform_0(%arg0: i32, %arg1: i32, %arg2: i32) -> (i32, i32) {
    %c0_i32 = arith.constant 0 : i32
    return %arg0, %arg2 : i32, i32
  }
  func.func @transform_1(%arg0: i32, %arg1: i32, %arg2: i32) -> (i32, i32) {
    %c0_i32 = arith.constant 0 : i32
    return %arg2, %arg1 : i32, i32
  }
  func.func @transform_2(%arg0: i32, %arg1: i32, %arg2: i32) -> (i32, i32) {
    %c0_i32 = arith.constant 0 : i32
    %c0_i32_0 = arith.constant 0 : i32
    return %c0_i32, %arg1 : i32, i32
  }
  func.func @transform_3(%arg0: i32, %arg1: i32, %arg2: i32) -> (i32, i32) {
    %c0_i32 = arith.constant 0 : i32
    %c0_i32_0 = arith.constant 0 : i32
    return %c0_i32, %arg1 : i32, i32
  }
  func.func @transform_4(%arg0: i32, %arg1: i32, %arg2: i32) -> (i32, i32) {
    %c0_i32 = arith.constant 0 : i32
    return %arg0, %arg1 : i32, i32
  }
}

module attributes {stable_mosaic.version = 11 : i64} {
  func.func @_mm_res_kernel(%arg0: i32, %arg1: i32, %arg2: i32, %arg3: memref<32x128xbf16, #tpu.memory_space<vmem>>, %arg4: memref<128x128xbf16, #tpu.memory_space<vmem>>, %arg5: memref<1x128xf32, #tpu.memory_space<vmem>>, %arg6: memref<32x128xbf16, #tpu.memory_space<vmem>>, %arg7: memref<32x128xbf16, #tpu.memory_space<vmem>>, %arg8: memref<32x128xf32, #tpu.memory_space<vmem>>) attributes {dimension_semantics = [#tpu.dimension_semantics<parallel>, #tpu.dimension_semantics<parallel>, #tpu.dimension_semantics<arbitrary>], iteration_bounds = array<i64: 2, 1, 1>, scalar_prefetch = 0 : i64, scratch_operands = 1 : i64, tpu.core_type = #tpu.core_type<tc>, window_params = [{transform_indices = @transform_0, window_bounds = array<i64: 32, 128>}, {transform_indices = @transform_1, window_bounds = array<i64: 128, 128>}, {transform_indices = @transform_2, window_bounds = array<i64: 1, 128>}, {transform_indices = @transform_3, window_bounds = array<i64: 32, 128>}, {transform_indices = @transform_4, window_bounds = array<i64: 32, 128>}]} {
    %c0_i32 = arith.constant 0 : i32
    %0 = arith.cmpi eq, %arg2, %c0_i32 : i32
    %1 = arith.extui %0 : i1 to i32
    %c0_i32_0 = arith.constant 0 : i32
    %2 = arith.cmpi ne, %1, %c0_i32_0 : i32
    scf.if %2 {
      %cst_10 = arith.constant 0.000000e+00 : f32
      %12 = vector.broadcast %cst_10 : f32 to vector<32x128xf32>
      %c0_11 = arith.constant 0 : index
      %c0_12 = arith.constant 0 : index
      %13 = vector.load %arg8[%c0_11, %c0_12] : memref<32x128xf32, #tpu.memory_space<vmem>>, vector<32x128xf32>
      tpu.vector_store %arg8[%c0_11, %c0_12], %12 {strides = array<i32>} : memref<32x128xf32, #tpu.memory_space<vmem>>, vector<32x128xf32>,
    } else {
    }
    %c0 = arith.constant 0 : index
    %c0_1 = arith.constant 0 : index
    %3 = vector.load %arg8[%c0, %c0_1] : memref<32x128xf32, #tpu.memory_space<vmem>>, vector<32x128xf32>
    %c0_2 = arith.constant 0 : index
    %c0_3 = arith.constant 0 : index
    %4 = vector.load %arg3[%c0_2, %c0_3] : memref<32x128xbf16, #tpu.memory_space<vmem>>, vector<32x128xbf16>
    %c0_4 = arith.constant 0 : index
    %c0_5 = arith.constant 0 : index
    %5 = vector.load %arg4[%c0_4, %c0_5] : memref<128x128xbf16, #tpu.memory_space<vmem>>, vector<128x128xbf16>
    %cst = arith.constant dense<0.000000e+00> : vector<32x128xf32>
    %6 = tpu.matmul %4, %5, %cst {dimension_numbers = #tpu.dot_dimension_numbers<[1], [0], [0], [1], [0, 0, 1, 1], [], []>} : vector<32x128xbf16>, vector<128x128xbf16>, vector<32x128xf32> -> vector<32x128xf32>
    %7 = arith.addf %3, %6 : vector<32x128xf32>
    %c0_6 = arith.constant 0 : index
    %c0_7 = arith.constant 0 : index
    %8 = vector.load %arg8[%c0_6, %c0_7] : memref<32x128xf32, #tpu.memory_space<vmem>>, vector<32x128xf32>
    tpu.vector_store %arg8[%c0_6, %c0_7], %7 {strides = array<i32>} : memref<32x128xf32, #tpu.memory_space<vmem>>, vector<32x128xf32>,
    %c0_i32_8 = arith.constant 0 : i32
    %9 = arith.cmpi eq, %arg2, %c0_i32_8 : i32
    %10 = arith.extui %9 : i1 to i32
    %c0_i32_9 = arith.constant 0 : i32
    %11 = arith.cmpi ne, %10, %c0_i32_9 : i32
    scf.if %11 {
      %c0_10 = arith.constant 0 : index
      %c0_11 = arith.constant 0 : index
      %12 = vector.load %arg8[%c0_10, %c0_11] : memref<32x128xf32, #tpu.memory_space<vmem>>, vector<32x128xf32>
      %c0_12 = arith.constant 0 : index
      %c0_13 = arith.constant 0 : index
      %13 = vector.load %arg5[%c0_12, %c0_13] : memref<1x128xf32, #tpu.memory_space<vmem>>, vector<1x128xf32>
      %14 = vector.broadcast %13 : vector<1x128xf32> to vector<32x128xf32>
      %15 = arith.addf %12, %14 : vector<32x128xf32>
      %c0_14 = arith.constant 0 : index
      %c0_15 = arith.constant 0 : index
      %16 = vector.load %arg6[%c0_14, %c0_15] : memref<32x128xbf16, #tpu.memory_space<vmem>>, vector<32x128xbf16>
      %17 = arith.extf %16 : vector<32x128xbf16> to vector<32x128xf32>
      %18 = arith.addf %15, %17 : vector<32x128xf32>
      %cst_16 = arith.constant 0.000000e+00 : f32
      %19 = vector.broadcast %cst_16 : f32 to vector<32x128xf32>
      %20 = arith.maximumf %18, %19 : vector<32x128xf32>
      %21 = arith.truncf %20 : vector<32x128xf32> to vector<32x128xbf16>
      %c0_17 = arith.constant 0 : index
      %c0_18 = arith.constant 0 : index
      %22 = vector.load %arg7[%c0_17, %c0_18] : memref<32x128xbf16, #tpu.memory_space<vmem>>, vector<32x128xbf16>
      tpu.vector_store %arg7[%c0_17, %c0_18], %21 {strides = array<i32>} : memref<32x128xbf16, #tpu.memory_space<vmem>>, vector<32x128xbf16>,
    } else {
    }
    return
  }
  func.func @transform_0(%arg0: i32, %arg1: i32, %arg2: i32) -> (i32, i32) {
    %c0_i32 = arith.constant 0 : i32
    return %arg0, %arg2 : i32, i32
  }
  func.func @transform_1(%arg0: i32, %arg1: i32, %arg2: i32) -> (i32, i32) {
    %c0_i32 = arith.constant 0 : i32
    return %arg2, %arg1 : i32, i32
  }
  func.func @transform_2(%arg0: i32, %arg1: i32, %arg2: i32) -> (i32, i32) {
    %c0_i32 = arith.constant 0 : i32
    %c0_i32_0 = arith.constant 0 : i32
    return %c0_i32, %arg1 : i32, i32
  }
  func.func @transform_3(%arg0: i32, %arg1: i32, %arg2: i32) -> (i32, i32) {
    %c0_i32 = arith.constant 0 : i32
    return %arg0, %arg1 : i32, i32
  }
  func.func @transform_4(%arg0: i32, %arg1: i32, %arg2: i32) -> (i32, i32) {
    %c0_i32 = arith.constant 0 : i32
    return %arg0, %arg1 : i32, i32
  }
}

module attributes {stable_mosaic.version = 11 : i64} {
  func.func @_mm_kernel(%arg0: i32, %arg1: i32, %arg2: i32, %arg3: memref<32x256xbf16, #tpu.memory_space<vmem>>, %arg4: memref<256x128xbf16, #tpu.memory_space<vmem>>, %arg5: memref<1x128xf32, #tpu.memory_space<vmem>>, %arg6: memref<1x128xf32, #tpu.memory_space<vmem>>, %arg7: memref<32x128xbf16, #tpu.memory_space<vmem>>, %arg8: memref<32x128xf32, #tpu.memory_space<vmem>>) attributes {dimension_semantics = [#tpu.dimension_semantics<parallel>, #tpu.dimension_semantics<parallel>, #tpu.dimension_semantics<arbitrary>], iteration_bounds = array<i64: 2, 1, 1>, scalar_prefetch = 0 : i64, scratch_operands = 1 : i64, tpu.core_type = #tpu.core_type<tc>, window_params = [{transform_indices = @transform_0, window_bounds = array<i64: 32, 256>}, {transform_indices = @transform_1, window_bounds = array<i64: 256, 128>}, {transform_indices = @transform_2, window_bounds = array<i64: 1, 128>}, {transform_indices = @transform_3, window_bounds = array<i64: 1, 128>}, {transform_indices = @transform_4, window_bounds = array<i64: 32, 128>}]} {
    %c0_i32 = arith.constant 0 : i32
    %0 = arith.cmpi eq, %arg2, %c0_i32 : i32
    %1 = arith.extui %0 : i1 to i32
    %c0_i32_0 = arith.constant 0 : i32
    %2 = arith.cmpi ne, %1, %c0_i32_0 : i32
    scf.if %2 {
      %cst_10 = arith.constant 0.000000e+00 : f32
      %12 = vector.broadcast %cst_10 : f32 to vector<32x128xf32>
      %c0_11 = arith.constant 0 : index
      %c0_12 = arith.constant 0 : index
      %13 = vector.load %arg8[%c0_11, %c0_12] : memref<32x128xf32, #tpu.memory_space<vmem>>, vector<32x128xf32>
      tpu.vector_store %arg8[%c0_11, %c0_12], %12 {strides = array<i32>} : memref<32x128xf32, #tpu.memory_space<vmem>>, vector<32x128xf32>,
    } else {
    }
    %c0 = arith.constant 0 : index
    %c0_1 = arith.constant 0 : index
    %3 = vector.load %arg8[%c0, %c0_1] : memref<32x128xf32, #tpu.memory_space<vmem>>, vector<32x128xf32>
    %c0_2 = arith.constant 0 : index
    %c0_3 = arith.constant 0 : index
    %4 = vector.load %arg3[%c0_2, %c0_3] : memref<32x256xbf16, #tpu.memory_space<vmem>>, vector<32x256xbf16>
    %c0_4 = arith.constant 0 : index
    %c0_5 = arith.constant 0 : index
    %5 = vector.load %arg4[%c0_4, %c0_5] : memref<256x128xbf16, #tpu.memory_space<vmem>>, vector<256x128xbf16>
    %cst = arith.constant dense<0.000000e+00> : vector<32x128xf32>
    %6 = tpu.matmul %4, %5, %cst {dimension_numbers = #tpu.dot_dimension_numbers<[1], [0], [0], [1], [0, 0, 1, 1], [], []>} : vector<32x256xbf16>, vector<256x128xbf16>, vector<32x128xf32> -> vector<32x128xf32>
    %7 = arith.addf %3, %6 : vector<32x128xf32>
    %c0_6 = arith.constant 0 : index
    %c0_7 = arith.constant 0 : index
    %8 = vector.load %arg8[%c0_6, %c0_7] : memref<32x128xf32, #tpu.memory_space<vmem>>, vector<32x128xf32>
    tpu.vector_store %arg8[%c0_6, %c0_7], %7 {strides = array<i32>} : memref<32x128xf32, #tpu.memory_space<vmem>>, vector<32x128xf32>,
    %c0_i32_8 = arith.constant 0 : i32
    %9 = arith.cmpi eq, %arg2, %c0_i32_8 : i32
    %10 = arith.extui %9 : i1 to i32
    %c0_i32_9 = arith.constant 0 : i32
    %11 = arith.cmpi ne, %10, %c0_i32_9 : i32
    scf.if %11 {
      %c0_10 = arith.constant 0 : index
      %c0_11 = arith.constant 0 : index
      %12 = vector.load %arg8[%c0_10, %c0_11] : memref<32x128xf32, #tpu.memory_space<vmem>>, vector<32x128xf32>
      %c0_12 = arith.constant 0 : index
      %c0_13 = arith.constant 0 : index
      %13 = vector.load %arg5[%c0_12, %c0_13] : memref<1x128xf32, #tpu.memory_space<vmem>>, vector<1x128xf32>
      %14 = vector.broadcast %13 : vector<1x128xf32> to vector<32x128xf32>
      %15 = arith.addf %12, %14 : vector<32x128xf32>
      %c0_14 = arith.constant 0 : index
      %c0_15 = arith.constant 0 : index
      %16 = vector.load %arg6[%c0_14, %c0_15] : memref<1x128xf32, #tpu.memory_space<vmem>>, vector<1x128xf32>
      %cst_16 = arith.constant 5.000000e-01 : f32
      %17 = vector.broadcast %cst_16 : f32 to vector<1x128xf32>
      %18 = arith.cmpf ogt, %16, %17 : vector<1x128xf32>
      %cst_17 = arith.constant 0.000000e+00 : f32
      %19 = vector.broadcast %cst_17 : f32 to vector<32x128xf32>
      %20 = arith.maximumf %15, %19 : vector<32x128xf32>
      %21 = vector.shape_cast %18 : vector<1x128xi1> to vector<1x128xi1>
      %22 = vector.broadcast %21 : vector<1x128xi1> to vector<32x128xi1>
      %23 = arith.select %22, %20, %15 : vector<32x128xi1>, vector<32x128xf32>
      %24 = arith.truncf %23 : vector<32x128xf32> to vector<32x128xbf16>
      %c0_18 = arith.constant 0 : index
      %c0_19 = arith.constant 0 : index
      %25 = vector.load %arg7[%c0_18, %c0_19] : memref<32x128xbf16, #tpu.memory_space<vmem>>, vector<32x128xbf16>
      tpu.vector_store %arg7[%c0_18, %c0_19], %24 {strides = array<i32>} : memref<32x128xbf16, #tpu.memory_space<vmem>>, vector<32x128xbf16>,
    } else {
    }
    return
  }
  func.func @transform_0(%arg0: i32, %arg1: i32, %arg2: i32) -> (i32, i32) {
    %c0_i32 = arith.constant 0 : i32
    return %arg0, %arg2 : i32, i32
  }
  func.func @transform_1(%arg0: i32, %arg1: i32, %arg2: i32) -> (i32, i32) {
    %c0_i32 = arith.constant 0 : i32
    return %arg2, %arg1 : i32, i32
  }
  func.func @transform_2(%arg0: i32, %arg1: i32, %arg2: i32) -> (i32, i32) {
    %c0_i32 = arith.constant 0 : i32
    %c0_i32_0 = arith.constant 0 : i32
    return %c0_i32, %arg1 : i32, i32
  }
  func.func @transform_3(%arg0: i32, %arg1: i32, %arg2: i32) -> (i32, i32) {
    %c0_i32 = arith.constant 0 : i32
    %c0_i32_0 = arith.constant 0 : i32
    return %c0_i32, %arg1 : i32, i32
  }
  func.func @transform_4(%arg0: i32, %arg1: i32, %arg2: i32) -> (i32, i32) {
    %c0_i32 = arith.constant 0 : i32
    return %arg0, %arg1 : i32, i32
  }
}

module attributes {stable_mosaic.version = 11 : i64} {
  func.func @_mm_kernel(%arg0: i32, %arg1: i32, %arg2: i32, %arg3: memref<32x128xbf16, #tpu.memory_space<vmem>>, %arg4: memref<128x256xbf16, #tpu.memory_space<vmem>>, %arg5: memref<1x256xf32, #tpu.memory_space<vmem>>, %arg6: memref<1x256xf32, #tpu.memory_space<vmem>>, %arg7: memref<32x256xbf16, #tpu.memory_space<vmem>>, %arg8: memref<32x256xf32, #tpu.memory_space<vmem>>) attributes {dimension_semantics = [#tpu.dimension_semantics<parallel>, #tpu.dimension_semantics<parallel>, #tpu.dimension_semantics<arbitrary>], iteration_bounds = array<i64: 2, 1, 1>, scalar_prefetch = 0 : i64, scratch_operands = 1 : i64, tpu.core_type = #tpu.core_type<tc>, window_params = [{transform_indices = @transform_0, window_bounds = array<i64: 32, 128>}, {transform_indices = @transform_1, window_bounds = array<i64: 128, 256>}, {transform_indices = @transform_2, window_bounds = array<i64: 1, 256>}, {transform_indices = @transform_3, window_bounds = array<i64: 1, 256>}, {transform_indices = @transform_4, window_bounds = array<i64: 32, 256>}]} {
    %c0_i32 = arith.constant 0 : i32
    %0 = arith.cmpi eq, %arg2, %c0_i32 : i32
    %1 = arith.extui %0 : i1 to i32
    %c0_i32_0 = arith.constant 0 : i32
    %2 = arith.cmpi ne, %1, %c0_i32_0 : i32
    scf.if %2 {
      %cst_10 = arith.constant 0.000000e+00 : f32
      %12 = vector.broadcast %cst_10 : f32 to vector<32x256xf32>
      %c0_11 = arith.constant 0 : index
      %c0_12 = arith.constant 0 : index
      %13 = vector.load %arg8[%c0_11, %c0_12] : memref<32x256xf32, #tpu.memory_space<vmem>>, vector<32x256xf32>
      tpu.vector_store %arg8[%c0_11, %c0_12], %12 {strides = array<i32>} : memref<32x256xf32, #tpu.memory_space<vmem>>, vector<32x256xf32>,
    } else {
    }
    %c0 = arith.constant 0 : index
    %c0_1 = arith.constant 0 : index
    %3 = vector.load %arg8[%c0, %c0_1] : memref<32x256xf32, #tpu.memory_space<vmem>>, vector<32x256xf32>
    %c0_2 = arith.constant 0 : index
    %c0_3 = arith.constant 0 : index
    %4 = vector.load %arg3[%c0_2, %c0_3] : memref<32x128xbf16, #tpu.memory_space<vmem>>, vector<32x128xbf16>
    %c0_4 = arith.constant 0 : index
    %c0_5 = arith.constant 0 : index
    %5 = vector.load %arg4[%c0_4, %c0_5] : memref<128x256xbf16, #tpu.memory_space<vmem>>, vector<128x256xbf16>
    %cst = arith.constant dense<0.000000e+00> : vector<32x256xf32>
    %6 = tpu.matmul %4, %5, %cst {dimension_numbers = #tpu.dot_dimension_numbers<[1], [0], [0], [1], [0, 0, 1, 1], [], []>} : vector<32x128xbf16>, vector<128x256xbf16>, vector<32x256xf32> -> vector<32x256xf32>
    %7 = arith.addf %3, %6 : vector<32x256xf32>
    %c0_6 = arith.constant 0 : index
    %c0_7 = arith.constant 0 : index
    %8 = vector.load %arg8[%c0_6, %c0_7] : memref<32x256xf32, #tpu.memory_space<vmem>>, vector<32x256xf32>
    tpu.vector_store %arg8[%c0_6, %c0_7], %7 {strides = array<i32>} : memref<32x256xf32, #tpu.memory_space<vmem>>, vector<32x256xf32>,
    %c0_i32_8 = arith.constant 0 : i32
    %9 = arith.cmpi eq, %arg2, %c0_i32_8 : i32
    %10 = arith.extui %9 : i1 to i32
    %c0_i32_9 = arith.constant 0 : i32
    %11 = arith.cmpi ne, %10, %c0_i32_9 : i32
    scf.if %11 {
      %c0_10 = arith.constant 0 : index
      %c0_11 = arith.constant 0 : index
      %12 = vector.load %arg8[%c0_10, %c0_11] : memref<32x256xf32, #tpu.memory_space<vmem>>, vector<32x256xf32>
      %c0_12 = arith.constant 0 : index
      %c0_13 = arith.constant 0 : index
      %13 = vector.load %arg5[%c0_12, %c0_13] : memref<1x256xf32, #tpu.memory_space<vmem>>, vector<1x256xf32>
      %14 = vector.broadcast %13 : vector<1x256xf32> to vector<32x256xf32>
      %15 = arith.addf %12, %14 : vector<32x256xf32>
      %c0_14 = arith.constant 0 : index
      %c0_15 = arith.constant 0 : index
      %16 = vector.load %arg6[%c0_14, %c0_15] : memref<1x256xf32, #tpu.memory_space<vmem>>, vector<1x256xf32>
      %cst_16 = arith.constant 5.000000e-01 : f32
      %17 = vector.broadcast %cst_16 : f32 to vector<1x256xf32>
      %18 = arith.cmpf ogt, %16, %17 : vector<1x256xf32>
      %cst_17 = arith.constant 0.000000e+00 : f32
      %19 = vector.broadcast %cst_17 : f32 to vector<32x256xf32>
      %20 = arith.maximumf %15, %19 : vector<32x256xf32>
      %21 = vector.shape_cast %18 : vector<1x256xi1> to vector<1x256xi1>
      %22 = vector.broadcast %21 : vector<1x256xi1> to vector<32x256xi1>
      %23 = arith.select %22, %20, %15 : vector<32x256xi1>, vector<32x256xf32>
      %24 = arith.truncf %23 : vector<32x256xf32> to vector<32x256xbf16>
      %c0_18 = arith.constant 0 : index
      %c0_19 = arith.constant 0 : index
      %25 = vector.load %arg7[%c0_18, %c0_19] : memref<32x256xbf16, #tpu.memory_space<vmem>>, vector<32x256xbf16>
      tpu.vector_store %arg7[%c0_18, %c0_19], %24 {strides = array<i32>} : memref<32x256xbf16, #tpu.memory_space<vmem>>, vector<32x256xbf16>,
    } else {
    }
    return
  }
  func.func @transform_0(%arg0: i32, %arg1: i32, %arg2: i32) -> (i32, i32) {
    %c0_i32 = arith.constant 0 : i32
    return %arg0, %arg2 : i32, i32
  }
  func.func @transform_1(%arg0: i32, %arg1: i32, %arg2: i32) -> (i32, i32) {
    %c0_i32 = arith.constant 0 : i32
    return %arg2, %arg1 : i32, i32
  }
  func.func @transform_2(%arg0: i32, %arg1: i32, %arg2: i32) -> (i32, i32) {
    %c0_i32 = arith.constant 0 : i32
    %c0_i32_0 = arith.constant 0 : i32
    return %c0_i32, %arg1 : i32, i32
  }
  func.func @transform_3(%arg0: i32, %arg1: i32, %arg2: i32) -> (i32, i32) {
    %c0_i32 = arith.constant 0 : i32
    %c0_i32_0 = arith.constant 0 : i32
    return %c0_i32, %arg1 : i32, i32
  }
  func.func @transform_4(%arg0: i32, %arg1: i32, %arg2: i32) -> (i32, i32) {
    %c0_i32 = arith.constant 0 : i32
    return %arg0, %arg1 : i32, i32
  }
}

module attributes {stable_mosaic.version = 11 : i64} {
  func.func @_mm_kernel(%arg0: i32, %arg1: i32, %arg2: i32, %arg3: memref<32x384xbf16, #tpu.memory_space<vmem>>, %arg4: memref<384x128xbf16, #tpu.memory_space<vmem>>, %arg5: memref<1x128xf32, #tpu.memory_space<vmem>>, %arg6: memref<1x128xf32, #tpu.memory_space<vmem>>, %arg7: memref<32x128xbf16, #tpu.memory_space<vmem>>, %arg8: memref<32x128xf32, #tpu.memory_space<vmem>>) attributes {dimension_semantics = [#tpu.dimension_semantics<parallel>, #tpu.dimension_semantics<parallel>, #tpu.dimension_semantics<arbitrary>], iteration_bounds = array<i64: 2, 1, 1>, scalar_prefetch = 0 : i64, scratch_operands = 1 : i64, tpu.core_type = #tpu.core_type<tc>, window_params = [{transform_indices = @transform_0, window_bounds = array<i64: 32, 384>}, {transform_indices = @transform_1, window_bounds = array<i64: 384, 128>}, {transform_indices = @transform_2, window_bounds = array<i64: 1, 128>}, {transform_indices = @transform_3, window_bounds = array<i64: 1, 128>}, {transform_indices = @transform_4, window_bounds = array<i64: 32, 128>}]} {
    %c0_i32 = arith.constant 0 : i32
    %0 = arith.cmpi eq, %arg2, %c0_i32 : i32
    %1 = arith.extui %0 : i1 to i32
    %c0_i32_0 = arith.constant 0 : i32
    %2 = arith.cmpi ne, %1, %c0_i32_0 : i32
    scf.if %2 {
      %cst_10 = arith.constant 0.000000e+00 : f32
      %12 = vector.broadcast %cst_10 : f32 to vector<32x128xf32>
      %c0_11 = arith.constant 0 : index
      %c0_12 = arith.constant 0 : index
      %13 = vector.load %arg8[%c0_11, %c0_12] : memref<32x128xf32, #tpu.memory_space<vmem>>, vector<32x128xf32>
      tpu.vector_store %arg8[%c0_11, %c0_12], %12 {strides = array<i32>} : memref<32x128xf32, #tpu.memory_space<vmem>>, vector<32x128xf32>,
    } else {
    }
    %c0 = arith.constant 0 : index
    %c0_1 = arith.constant 0 : index
    %3 = vector.load %arg8[%c0, %c0_1] : memref<32x128xf32, #tpu.memory_space<vmem>>, vector<32x128xf32>
    %c0_2 = arith.constant 0 : index
    %c0_3 = arith.constant 0 : index
    %4 = vector.load %arg3[%c0_2, %c0_3] : memref<32x384xbf16, #tpu.memory_space<vmem>>, vector<32x384xbf16>
    %c0_4 = arith.constant 0 : index
    %c0_5 = arith.constant 0 : index
    %5 = vector.load %arg4[%c0_4, %c0_5] : memref<384x128xbf16, #tpu.memory_space<vmem>>, vector<384x128xbf16>
    %cst = arith.constant dense<0.000000e+00> : vector<32x128xf32>
    %6 = tpu.matmul %4, %5, %cst {dimension_numbers = #tpu.dot_dimension_numbers<[1], [0], [0], [1], [0, 0, 1, 1], [], []>} : vector<32x384xbf16>, vector<384x128xbf16>, vector<32x128xf32> -> vector<32x128xf32>
    %7 = arith.addf %3, %6 : vector<32x128xf32>
    %c0_6 = arith.constant 0 : index
    %c0_7 = arith.constant 0 : index
    %8 = vector.load %arg8[%c0_6, %c0_7] : memref<32x128xf32, #tpu.memory_space<vmem>>, vector<32x128xf32>
    tpu.vector_store %arg8[%c0_6, %c0_7], %7 {strides = array<i32>} : memref<32x128xf32, #tpu.memory_space<vmem>>, vector<32x128xf32>,
    %c0_i32_8 = arith.constant 0 : i32
    %9 = arith.cmpi eq, %arg2, %c0_i32_8 : i32
    %10 = arith.extui %9 : i1 to i32
    %c0_i32_9 = arith.constant 0 : i32
    %11 = arith.cmpi ne, %10, %c0_i32_9 : i32
    scf.if %11 {
      %c0_10 = arith.constant 0 : index
      %c0_11 = arith.constant 0 : index
      %12 = vector.load %arg8[%c0_10, %c0_11] : memref<32x128xf32, #tpu.memory_space<vmem>>, vector<32x128xf32>
      %c0_12 = arith.constant 0 : index
      %c0_13 = arith.constant 0 : index
      %13 = vector.load %arg5[%c0_12, %c0_13] : memref<1x128xf32, #tpu.memory_space<vmem>>, vector<1x128xf32>
      %14 = vector.broadcast %13 : vector<1x128xf32> to vector<32x128xf32>
      %15 = arith.addf %12, %14 : vector<32x128xf32>
      %c0_14 = arith.constant 0 : index
      %c0_15 = arith.constant 0 : index
      %16 = vector.load %arg6[%c0_14, %c0_15] : memref<1x128xf32, #tpu.memory_space<vmem>>, vector<1x128xf32>
      %cst_16 = arith.constant 5.000000e-01 : f32
      %17 = vector.broadcast %cst_16 : f32 to vector<1x128xf32>
      %18 = arith.cmpf ogt, %16, %17 : vector<1x128xf32>
      %cst_17 = arith.constant 0.000000e+00 : f32
      %19 = vector.broadcast %cst_17 : f32 to vector<32x128xf32>
      %20 = arith.maximumf %15, %19 : vector<32x128xf32>
      %21 = vector.shape_cast %18 : vector<1x128xi1> to vector<1x128xi1>
      %22 = vector.broadcast %21 : vector<1x128xi1> to vector<32x128xi1>
      %23 = arith.select %22, %20, %15 : vector<32x128xi1>, vector<32x128xf32>
      %24 = arith.truncf %23 : vector<32x128xf32> to vector<32x128xbf16>
      %c0_18 = arith.constant 0 : index
      %c0_19 = arith.constant 0 : index
      %25 = vector.load %arg7[%c0_18, %c0_19] : memref<32x128xbf16, #tpu.memory_space<vmem>>, vector<32x128xbf16>
      tpu.vector_store %arg7[%c0_18, %c0_19], %24 {strides = array<i32>} : memref<32x128xbf16, #tpu.memory_space<vmem>>, vector<32x128xbf16>,
    } else {
    }
    return
  }
  func.func @transform_0(%arg0: i32, %arg1: i32, %arg2: i32) -> (i32, i32) {
    %c0_i32 = arith.constant 0 : i32
    return %arg0, %arg2 : i32, i32
  }
  func.func @transform_1(%arg0: i32, %arg1: i32, %arg2: i32) -> (i32, i32) {
    %c0_i32 = arith.constant 0 : i32
    return %arg2, %arg1 : i32, i32
  }
  func.func @transform_2(%arg0: i32, %arg1: i32, %arg2: i32) -> (i32, i32) {
    %c0_i32 = arith.constant 0 : i32
    %c0_i32_0 = arith.constant 0 : i32
    return %c0_i32, %arg1 : i32, i32
  }
  func.func @transform_3(%arg0: i32, %arg1: i32, %arg2: i32) -> (i32, i32) {
    %c0_i32 = arith.constant 0 : i32
    %c0_i32_0 = arith.constant 0 : i32
    return %c0_i32, %arg1 : i32, i32
  }
  func.func @transform_4(%arg0: i32, %arg1: i32, %arg2: i32) -> (i32, i32) {
    %c0_i32 = arith.constant 0 : i32
    return %arg0, %arg1 : i32, i32
  }
}

module attributes {stable_mosaic.version = 11 : i64} {
  func.func @_mm_kernel(%arg0: i32, %arg1: i32, %arg2: i32, %arg3: memref<64x128xbf16, #tpu.memory_space<vmem>>, %arg4: memref<128x128xbf16, #tpu.memory_space<vmem>>, %arg5: memref<1x128xf32, #tpu.memory_space<vmem>>, %arg6: memref<1x128xf32, #tpu.memory_space<vmem>>, %arg7: memref<64x128xbf16, #tpu.memory_space<vmem>>, %arg8: memref<64x128xf32, #tpu.memory_space<vmem>>) attributes {dimension_semantics = [#tpu.dimension_semantics<parallel>, #tpu.dimension_semantics<parallel>, #tpu.dimension_semantics<arbitrary>], iteration_bounds = array<i64: 2, 1, 1>, scalar_prefetch = 0 : i64, scratch_operands = 1 : i64, tpu.core_type = #tpu.core_type<tc>, window_params = [{transform_indices = @transform_0, window_bounds = array<i64: 64, 128>}, {transform_indices = @transform_1, window_bounds = array<i64: 128, 128>}, {transform_indices = @transform_2, window_bounds = array<i64: 1, 128>}, {transform_indices = @transform_3, window_bounds = array<i64: 1, 128>}, {transform_indices = @transform_4, window_bounds = array<i64: 64, 128>}]} {
    %c0_i32 = arith.constant 0 : i32
    %0 = arith.cmpi eq, %arg2, %c0_i32 : i32
    %1 = arith.extui %0 : i1 to i32
    %c0_i32_0 = arith.constant 0 : i32
    %2 = arith.cmpi ne, %1, %c0_i32_0 : i32
    scf.if %2 {
      %cst_10 = arith.constant 0.000000e+00 : f32
      %12 = vector.broadcast %cst_10 : f32 to vector<64x128xf32>
      %c0_11 = arith.constant 0 : index
      %c0_12 = arith.constant 0 : index
      %13 = vector.load %arg8[%c0_11, %c0_12] : memref<64x128xf32, #tpu.memory_space<vmem>>, vector<64x128xf32>
      tpu.vector_store %arg8[%c0_11, %c0_12], %12 {strides = array<i32>} : memref<64x128xf32, #tpu.memory_space<vmem>>, vector<64x128xf32>,
    } else {
    }
    %c0 = arith.constant 0 : index
    %c0_1 = arith.constant 0 : index
    %3 = vector.load %arg8[%c0, %c0_1] : memref<64x128xf32, #tpu.memory_space<vmem>>, vector<64x128xf32>
    %c0_2 = arith.constant 0 : index
    %c0_3 = arith.constant 0 : index
    %4 = vector.load %arg3[%c0_2, %c0_3] : memref<64x128xbf16, #tpu.memory_space<vmem>>, vector<64x128xbf16>
    %c0_4 = arith.constant 0 : index
    %c0_5 = arith.constant 0 : index
    %5 = vector.load %arg4[%c0_4, %c0_5] : memref<128x128xbf16, #tpu.memory_space<vmem>>, vector<128x128xbf16>
    %cst = arith.constant dense<0.000000e+00> : vector<64x128xf32>
    %6 = tpu.matmul %4, %5, %cst {dimension_numbers = #tpu.dot_dimension_numbers<[1], [0], [0], [1], [0, 0, 1, 1], [], []>} : vector<64x128xbf16>, vector<128x128xbf16>, vector<64x128xf32> -> vector<64x128xf32>
    %7 = arith.addf %3, %6 : vector<64x128xf32>
    %c0_6 = arith.constant 0 : index
    %c0_7 = arith.constant 0 : index
    %8 = vector.load %arg8[%c0_6, %c0_7] : memref<64x128xf32, #tpu.memory_space<vmem>>, vector<64x128xf32>
    tpu.vector_store %arg8[%c0_6, %c0_7], %7 {strides = array<i32>} : memref<64x128xf32, #tpu.memory_space<vmem>>, vector<64x128xf32>,
    %c0_i32_8 = arith.constant 0 : i32
    %9 = arith.cmpi eq, %arg2, %c0_i32_8 : i32
    %10 = arith.extui %9 : i1 to i32
    %c0_i32_9 = arith.constant 0 : i32
    %11 = arith.cmpi ne, %10, %c0_i32_9 : i32
    scf.if %11 {
      %c0_10 = arith.constant 0 : index
      %c0_11 = arith.constant 0 : index
      %12 = vector.load %arg8[%c0_10, %c0_11] : memref<64x128xf32, #tpu.memory_space<vmem>>, vector<64x128xf32>
      %c0_12 = arith.constant 0 : index
      %c0_13 = arith.constant 0 : index
      %13 = vector.load %arg5[%c0_12, %c0_13] : memref<1x128xf32, #tpu.memory_space<vmem>>, vector<1x128xf32>
      %14 = vector.broadcast %13 : vector<1x128xf32> to vector<64x128xf32>
      %15 = arith.addf %12, %14 : vector<64x128xf32>
      %c0_14 = arith.constant 0 : index
      %c0_15 = arith.constant 0 : index
      %16 = vector.load %arg6[%c0_14, %c0_15] : memref<1x128xf32, #tpu.memory_space<vmem>>, vector<1x128xf32>
      %cst_16 = arith.constant 5.000000e-01 : f32
      %17 = vector.broadcast %cst_16 : f32 to vector<1x128xf32>
      %18 = arith.cmpf ogt, %16, %17 : vector<1x128xf32>
      %cst_17 = arith.constant 0.000000e+00 : f32
      %19 = vector.broadcast %cst_17 : f32 to vector<64x128xf32>
      %20 = arith.maximumf %15, %19 : vector<64x128xf32>
      %21 = vector.shape_cast %18 : vector<1x128xi1> to vector<1x128xi1>
      %22 = vector.broadcast %21 : vector<1x128xi1> to vector<64x128xi1>
      %23 = arith.select %22, %20, %15 : vector<64x128xi1>, vector<64x128xf32>
      %24 = arith.truncf %23 : vector<64x128xf32> to vector<64x128xbf16>
      %c0_18 = arith.constant 0 : index
      %c0_19 = arith.constant 0 : index
      %25 = vector.load %arg7[%c0_18, %c0_19] : memref<64x128xbf16, #tpu.memory_space<vmem>>, vector<64x128xbf16>
      tpu.vector_store %arg7[%c0_18, %c0_19], %24 {strides = array<i32>} : memref<64x128xbf16, #tpu.memory_space<vmem>>, vector<64x128xbf16>,
    } else {
    }
    return
  }
  func.func @transform_0(%arg0: i32, %arg1: i32, %arg2: i32) -> (i32, i32) {
    %c0_i32 = arith.constant 0 : i32
    return %arg0, %arg2 : i32, i32
  }
  func.func @transform_1(%arg0: i32, %arg1: i32, %arg2: i32) -> (i32, i32) {
    %c0_i32 = arith.constant 0 : i32
    return %arg2, %arg1 : i32, i32
  }
  func.func @transform_2(%arg0: i32, %arg1: i32, %arg2: i32) -> (i32, i32) {
    %c0_i32 = arith.constant 0 : i32
    %c0_i32_0 = arith.constant 0 : i32
    return %c0_i32, %arg1 : i32, i32
  }
  func.func @transform_3(%arg0: i32, %arg1: i32, %arg2: i32) -> (i32, i32) {
    %c0_i32 = arith.constant 0 : i32
    %c0_i32_0 = arith.constant 0 : i32
    return %c0_i32, %arg1 : i32, i32
  }
  func.func @transform_4(%arg0: i32, %arg1: i32, %arg2: i32) -> (i32, i32) {
    %c0_i32 = arith.constant 0 : i32
    return %arg0, %arg1 : i32, i32
  }
}

module attributes {stable_mosaic.version = 11 : i64} {
  func.func @_mm_kernel(%arg0: i32, %arg1: i32, %arg2: i32, %arg3: memref<32x512xbf16, #tpu.memory_space<vmem>>, %arg4: memref<512x128xbf16, #tpu.memory_space<vmem>>, %arg5: memref<1x128xf32, #tpu.memory_space<vmem>>, %arg6: memref<1x128xf32, #tpu.memory_space<vmem>>, %arg7: memref<32x128xbf16, #tpu.memory_space<vmem>>, %arg8: memref<32x128xf32, #tpu.memory_space<vmem>>) attributes {dimension_semantics = [#tpu.dimension_semantics<parallel>, #tpu.dimension_semantics<parallel>, #tpu.dimension_semantics<arbitrary>], iteration_bounds = array<i64: 2, 1, 5>, scalar_prefetch = 0 : i64, scratch_operands = 1 : i64, tpu.core_type = #tpu.core_type<tc>, window_params = [{transform_indices = @transform_0, window_bounds = array<i64: 32, 512>}, {transform_indices = @transform_1, window_bounds = array<i64: 512, 128>}, {transform_indices = @transform_2, window_bounds = array<i64: 1, 128>}, {transform_indices = @transform_3, window_bounds = array<i64: 1, 128>}, {transform_indices = @transform_4, window_bounds = array<i64: 32, 128>}]} {
    %c0_i32 = arith.constant 0 : i32
    %0 = arith.cmpi eq, %arg2, %c0_i32 : i32
    %1 = arith.extui %0 : i1 to i32
    %c0_i32_0 = arith.constant 0 : i32
    %2 = arith.cmpi ne, %1, %c0_i32_0 : i32
    scf.if %2 {
      %cst_9 = arith.constant 0.000000e+00 : f32
      %12 = vector.broadcast %cst_9 : f32 to vector<32x128xf32>
      %c0_10 = arith.constant 0 : index
      %c0_11 = arith.constant 0 : index
      %13 = vector.load %arg8[%c0_10, %c0_11] : memref<32x128xf32, #tpu.memory_space<vmem>>, vector<32x128xf32>
      tpu.vector_store %arg8[%c0_10, %c0_11], %12 {strides = array<i32>} : memref<32x128xf32, #tpu.memory_space<vmem>>, vector<32x128xf32>,
    } else {
    }
    %c0 = arith.constant 0 : index
    %c0_1 = arith.constant 0 : index
    %3 = vector.load %arg8[%c0, %c0_1] : memref<32x128xf32, #tpu.memory_space<vmem>>, vector<32x128xf32>
    %c0_2 = arith.constant 0 : index
    %c0_3 = arith.constant 0 : index
    %4 = vector.load %arg3[%c0_2, %c0_3] : memref<32x512xbf16, #tpu.memory_space<vmem>>, vector<32x512xbf16>
    %c0_4 = arith.constant 0 : index
    %c0_5 = arith.constant 0 : index
    %5 = vector.load %arg4[%c0_4, %c0_5] : memref<512x128xbf16, #tpu.memory_space<vmem>>, vector<512x128xbf16>
    %cst = arith.constant dense<0.000000e+00> : vector<32x128xf32>
    %6 = tpu.matmul %4, %5, %cst {dimension_numbers = #tpu.dot_dimension_numbers<[1], [0], [0], [1], [0, 0, 1, 1], [], []>} : vector<32x512xbf16>, vector<512x128xbf16>, vector<32x128xf32> -> vector<32x128xf32>
    %7 = arith.addf %3, %6 : vector<32x128xf32>
    %c0_6 = arith.constant 0 : index
    %c0_7 = arith.constant 0 : index
    %8 = vector.load %arg8[%c0_6, %c0_7] : memref<32x128xf32, #tpu.memory_space<vmem>>, vector<32x128xf32>
    tpu.vector_store %arg8[%c0_6, %c0_7], %7 {strides = array<i32>} : memref<32x128xf32, #tpu.memory_space<vmem>>, vector<32x128xf32>,
    %c4_i32 = arith.constant 4 : i32
    %9 = arith.cmpi eq, %arg2, %c4_i32 : i32
    %10 = arith.extui %9 : i1 to i32
    %c0_i32_8 = arith.constant 0 : i32
    %11 = arith.cmpi ne, %10, %c0_i32_8 : i32
    scf.if %11 {
      %c0_9 = arith.constant 0 : index
      %c0_10 = arith.constant 0 : index
      %12 = vector.load %arg8[%c0_9, %c0_10] : memref<32x128xf32, #tpu.memory_space<vmem>>, vector<32x128xf32>
      %c0_11 = arith.constant 0 : index
      %c0_12 = arith.constant 0 : index
      %13 = vector.load %arg5[%c0_11, %c0_12] : memref<1x128xf32, #tpu.memory_space<vmem>>, vector<1x128xf32>
      %14 = vector.broadcast %13 : vector<1x128xf32> to vector<32x128xf32>
      %15 = arith.addf %12, %14 : vector<32x128xf32>
      %c0_13 = arith.constant 0 : index
      %c0_14 = arith.constant 0 : index
      %16 = vector.load %arg6[%c0_13, %c0_14] : memref<1x128xf32, #tpu.memory_space<vmem>>, vector<1x128xf32>
      %cst_15 = arith.constant 5.000000e-01 : f32
      %17 = vector.broadcast %cst_15 : f32 to vector<1x128xf32>
      %18 = arith.cmpf ogt, %16, %17 : vector<1x128xf32>
      %cst_16 = arith.constant 0.000000e+00 : f32
      %19 = vector.broadcast %cst_16 : f32 to vector<32x128xf32>
      %20 = arith.maximumf %15, %19 : vector<32x128xf32>
      %21 = vector.shape_cast %18 : vector<1x128xi1> to vector<1x128xi1>
      %22 = vector.broadcast %21 : vector<1x128xi1> to vector<32x128xi1>
      %23 = arith.select %22, %20, %15 : vector<32x128xi1>, vector<32x128xf32>
      %24 = arith.truncf %23 : vector<32x128xf32> to vector<32x128xbf16>
      %c0_17 = arith.constant 0 : index
      %c0_18 = arith.constant 0 : index
      %25 = vector.load %arg7[%c0_17, %c0_18] : memref<32x128xbf16, #tpu.memory_space<vmem>>, vector<32x128xbf16>
      tpu.vector_store %arg7[%c0_17, %c0_18], %24 {strides = array<i32>} : memref<32x128xbf16, #tpu.memory_space<vmem>>, vector<32x128xbf16>,
    } else {
    }
    return
  }
  func.func @transform_0(%arg0: i32, %arg1: i32, %arg2: i32) -> (i32, i32) {
    %c0_i32 = arith.constant 0 : i32
    return %arg0, %arg2 : i32, i32
  }
  func.func @transform_1(%arg0: i32, %arg1: i32, %arg2: i32) -> (i32, i32) {
    %c0_i32 = arith.constant 0 : i32
    return %arg2, %arg1 : i32, i32
  }
  func.func @transform_2(%arg0: i32, %arg1: i32, %arg2: i32) -> (i32, i32) {
    %c0_i32 = arith.constant 0 : i32
    %c0_i32_0 = arith.constant 0 : i32
    return %c0_i32, %arg1 : i32, i32
  }
  func.func @transform_3(%arg0: i32, %arg1: i32, %arg2: i32) -> (i32, i32) {
    %c0_i32 = arith.constant 0 : i32
    %c0_i32_0 = arith.constant 0 : i32
    return %c0_i32, %arg1 : i32, i32
  }
  func.func @transform_4(%arg0: i32, %arg1: i32, %arg2: i32) -> (i32, i32) {
    %c0_i32 = arith.constant 0 : i32
    return %arg0, %arg1 : i32, i32
  }
}

module attributes {stable_mosaic.version = 11 : i64} {
  func.func @_mm_kernel(%arg0: i32, %arg1: i32, %arg2: i32, %arg3: memref<32x128xbf16, #tpu.memory_space<vmem>>, %arg4: memref<128x128xbf16, #tpu.memory_space<vmem>>, %arg5: memref<1x128xf32, #tpu.memory_space<vmem>>, %arg6: memref<1x128xf32, #tpu.memory_space<vmem>>, %arg7: memref<32x128xf32, #tpu.memory_space<vmem>>, %arg8: memref<32x128xf32, #tpu.memory_space<vmem>>) attributes {dimension_semantics = [#tpu.dimension_semantics<parallel>, #tpu.dimension_semantics<parallel>, #tpu.dimension_semantics<arbitrary>], iteration_bounds = array<i64: 2, 1, 1>, scalar_prefetch = 0 : i64, scratch_operands = 1 : i64, tpu.core_type = #tpu.core_type<tc>, window_params = [{transform_indices = @transform_0, window_bounds = array<i64: 32, 128>}, {transform_indices = @transform_1, window_bounds = array<i64: 128, 128>}, {transform_indices = @transform_2, window_bounds = array<i64: 1, 128>}, {transform_indices = @transform_3, window_bounds = array<i64: 1, 128>}, {transform_indices = @transform_4, window_bounds = array<i64: 32, 128>}]} {
    %c0_i32 = arith.constant 0 : i32
    %0 = arith.cmpi eq, %arg2, %c0_i32 : i32
    %1 = arith.extui %0 : i1 to i32
    %c0_i32_0 = arith.constant 0 : i32
    %2 = arith.cmpi ne, %1, %c0_i32_0 : i32
    scf.if %2 {
      %cst_10 = arith.constant 0.000000e+00 : f32
      %12 = vector.broadcast %cst_10 : f32 to vector<32x128xf32>
      %c0_11 = arith.constant 0 : index
      %c0_12 = arith.constant 0 : index
      %13 = vector.load %arg8[%c0_11, %c0_12] : memref<32x128xf32, #tpu.memory_space<vmem>>, vector<32x128xf32>
      tpu.vector_store %arg8[%c0_11, %c0_12], %12 {strides = array<i32>} : memref<32x128xf32, #tpu.memory_space<vmem>>, vector<32x128xf32>,
    } else {
    }
    %c0 = arith.constant 0 : index
    %c0_1 = arith.constant 0 : index
    %3 = vector.load %arg8[%c0, %c0_1] : memref<32x128xf32, #tpu.memory_space<vmem>>, vector<32x128xf32>
    %c0_2 = arith.constant 0 : index
    %c0_3 = arith.constant 0 : index
    %4 = vector.load %arg3[%c0_2, %c0_3] : memref<32x128xbf16, #tpu.memory_space<vmem>>, vector<32x128xbf16>
    %c0_4 = arith.constant 0 : index
    %c0_5 = arith.constant 0 : index
    %5 = vector.load %arg4[%c0_4, %c0_5] : memref<128x128xbf16, #tpu.memory_space<vmem>>, vector<128x128xbf16>
    %cst = arith.constant dense<0.000000e+00> : vector<32x128xf32>
    %6 = tpu.matmul %4, %5, %cst {dimension_numbers = #tpu.dot_dimension_numbers<[1], [0], [0], [1], [0, 0, 1, 1], [], []>} : vector<32x128xbf16>, vector<128x128xbf16>, vector<32x128xf32> -> vector<32x128xf32>
    %7 = arith.addf %3, %6 : vector<32x128xf32>
    %c0_6 = arith.constant 0 : index
    %c0_7 = arith.constant 0 : index
    %8 = vector.load %arg8[%c0_6, %c0_7] : memref<32x128xf32, #tpu.memory_space<vmem>>, vector<32x128xf32>
    tpu.vector_store %arg8[%c0_6, %c0_7], %7 {strides = array<i32>} : memref<32x128xf32, #tpu.memory_space<vmem>>, vector<32x128xf32>,
    %c0_i32_8 = arith.constant 0 : i32
    %9 = arith.cmpi eq, %arg2, %c0_i32_8 : i32
    %10 = arith.extui %9 : i1 to i32
    %c0_i32_9 = arith.constant 0 : i32
    %11 = arith.cmpi ne, %10, %c0_i32_9 : i32
    scf.if %11 {
      %c0_10 = arith.constant 0 : index
      %c0_11 = arith.constant 0 : index
      %12 = vector.load %arg8[%c0_10, %c0_11] : memref<32x128xf32, #tpu.memory_space<vmem>>, vector<32x128xf32>
      %c0_12 = arith.constant 0 : index
      %c0_13 = arith.constant 0 : index
      %13 = vector.load %arg5[%c0_12, %c0_13] : memref<1x128xf32, #tpu.memory_space<vmem>>, vector<1x128xf32>
      %14 = vector.broadcast %13 : vector<1x128xf32> to vector<32x128xf32>
      %15 = arith.addf %12, %14 : vector<32x128xf32>
      %c0_14 = arith.constant 0 : index
      %c0_15 = arith.constant 0 : index
      %16 = vector.load %arg6[%c0_14, %c0_15] : memref<1x128xf32, #tpu.memory_space<vmem>>, vector<1x128xf32>
      %cst_16 = arith.constant 5.000000e-01 : f32
      %17 = vector.broadcast %cst_16 : f32 to vector<1x128xf32>
      %18 = arith.cmpf ogt, %16, %17 : vector<1x128xf32>
      %cst_17 = arith.constant 0.000000e+00 : f32
      %19 = vector.broadcast %cst_17 : f32 to vector<32x128xf32>
      %20 = arith.maximumf %15, %19 : vector<32x128xf32>
      %21 = vector.shape_cast %18 : vector<1x128xi1> to vector<1x128xi1>
      %22 = vector.broadcast %21 : vector<1x128xi1> to vector<32x128xi1>
      %23 = arith.select %22, %20, %15 : vector<32x128xi1>, vector<32x128xf32>
      %c0_18 = arith.constant 0 : index
      %c0_19 = arith.constant 0 : index
      %24 = vector.load %arg7[%c0_18, %c0_19] : memref<32x128xf32, #tpu.memory_space<vmem>>, vector<32x128xf32>
      tpu.vector_store %arg7[%c0_18, %c0_19], %23 {strides = array<i32>} : memref<32x128xf32, #tpu.memory_space<vmem>>, vector<32x128xf32>,
    } else {
    }
    return
  }
  func.func @transform_0(%arg0: i32, %arg1: i32, %arg2: i32) -> (i32, i32) {
    %c0_i32 = arith.constant 0 : i32
    return %arg0, %arg2 : i32, i32
  }
  func.func @transform_1(%arg0: i32, %arg1: i32, %arg2: i32) -> (i32, i32) {
    %c0_i32 = arith.constant 0 : i32
    return %arg2, %arg1 : i32, i32
  }
  func.func @transform_2(%arg0: i32, %arg1: i32, %arg2: i32) -> (i32, i32) {
    %c0_i32 = arith.constant 0 : i32
    %c0_i32_0 = arith.constant 0 : i32
    return %c0_i32, %arg1 : i32, i32
  }
  func.func @transform_3(%arg0: i32, %arg1: i32, %arg2: i32) -> (i32, i32) {
    %c0_i32 = arith.constant 0 : i32
    %c0_i32_0 = arith.constant 0 : i32
    return %c0_i32, %arg1 : i32, i32
  }
  func.func @transform_4(%arg0: i32, %arg1: i32, %arg2: i32) -> (i32, i32) {
    %c0_i32 = arith.constant 0 : i32
    return %arg0, %arg1 : i32, i32
  }
}

</mosaic_0001>

<bundles_post_ra>
// kernel: pspnet_forward.54
= control target key start
LH: loop header
LB: loop body
LE: loop exit
PB: predicated region body
PF: predicated region fallthrough
CT: control target
= control target key end

     0   :  { %s1144_s15 = smov 0   ;;  %s1146_s16 = smov 0   ;;  %s1287_s0 = inlined_call_operand.vmem [shape: bf16[640,128], index: 0, kind: input, shape index: {}]   ;;  %s1288_s1 = inlined_call_operand.vmem [shape: bf16[128,128], index: 1, kind: input, shape index: {}]   ;;  %s1289_s2 = inlined_call_operand.vmem [shape: f32[1,128], index: 2, kind: input, shape index: {}]   ;;  %s1290_s3 = inlined_call_operand.vmem [shape: f32[1,128], index: 3, kind: input, shape index: {}]   ;;  %s1291_s4 = inlined_call_operand.vmem [shape: bf16[640,128], index: 4, kind: output, shape index: {}]  }
   0x1   :  { %s1148_s17 = smov 0  }
   0x2 LB: > { %s33_s18 = sadd.s32 1, %s1112_s16  ;;  %p886_p0 = scmp.ge.s32.totalorder %s1116_s17, 1  ;;  %s1116_s17 = sphi %s1148_s17, %s14_s17   ;;  %s1112_s16 = sphi %s1146_s16, %s1293_s16   ;;  %s1108_s15 = sphi %s1144_s15, %s1292_s15  }
   0x3   : > { %p35_p1 = scmp.ge.s32.totalorder %s33_s18, 5  ;;  %p221_p2 = scmp.lt.s32.totalorder %s1116_s17, 6 }
   0x5   : > { %s1295_s18 = smov (%p35_p1, %s33_s18), 0  ;;  %p222_p3 = pnand %p886_p0, %p221_p2 }
   0x6   : > { %s887_s21 = sshll.u32 (!%p222_p3), %s1108_s15, 4 }
   0x7   : > { %225 = sbr.rel (%p222_p3) target bundleno = 261 (0x105), region = 36  ;;  %p268_p4 = scmp.lt.s32.totalorder (!%p222_p3), %s887_s21, 79 }
   0xc   : > { %v1078_v0 = vld [vmem:[%s1288_s1 + $0x38] sm:$0xff]   ;;  %v1079_v1 = vld [vmem:[%s1288_s1 + $0x30] sm:$0xff]   ;;  %s1297_s21 = smov (!%p268_p4, %s887_s21), 79  ;;  %v1080_v2 = vld [vmem:[%s1288_s1 + $0x28] sm:$0xff]   ;;  %v655_v16 = vlaneseq  ;;  %v1118_v21 = vmov 0  }
   0xd   : > { %1005 = vmatprep.subr.bf16.mxu0 %v1078_v0  ;;  %1037 = vmatprep.subr.bf16.mxu1 %v1078_v0  ;;  %s888_s26 = sshll.u32 %s1297_s21, 2  ;;  %v1081_v3 = vld [vmem:[%s1288_s1 + $0x20] sm:$0xff]   ;;  %v1082_v6 = vld [vmem:[%s1288_s1 + $0x18] sm:$0xff]   ;;  %v1083_v7 = vld [vmem:[%s1288_s1 + $0x10] sm:$0xff]  }
   0xe   : > { %1006 = vmatpush3.bf16.msra.mxu0 %v1078_v0  ;;  %1045 = vmatpush3.bf16.msra.mxu1 %v1078_v0  ;;  %s1179_s29 = scalar_lea.vmem %s1287_s0, %s888_s26  ;;  %v1084_v8 = vld [vmem:[%s1288_s1 + $0x8] sm:$0xff]   ;;  %v1085_v9 = vld [vmem:[%s1288_s1] sm:$0xff]   ;;  %v656_v18 = vshrl.u32 %v655_v16, 7  ;;  %s1238_s24 = scalar_lea.vmem %s1291_s4, %s888_s26 }
   0xf   : > { %1007 = vmatprep.subr.bf16.mxu0 %v1079_v1  ;;  %1038 = vmatprep.subr.bf16.mxu1 %v1079_v1  ;;  %v1086_v4 = vld [vmem:[%s1179_s29] sm:$0xff]   ;;  %v1088_v10 = vld [vmem:[%s1179_s29 + $0x8] sm:$0xff]   ;;  %v1090_v12 = vld [vmem:[%s1179_s29 + $0x10] sm:$0xff]  }
  0x10   : > { %v1087_v5 = vld [vmem:[%s1179_s29 + $0x20] sm:$0xff]   ;;  %1021 = vmatprep.mubr.bf16.mxu0 %v1086_v4  ;;  %v1089_v11 = vld [vmem:[%s1179_s29 + $0x28] sm:$0xff]   ;;  %v1091_v13 = vld [vmem:[%s1179_s29 + $0x30] sm:$0xff]   ;;  %v657_v19 = vsub.s32 0, %v656_v18 }
  0x11   : > { %1029 = vmatprep.mubr.bf16.mxu1 %v1087_v5  ;;  %v1092_v14 = vld [vmem:[%s1179_s29 + $0x18] sm:$0xff]   ;;  %v636_v17 = vld [vmem:[%s1290_s3] sm:$0x1] }
  0x12   : > { %1008 = vmatpush3.bf16.msra.mxu0 %v1079_v1  ;;  %1046 = vmatpush3.bf16.msra.mxu1 %v1079_v1  ;;  %v1093_v15 = vld [vmem:[%s1179_s29 + $0x38] sm:$0xff]   ;;  %vm637_vm0 = vcmp.gt.f32.partialorder %v636_v17, 0.5  ;;  %v1210_v20 = vld [vmem:[%s1289_s2] ss:$0 sm:$0xff] }
  0x13   : > { %1009 = vmatprep.subr.bf16.mxu0 %v1080_v2  ;;  %1039 = vmatprep.subr.bf16.mxu1 %v1080_v2  ;;  %v654_v22 = vsel %vm637_vm0, 1, %v1118_v21 }
  0x14   : > { %v1213_v26 = vrot.slane %v654_v22, %v657_v19 }
  0x16   : > { %1010 = vmatpush3.bf16.msra.mxu0 %v1080_v2  ;;  %1047 = vmatpush3.bf16.msra.mxu1 %v1080_v2  ;;  %vm659_vm1 = vcmp.eq.s32.totalorder %v1213_v26, 1 }
  0x17   : > { %1011 = vmatprep.subr.bf16.mxu0 %v1081_v3  ;;  %1040 = vmatprep.subr.bf16.mxu1 %v1081_v3 }
  0x1a   : > { %1012 = vmatpush3.bf16.msra.mxu0 %v1081_v3  ;;  %1048 = vmatpush3.bf16.msra.mxu1 %v1081_v3 }
  0x1b   : > { %1013 = vmatprep.subr.bf16.mxu0 %v1082_v6  ;;  %1041 = vmatprep.subr.bf16.mxu1 %v1082_v6 }
  0x1e   : > { %1014 = vmatpush3.bf16.msra.mxu0 %v1082_v6  ;;  %1049 = vmatpush3.bf16.msra.mxu1 %v1082_v6 }
  0x1f   : > { %1015 = vmatprep.subr.bf16.mxu0 %v1083_v7  ;;  %1042 = vmatprep.subr.bf16.mxu1 %v1083_v7 }
  0x22   : > { %1016 = vmatpush3.bf16.msra.mxu0 %v1083_v7  ;;  %1050 = vmatpush3.bf16.msra.mxu1 %v1083_v7 }
  0x23   : > { %1017 = vmatprep.subr.bf16.mxu0 %v1084_v8  ;;  %1043 = vmatprep.subr.bf16.mxu1 %v1084_v8 }
  0x26   : > { %1018 = vmatpush3.bf16.msra.mxu0 %v1084_v8  ;;  %1051 = vmatpush3.bf16.msra.mxu1 %v1084_v8 }
  0x27   : > { %1019 = vmatprep.subr.bf16.mxu0 %v1085_v9  ;;  %1044 = vmatprep.subr.bf16.mxu1 %v1085_v9 }
  0x2a   : > { %1020 = vmatpush3.bf16.msra.mxu0 %v1085_v9  ;;  %1052 = vmatpush3.bf16.msra.mxu1 %v1085_v9 }
  0x2d   : > { %1022 = vmatmul.mubr.bf16.vlgmr.msra.gmra.mxu0 %v1088_v10  ;;  %1030 = vmatmul.mubr.bf16.vlgmr.msra.gmra.mxu1 %v1089_v11 }
  0x2e   : > { %1025 = vmatprep.mubr.bf16.mxu0 %v1090_v12  ;;  %1033 = vmatprep.mubr.bf16.mxu1 %v1091_v13 }
  0x35   : > { %1026 = vmatmul.mubr.bf16.gmra.mxu0 %v1092_v14  ;;  %1034 = vmatmul.mubr.bf16.gmra.mxu1 %v1093_v15 }
  0xed   : > { %v1023_v23 = vpop.f32.mrf.mxu0  ;;  %v1031_v24 = vpop.f32.mrf.mxu1 }
  0xee   : > { %v622_v25 = vadd.f32 %v1023_v23, %v1210_v20  ;;  %v630_v27 = vadd.f32 %v1031_v24, %v1210_v20 }
  0xef   : > { %v499_v28 = vpop.f32.mrf.mxu0  ;;  %v531_v29 = vpop.f32.mrf.mxu1 }
  0xf0   : > { %v620_v30 = vadd.f32 %v1210_v20, %v499_v28  ;;  %v628_v31 = vadd.f32 %v1210_v20, %v531_v29  ;;  %v640_v32 = vmax.f32 %v622_v25, 0.0  ;;  %v648_v33 = vmax.f32 %v630_v27, 0.0 }
  0xf1   : > { %v1024_v34 = vpop.f32.mrf.mxu0  ;;  %v1032_v35 = vpop.f32.mrf.mxu1 }
  0xf2   : > { %v638_v36 = vmax.f32 %v620_v30, 0.0  ;;  %v646_v37 = vmax.f32 %v628_v31, 0.0  ;;  %v623_v38 = vadd.f32 %v1024_v34, %v1210_v20  ;;  %v631_v39 = vadd.f32 %v1032_v35, %v1210_v20 }
  0xf3   : > { %v502_v40 = vpop.f32.mrf.mxu0  ;;  %v534_v41 = vpop.f32.mrf.mxu1  ;;  %v662_v44 = vsel %vm659_vm1, %v640_v32, %v622_v25  ;;  %v670_v45 = vsel %vm659_vm1, %v648_v33, %v630_v27 }
  0xf4   : > { %v621_v42 = vadd.f32 %v1210_v20, %v502_v40  ;;  %v629_v43 = vadd.f32 %v1210_v20, %v534_v41  ;;  %v641_v46 = vmax.f32 %v623_v38, 0.0  ;;  %v649_v47 = vmax.f32 %v631_v39, 0.0 }
  0xf5   : > { %v1027_v48 = vpop.f32.mrf.mxu0  ;;  %v1035_v49 = vpop.f32.mrf.mxu1  ;;  %v660_v54 = vsel %vm659_vm1, %v638_v36, %v620_v30  ;;  %v668_v55 = vsel %vm659_vm1, %v646_v37, %v628_v31 }
  0xf6   : > { %v639_v50 = vmax.f32 %v621_v42, 0.0  ;;  %v647_v51 = vmax.f32 %v629_v43, 0.0  ;;  %v626_v52 = vadd.f32 %v1027_v48, %v1210_v20  ;;  %v634_v53 = vadd.f32 %v1035_v49, %v1210_v20 }
  0xf7   : > { %v663_v56 = vsel %vm659_vm1, %v641_v46, %v623_v38  ;;  %v671_v57 = vsel %vm659_vm1, %v649_v47, %v631_v39  ;;  %v515_v58 = vpop.f32.mrf.mxu0  ;;  %v547_v59 = vpop.f32.mrf.mxu1 }
  0xf8   : > { %v950_v60 = vpack.c.bf16 %v663_v56, %v662_v44  ;;  %v970_v61 = vpack.c.bf16 %v671_v57, %v670_v45  ;;  %v661_v62 = vsel %vm659_vm1, %v639_v50, %v621_v42  ;;  %v669_v63 = vsel %vm659_vm1, %v647_v51, %v629_v43 }
  0xf9   : > { %v945_v0 = vpack.c.bf16 %v661_v62, %v660_v54  ;;  %v965_v1 = vpack.c.bf16 %v669_v63, %v668_v55  ;;  %v644_v2 = vmax.f32 %v626_v52, 0.0  ;;  %v652_v3 = vmax.f32 %v634_v53, 0.0  ;;  %v1028_v4 = vpop.f32.mrf.mxu0  ;;  %v1036_v5 = vpop.f32.mrf.mxu1 }
  0xfa   : > { %982 = vst [vmem:[%s1238_s24 + $0x8] sm:$0xff] %v950_v60   ;;  %986 = vst [vmem:[%s1238_s24 + $0x28] sm:$0xff] %v970_v61   ;;  %v624_v6 = vadd.f32 %v1210_v20, %v515_v58  ;;  %v632_v7 = vadd.f32 %v1210_v20, %v547_v59  ;;  %v627_v8 = vadd.f32 %v1028_v4, %v1210_v20 }
  0xfb   : > { %v635_v9 = vadd.f32 %v1036_v5, %v1210_v20  ;;  %946 = vst [vmem:[%s1238_s24] sm:$0xff] %v945_v0   ;;  %985 = vst [vmem:[%s1238_s24 + $0x20] sm:$0xff] %v965_v1   ;;  %v518_v10 = vpop.f32.mrf.mxu0  ;;  %v550_v11 = vpop.f32.mrf.mxu1  ;;  %v666_v18 = vsel %vm659_vm1, %v644_v2, %v626_v52  ;;  %v674_v19 = vsel %vm659_vm1, %v652_v3, %v634_v53 }
  0xfc   : > { %v645_v12 = vmax.f32 %v627_v8, 0.0  ;;  %v642_v14 = vmax.f32 %v624_v6, 0.0  ;;  %v650_v15 = vmax.f32 %v632_v7, 0.0  ;;  %v625_v16 = vadd.f32 %v1210_v20, %v518_v10 }
  0xfd   : > { %v653_v13 = vmax.f32 %v635_v9, 0.0  ;;  %v633_v17 = vadd.f32 %v1210_v20, %v550_v11 }
  0xfe   : > { %v667_v21 = vsel %vm659_vm1, %v645_v12, %v627_v8  ;;  %v643_v25 = vmax.f32 %v625_v16, 0.0  ;;  %v664_v20 = vsel %vm659_vm1, %v642_v14, %v624_v6  ;;  %v672_v28 = vsel %vm659_vm1, %v650_v15, %v632_v7 }
  0xff   : > { %v675_v22 = vsel %vm659_vm1, %v653_v13, %v635_v9  ;;  %v960_v23 = vpack.c.bf16 %v667_v21, %v666_v18  ;;  %v651_v27 = vmax.f32 %v633_v17, 0.0 }
 0x100   : > { %v980_v24 = vpack.c.bf16 %v675_v22, %v674_v19  ;;  %v665_v29 = vsel %vm659_vm1, %v643_v25, %v625_v16 }
 0x101   : > { %984 = vst [vmem:[%s1238_s24 + $0x18] sm:$0xff] %v960_v23   ;;  %v673_v30 = vsel %vm659_vm1, %v651_v27, %v633_v17  ;;  %v955_v31 = vpack.c.bf16 %v665_v29, %v664_v20 }
 0x102   : > { %988 = vst [vmem:[%s1238_s24 + $0x38] sm:$0xff] %v980_v24   ;;  %v975_v32 = vpack.c.bf16 %v673_v30, %v672_v28 }
 0x103   : > { %983 = vst [vmem:[%s1238_s24 + $0x10] sm:$0xff] %v955_v31  }
 0x104   : > { %987 = vst [vmem:[%s1238_s24 + $0x30] sm:$0xff] %v975_v32  }
 0x105 PF: > { %s14_s17 = sadd.s32 1, %s1116_s17   ;;  %s1292_s15 = smov %s1112_s16 }
 0x106   : > { %p11_p5 = scmp.ge.s32.totalorder %s14_s17, 7   ;;  %s1293_s16 = smov %s1295_s18 }
 0x108   :  { %13 = sbr.rel (!%p11_p5) target bundleno = 2 (0x2), region = 83 }

// kernel: pspnet_forward.57
= control target key start
LH: loop header
LB: loop body
LE: loop exit
PB: predicated region body
PF: predicated region fallthrough
CT: control target
= control target key end

     0   :  { %s1028_s15 = smov 0   ;;  %s1030_s16 = smov 0   ;;  %s1118_s0 = inlined_call_operand.vmem [shape: bf16[192,128], index: 0, kind: input, shape index: {}]   ;;  %s1119_s1 = inlined_call_operand.vmem [shape: bf16[128,128], index: 1, kind: input, shape index: {}]   ;;  %s1120_s2 = inlined_call_operand.vmem [shape: f32[1,128], index: 2, kind: input, shape index: {}]   ;;  %s1121_s3 = inlined_call_operand.vmem [shape: f32[1,128], index: 3, kind: input, shape index: {}]   ;;  %s1122_s4 = inlined_call_operand.vmem [shape: bf16[192,128], index: 4, kind: output, shape index: {}]  }
   0x1   :  { %s1032_s17 = smov 0  }
   0x2 LB: > { %s33_s18 = sadd.s32 1, %s996_s16  ;;  %p802_p0 = scmp.ge.s32.totalorder %s1000_s17, 1  ;;  %s1000_s17 = sphi %s1032_s17, %s14_s17   ;;  %s996_s16 = sphi %s1030_s16, %s1124_s16   ;;  %s992_s15 = sphi %s1028_s15, %s1123_s15  }
   0x3   : > { %p35_p1 = scmp.ge.s32.totalorder %s33_s18, 2  ;;  %p221_p2 = scmp.lt.s32.totalorder %s1000_s17, 3 }
   0x5   : > { %s1126_s18 = smov (%p35_p1, %s33_s18), 0  ;;  %p222_p3 = pnand %p802_p0, %p221_p2 }
   0x6   : > { %s267_s21 = smul.u32 (!%p222_p3), 12, %s992_s15 }
   0x7   : > { %225 = sbr.rel (%p222_p3) target bundleno = 260 (0x104), region = 36 }
   0x8   : > { %p268_p4 = scmp.lt.s32.totalorder (!%p222_p3), %s267_s21, 23 }
   0xc   : > { %v964_v0 = vld [vmem:[%s1119_s1 + $0x38] sm:$0xff]   ;;  %v965_v1 = vld [vmem:[%s1119_s1 + $0x30] sm:$0xff]   ;;  %v966_v2 = vld [vmem:[%s1119_s1 + $0x28] sm:$0xff]   ;;  %s1128_s21 = smov (!%p268_p4, %s267_s21), 23  ;;  %v595_v14 = vlaneseq  ;;  %v1002_v20 = vmov 0  }
   0xd   : > { %895 = vmatprep.subr.bf16.mxu0 %v964_v0  ;;  %923 = vmatprep.subr.bf16.mxu1 %v964_v0  ;;  %s803_s26 = sshll.u32 %s1128_s21, 2  ;;  %v967_v3 = vld [vmem:[%s1119_s1 + $0x20] sm:$0xff]   ;;  %v968_v6 = vld [vmem:[%s1119_s1 + $0x18] sm:$0xff]   ;;  %v969_v7 = vld [vmem:[%s1119_s1 + $0x10] sm:$0xff]  }
   0xe   : > { %896 = vmatpush3.bf16.msra.mxu0 %v964_v0  ;;  %931 = vmatpush3.bf16.msra.mxu1 %v964_v0  ;;  %s1066_s5 = scalar_lea.vmem %s1118_s0, %s803_s26  ;;  %v970_v8 = vld [vmem:[%s1119_s1 + $0x8] sm:$0xff]   ;;  %v971_v9 = vld [vmem:[%s1119_s1] sm:$0xff]   ;;  %v596_v16 = vshrl.u32 %v595_v14, 7  ;;  %s298_s24 = scalar_lea.vmem %s1122_s4, %s803_s26 }
   0xf   : > { %897 = vmatprep.subr.bf16.mxu0 %v965_v1  ;;  %924 = vmatprep.subr.bf16.mxu1 %v965_v1  ;;  %v972_v4 = vld [vmem:[%s1066_s5] sm:$0xff]   ;;  %v973_v5 = vld [vmem:[%s1066_s5 + $0x10] sm:$0xff]   ;;  %v974_v10 = vld [vmem:[%s1066_s5 + $0x8] sm:$0xff]  }
  0x10   : > { %911 = vmatprep.mubr.bf16.mxu0 %v972_v4  ;;  %915 = vmatprep.mubr.bf16.mxu1 %v973_v5  ;;  %v975_v11 = vld [vmem:[%s1066_s5 + $0x18] sm:$0xff]   ;;  %v976_v12 = vld [vmem:[%s1066_s5 + $0x20] sm:$0xff]   ;;  %v977_v13 = vld [vmem:[%s1066_s5 + $0x28] sm:$0xff]   ;;  %v597_v18 = vsub.s32 0, %v596_v16 }
  0x11   : > { %v580_v15 = vld [vmem:[%s1121_s3] sm:$0x1] }
  0x12   : > { %898 = vmatpush3.bf16.msra.mxu0 %v965_v1  ;;  %932 = vmatpush3.bf16.msra.mxu1 %v965_v1  ;;  %vm581_vm0 = vcmp.gt.f32.partialorder %v580_v15, 0.5  ;;  %v819_v17 = vld [vmem:[%s1120_s2] ss:$0 sm:$0xff] }
  0x13   : > { %899 = vmatprep.subr.bf16.mxu0 %v966_v2  ;;  %925 = vmatprep.subr.bf16.mxu1 %v966_v2  ;;  %v594_v21 = vsel %vm581_vm0, 1, %v1002_v20 }
  0x14   : > { %v598_v27 = vrot.slane %v594_v21, %v597_v18 }
  0x16   : > { %900 = vmatpush3.bf16.msra.mxu0 %v966_v2  ;;  %933 = vmatpush3.bf16.msra.mxu1 %v966_v2  ;;  %vm599_vm1 = vcmp.eq.s32.totalorder %v598_v27, 1 }
  0x17   : > { %901 = vmatprep.subr.bf16.mxu0 %v967_v3  ;;  %926 = vmatprep.subr.bf16.mxu1 %v967_v3 }
  0x1a   : > { %902 = vmatpush3.bf16.msra.mxu0 %v967_v3  ;;  %934 = vmatpush3.bf16.msra.mxu1 %v967_v3 }
  0x1b   : > { %903 = vmatprep.subr.bf16.mxu0 %v968_v6  ;;  %927 = vmatprep.subr.bf16.mxu1 %v968_v6 }
  0x1e   : > { %904 = vmatpush3.bf16.msra.mxu0 %v968_v6  ;;  %935 = vmatpush3.bf16.msra.mxu1 %v968_v6 }
  0x1f   : > { %905 = vmatprep.subr.bf16.mxu0 %v969_v7  ;;  %928 = vmatprep.subr.bf16.mxu1 %v969_v7 }
  0x22   : > { %906 = vmatpush3.bf16.msra.mxu0 %v969_v7  ;;  %936 = vmatpush3.bf16.msra.mxu1 %v969_v7 }
  0x23   : > { %907 = vmatprep.subr.bf16.mxu0 %v970_v8  ;;  %929 = vmatprep.subr.bf16.mxu1 %v970_v8 }
  0x26   : > { %908 = vmatpush3.bf16.msra.mxu0 %v970_v8  ;;  %937 = vmatpush3.bf16.msra.mxu1 %v970_v8 }
  0x27   : > { %909 = vmatprep.subr.bf16.mxu0 %v971_v9  ;;  %930 = vmatprep.subr.bf16.mxu1 %v971_v9 }
  0x2a   : > { %910 = vmatpush3.bf16.msra.mxu0 %v971_v9  ;;  %938 = vmatpush3.bf16.msra.mxu1 %v971_v9 }
  0x2d   : > { %912 = vmatmul.mubr.bf16.vlgmr.msra.gmra.mxu0 %v974_v10  ;;  %916 = vmatmul.mubr.bf16.vlgmr.msra.gmra.mxu1 %v975_v11 }
  0x2e   : > { %919 = vmatprep.mubr.bf16.mxu1 %v976_v12 }
  0x35   : > { %920 = vmatmul.mubr.bf16.gmra.mxu1 %v977_v13 }
  0xed   : > { %v913_v19 = vpop.f32.mrf.mxu0  ;;  %v917_v22 = vpop.f32.mrf.mxu1 }
  0xee   : > { %v570_v23 = vadd.f32 %v913_v19, %v819_v17  ;;  %v574_v24 = vadd.f32 %v917_v22, %v819_v17 }
  0xef   : > { %v475_v25 = vpop.f32.mrf.mxu0  ;;  %v491_v26 = vpop.f32.mrf.mxu1 }
  0xf0   : > { %v568_v28 = vadd.f32 %v819_v17, %v475_v25  ;;  %v572_v29 = vadd.f32 %v819_v17, %v491_v26  ;;  %v584_v30 = vmax.f32 %v570_v23, 0.0  ;;  %v588_v34 = vmax.f32 %v574_v24, 0.0 }
  0xf1   : > { %v914_v31 = vpop.f32.mrf.mxu0  ;;  %v918_v32 = vpop.f32.mrf.mxu1 }
  0xf2   : > { %v582_v33 = vmax.f32 %v568_v28, 0.0  ;;  %v586_v35 = vmax.f32 %v572_v29, 0.0  ;;  %v571_v36 = vadd.f32 %v914_v31, %v819_v17  ;;  %v575_v37 = vadd.f32 %v918_v32, %v819_v17 }
  0xf3   : > { %v478_v38 = vpop.f32.mrf.mxu0  ;;  %v494_v39 = vpop.f32.mrf.mxu1  ;;  %v602_v42 = vsel %vm599_vm1, %v584_v30, %v570_v23  ;;  %v606_v50 = vsel %vm599_vm1, %v588_v34, %v574_v24 }
  0xf4   : > { %v569_v40 = vadd.f32 %v819_v17, %v478_v38  ;;  %v573_v41 = vadd.f32 %v819_v17, %v494_v39  ;;  %v585_v43 = vmax.f32 %v571_v36, 0.0  ;;  %v589_v44 = vmax.f32 %v575_v37, 0.0 }
  0xf5   : > { %v921_v45 = vpop.f32.mrf.mxu1  ;;  %v600_v46 = vsel %vm599_vm1, %v582_v33, %v568_v28  ;;  %v604_v51 = vsel %vm599_vm1, %v586_v35, %v572_v29 }
  0xf6   : > { %v583_v47 = vmax.f32 %v569_v40, 0.0  ;;  %v587_v48 = vmax.f32 %v573_v41, 0.0  ;;  %v578_v49 = vadd.f32 %v921_v45, %v819_v17  ;;  %v603_v52 = vsel %vm599_vm1, %v585_v43, %v571_v36 }
  0xf7   : > { %v607_v53 = vsel %vm599_vm1, %v589_v44, %v575_v37  ;;  %v507_v54 = vpop.f32.mrf.mxu1  ;;  %v854_v55 = vpack.c.bf16 %v603_v52, %v602_v42 }
  0xf8   : > { %v864_v56 = vpack.c.bf16 %v607_v53, %v606_v50  ;;  %v601_v57 = vsel %vm599_vm1, %v583_v47, %v569_v40  ;;  %v605_v58 = vsel %vm599_vm1, %v587_v48, %v573_v41  ;;  %v576_v61 = vadd.f32 %v819_v17, %v507_v54 }
  0xf9   : > { %v849_v59 = vpack.c.bf16 %v601_v57, %v600_v46  ;;  %v859_v60 = vpack.c.bf16 %v605_v58, %v604_v51  ;;  %v922_v62 = vpop.f32.mrf.mxu1  ;;  %876 = vst [vmem:[%s298_s24 + $0x8] sm:$0xff] %v854_v55   ;;  %v592_v63 = vmax.f32 %v578_v49, 0.0 }
  0xfa   : > { %878 = vst [vmem:[%s298_s24 + $0x18] sm:$0xff] %v864_v56   ;;  %v579_v0 = vadd.f32 %v922_v62, %v819_v17  ;;  %v590_v2 = vmax.f32 %v576_v61, 0.0 }
  0xfb   : > { %850 = vst [vmem:[%s298_s24] sm:$0xff] %v849_v59   ;;  %877 = vst [vmem:[%s298_s24 + $0x10] sm:$0xff] %v859_v60   ;;  %v510_v1 = vpop.f32.mrf.mxu1  ;;  %v610_v5 = vsel %vm599_vm1, %v592_v63, %v578_v49 }
  0xfc   : > { %v593_v3 = vmax.f32 %v579_v0, 0.0  ;;  %v577_v4 = vadd.f32 %v819_v17, %v510_v1  ;;  %v608_v9 = vsel %vm599_vm1, %v590_v2, %v576_v61 }
  0xfe   : > { %v611_v6 = vsel %vm599_vm1, %v593_v3, %v579_v0  ;;  %v591_v7 = vmax.f32 %v577_v4, 0.0 }
  0xff   : > { %v874_v8 = vpack.c.bf16 %v611_v6, %v610_v5 }
 0x100   : > { %v609_v10 = vsel %vm599_vm1, %v591_v7, %v577_v4 }
 0x101   : > { %880 = vst [vmem:[%s298_s24 + $0x28] sm:$0xff] %v874_v8   ;;  %v869_v11 = vpack.c.bf16 %v609_v10, %v608_v9 }
 0x103   : > { %879 = vst [vmem:[%s298_s24 + $0x20] sm:$0xff] %v869_v11  }
 0x104 PF: > { %s14_s17 = sadd.s32 1, %s1000_s17   ;;  %s1123_s15 = smov %s996_s16 }
 0x105   : > { %p11_p5 = scmp.ge.s32.totalorder %s14_s17, 4   ;;  %s1124_s16 = smov %s1126_s18 }
 0x107   :  { %13 = sbr.rel (!%p11_p5) target bundleno = 2 (0x2), region = 83 }

// kernel: pspnet_forward.59
= control target key start
LH: loop header
LB: loop body
LE: loop exit
PB: predicated region body
PF: predicated region fallthrough
CT: control target
= control target key end

     0   :  { %s1093_s15 = smov 0   ;;  %s1095_s16 = smov 0   ;;  %s1191_s0 = inlined_call_operand.vmem [shape: bf16[192,128], index: 0, kind: input, shape index: {}]   ;;  %s1192_s1 = inlined_call_operand.vmem [shape: bf16[128,128], index: 1, kind: input, shape index: {}]   ;;  %s1193_s2 = inlined_call_operand.vmem [shape: f32[1,128], index: 2, kind: input, shape index: {}]   ;;  %s1194_s3 = inlined_call_operand.vmem [shape: bf16[192,128], index: 3, kind: input, shape index: {}]   ;;  %s1195_s4 = inlined_call_operand.vmem [shape: bf16[192,128], index: 4, kind: output, shape index: {}]  }
   0x1   :  { %s1097_s17 = smov 0  }
   0x2 LB: > { %s33_s18 = sadd.s32 1, %s1062_s16  ;;  %p839_p0 = scmp.ge.s32.totalorder %s1066_s17, 1  ;;  %s1066_s17 = sphi %s1097_s17, %s14_s17   ;;  %s1062_s16 = sphi %s1095_s16, %s1197_s16   ;;  %s1058_s15 = sphi %s1093_s15, %s1196_s15  }
   0x3   : > { %p35_p1 = scmp.ge.s32.totalorder %s33_s18, 2  ;;  %p229_p2 = scmp.lt.s32.totalorder %s1066_s17, 3 }
   0x5   : > { %s1199_s18 = smov (%p35_p1, %s33_s18), 0  ;;  %p230_p3 = pnand %p839_p0, %p229_p2 }
   0x6   : > { %s280_s21 = smul.u32 (!%p230_p3), 12, %s1058_s15 }
   0x7   : > { %233 = sbr.rel (%p230_p3) target bundleno = 261 (0x105), region = 36 }
   0x8   : > { %p281_p4 = scmp.lt.s32.totalorder (!%p230_p3), %s280_s21, 23 }
   0xc   : > { %v1030_v0 = vld [vmem:[%s1192_s1 + $0x38] sm:$0xff]   ;;  %v1031_v1 = vld [vmem:[%s1192_s1 + $0x30] sm:$0xff]   ;;  %v1032_v2 = vld [vmem:[%s1192_s1 + $0x28] sm:$0xff]   ;;  %s1201_s21 = smov (!%p281_p4, %s280_s21), 23 }
   0xd   : > { %990 = vmatprep.subr.bf16.mxu1 %v1030_v0  ;;  %962 = vmatprep.subr.bf16.mxu0 %v1030_v0  ;;  %s1120_s26 = sshll.u32 %s1201_s21, 2  ;;  %v1033_v3 = vld [vmem:[%s1192_s1 + $0x20] sm:$0xff]   ;;  %v1034_v6 = vld [vmem:[%s1192_s1 + $0x18] sm:$0xff]   ;;  %v1035_v7 = vld [vmem:[%s1192_s1 + $0x10] sm:$0xff]  }
   0xe   : > { %998 = vmatpush3.bf16.msra.mxu1 %v1030_v0  ;;  %963 = vmatpush3.bf16.msra.mxu0 %v1030_v0  ;;  %s1129_s5 = scalar_lea.vmem %s1191_s0, %s1120_s26  ;;  %v1036_v8 = vld [vmem:[%s1192_s1 + $0x8] sm:$0xff]   ;;  %v1037_v9 = vld [vmem:[%s1192_s1] sm:$0xff]   ;;  %s1153_s19 = scalar_lea.vmem %s1194_s3, %s1120_s26 }
   0xf   : > { %991 = vmatprep.subr.bf16.mxu1 %v1031_v1  ;;  %964 = vmatprep.subr.bf16.mxu0 %v1031_v1  ;;  %v1038_v4 = vld [vmem:[%s1129_s5 + $0x10] sm:$0xff]   ;;  %v1040_v5 = vld [vmem:[%s1129_s5] sm:$0xff]   ;;  %v1039_v10 = vld [vmem:[%s1129_s5 + $0x18] sm:$0xff]   ;;  %s317_s24 = scalar_lea.vmem %s1195_s4, %s1120_s26 }
  0x10   : > { %982 = vmatprep.mubr.bf16.mxu1 %v1038_v4  ;;  %978 = vmatprep.mubr.bf16.mxu0 %v1040_v5  ;;  %v1041_v11 = vld [vmem:[%s1129_s5 + $0x8] sm:$0xff]   ;;  %v1042_v12 = vld [vmem:[%s1129_s5 + $0x20] sm:$0xff]   ;;  %v940_v17 = vld [vmem:[%s1153_s19 + $0x18] sm:$0xff]  }
  0x11   : > { %v1043_v13 = vld [vmem:[%s1129_s5 + $0x28] sm:$0xff]   ;;  %v885_v15 = vld [vmem:[%s1153_s19] sm:$0xff]   ;;  %v939_v21 = vld [vmem:[%s1153_s19 + $0x10] sm:$0xff]   ;;  %v898_v25 = vunpack.c.l.bf16 %v940_v17  ;;  %v899_v33 = vunpack.c.h.bf16 %v940_v17 }
  0x12   : > { %999 = vmatpush3.bf16.msra.mxu1 %v1031_v1  ;;  %965 = vmatpush3.bf16.msra.mxu0 %v1031_v1  ;;  %v938_v14 = vld [vmem:[%s1153_s19 + $0x8] sm:$0xff]   ;;  %v1160_v16 = vld [vmem:[%s1193_s2] ss:$0 sm:$0xff]  ;;  %v886_v23 = vunpack.c.l.bf16 %v885_v15  ;;  %v894_v29 = vunpack.c.l.bf16 %v939_v21  ;;  %v895_v37 = vunpack.c.h.bf16 %v939_v21  ;;  %v887_v38 = vunpack.c.h.bf16 %v885_v15 }
  0x13   : > { %992 = vmatprep.subr.bf16.mxu1 %v1032_v2  ;;  %966 = vmatprep.subr.bf16.mxu0 %v1032_v2  ;;  %v890_v20 = vunpack.c.l.bf16 %v938_v14  ;;  %v891_v35 = vunpack.c.h.bf16 %v938_v14  ;;  %v942_v39 = vld [vmem:[%s1153_s19 + $0x28] sm:$0xff]   ;;  %v941_v45 = vld [vmem:[%s1153_s19 + $0x20] sm:$0xff]  }
  0x14   : > { %v906_v53 = vunpack.c.l.bf16 %v942_v39  ;;  %v902_v57 = vunpack.c.l.bf16 %v941_v45 }
  0x16   : > { %1000 = vmatpush3.bf16.msra.mxu1 %v1032_v2  ;;  %967 = vmatpush3.bf16.msra.mxu0 %v1032_v2 }
  0x17   : > { %993 = vmatprep.subr.bf16.mxu1 %v1033_v3  ;;  %968 = vmatprep.subr.bf16.mxu0 %v1033_v3 }
  0x1a   : > { %1001 = vmatpush3.bf16.msra.mxu1 %v1033_v3  ;;  %969 = vmatpush3.bf16.msra.mxu0 %v1033_v3 }
  0x1b   : > { %994 = vmatprep.subr.bf16.mxu1 %v1034_v6  ;;  %970 = vmatprep.subr.bf16.mxu0 %v1034_v6 }
  0x1e   : > { %1002 = vmatpush3.bf16.msra.mxu1 %v1034_v6  ;;  %971 = vmatpush3.bf16.msra.mxu0 %v1034_v6  ;;  %v907_v6 = vunpack.c.h.bf16 %v942_v39 }
  0x1f   : > { %995 = vmatprep.subr.bf16.mxu1 %v1035_v7  ;;  %972 = vmatprep.subr.bf16.mxu0 %v1035_v7 }
  0x22   : > { %1003 = vmatpush3.bf16.msra.mxu1 %v1035_v7  ;;  %973 = vmatpush3.bf16.msra.mxu0 %v1035_v7 }
  0x23   : > { %996 = vmatprep.subr.bf16.mxu1 %v1036_v8  ;;  %974 = vmatprep.subr.bf16.mxu0 %v1036_v8 }
  0x26   : > { %1004 = vmatpush3.bf16.msra.mxu1 %v1036_v8  ;;  %975 = vmatpush3.bf16.msra.mxu0 %v1036_v8 }
  0x27   : > { %997 = vmatprep.subr.bf16.mxu1 %v1037_v9  ;;  %976 = vmatprep.subr.bf16.mxu0 %v1037_v9 }
  0x2a   : > { %1005 = vmatpush3.bf16.msra.mxu1 %v1037_v9  ;;  %977 = vmatpush3.bf16.msra.mxu0 %v1037_v9  ;;  %v903_v9 = vunpack.c.h.bf16 %v941_v45 }
  0x2d   : > { %983 = vmatmul.mubr.bf16.vlgmr.msra.gmra.mxu1 %v1039_v10  ;;  %979 = vmatmul.mubr.bf16.vlgmr.msra.gmra.mxu0 %v1041_v11 }
  0x2e   : > { %986 = vmatprep.mubr.bf16.mxu1 %v1042_v12 }
  0x35   : > { %987 = vmatmul.mubr.bf16.gmra.mxu1 %v1043_v13 }
  0xed   : > { %v984_v18 = vpop.f32.mrf.mxu1  ;;  %v980_v19 = vpop.f32.mrf.mxu0 }
  0xee   : > { %v589_v22 = vadd.f32 %v980_v19, %v1160_v16  ;;  %v593_v24 = vadd.f32 %v984_v18, %v1160_v16 }
  0xef   : > { %v510_v26 = vpop.f32.mrf.mxu1  ;;  %v494_v27 = vpop.f32.mrf.mxu0 }
  0xf0   : > { %v591_v28 = vadd.f32 %v1160_v16, %v510_v26  ;;  %v587_v30 = vadd.f32 %v1160_v16, %v494_v27  ;;  %v625_v31 = vadd.f32 %v890_v20, %v589_v22  ;;  %v629_v40 = vadd.f32 %v898_v25, %v593_v24 }
  0xf1   : > { %v985_v32 = vpop.f32.mrf.mxu1  ;;  %v981_v34 = vpop.f32.mrf.mxu0 }
  0xf2   : > { %v623_v36 = vadd.f32 %v886_v23, %v587_v30  ;;  %v594_v41 = vadd.f32 %v985_v32, %v1160_v16  ;;  %v590_v42 = vadd.f32 %v981_v34, %v1160_v16  ;;  %v627_v46 = vadd.f32 %v894_v29, %v591_v28 }
  0xf3   : > { %v513_v43 = vpop.f32.mrf.mxu1  ;;  %v497_v44 = vpop.f32.mrf.mxu0  ;;  %v637_v49 = vmax.f32 %v625_v31, 0.0  ;;  %v641_v58 = vmax.f32 %v629_v40, 0.0 }
  0xf4   : > { %v592_v47 = vadd.f32 %v1160_v16, %v513_v43  ;;  %v588_v48 = vadd.f32 %v1160_v16, %v497_v44  ;;  %v630_v50 = vadd.f32 %v899_v33, %v594_v41  ;;  %v626_v51 = vadd.f32 %v891_v35, %v590_v42 }
  0xf5   : > { %v988_v52 = vpop.f32.mrf.mxu1  ;;  %v635_v54 = vmax.f32 %v623_v36, 0.0  ;;  %v639_v63 = vmax.f32 %v627_v46, 0.0 }
  0xf6   : > { %v628_v55 = vadd.f32 %v895_v37, %v592_v47  ;;  %v624_v56 = vadd.f32 %v887_v38, %v588_v48  ;;  %v642_v59 = vmax.f32 %v630_v50, 0.0  ;;  %v638_v60 = vmax.f32 %v626_v51, 0.0 }
  0xf7   : > { %v597_v61 = vadd.f32 %v988_v52, %v1160_v16  ;;  %v526_v62 = vpop.f32.mrf.mxu1 }
  0xf8   : > { %v640_v0 = vmax.f32 %v628_v55, 0.0  ;;  %v636_v1 = vmax.f32 %v624_v56, 0.0  ;;  %v595_v2 = vadd.f32 %v1160_v16, %v526_v62  ;;  %v926_v3 = vpack.c.bf16 %v642_v59, %v641_v58 }
  0xf9   : > { %v916_v4 = vpack.c.bf16 %v638_v60, %v637_v49  ;;  %v989_v5 = vpop.f32.mrf.mxu1  ;;  %v633_v10 = vadd.f32 %v906_v53, %v597_v61 }
  0xfa   : > { %v921_v7 = vpack.c.bf16 %v640_v0, %v639_v63  ;;  %v911_v8 = vpack.c.bf16 %v636_v1, %v635_v54  ;;  %945 = vst [vmem:[%s317_s24 + $0x18] sm:$0xff] %v926_v3   ;;  %v598_v11 = vadd.f32 %v989_v5, %v1160_v16  ;;  %v631_v13 = vadd.f32 %v902_v57, %v595_v2 }
  0xfb   : > { %943 = vst [vmem:[%s317_s24 + $0x8] sm:$0xff] %v916_v4   ;;  %v529_v12 = vpop.f32.mrf.mxu1  ;;  %v645_v18 = vmax.f32 %v633_v10, 0.0 }
  0xfc   : > { %944 = vst [vmem:[%s317_s24 + $0x10] sm:$0xff] %v921_v7   ;;  %912 = vst [vmem:[%s317_s24] sm:$0xff] %v911_v8   ;;  %v596_v14 = vadd.f32 %v1160_v16, %v529_v12  ;;  %v634_v15 = vadd.f32 %v907_v6, %v598_v11  ;;  %v643_v20 = vmax.f32 %v631_v13, 0.0 }
  0xfe   : > { %v632_v17 = vadd.f32 %v903_v9, %v596_v14  ;;  %v646_v19 = vmax.f32 %v634_v15, 0.0 }
 0x100   : > { %v644_v21 = vmax.f32 %v632_v17, 0.0  ;;  %v936_v22 = vpack.c.bf16 %v646_v19, %v645_v18 }
 0x102   : > { %v931_v23 = vpack.c.bf16 %v644_v21, %v643_v20  ;;  %947 = vst [vmem:[%s317_s24 + $0x28] sm:$0xff] %v936_v22  }
 0x104   : > { %946 = vst [vmem:[%s317_s24 + $0x20] sm:$0xff] %v931_v23  }
 0x105 PF: > { %s14_s17 = sadd.s32 1, %s1066_s17   ;;  %s1196_s15 = smov %s1062_s16 }
 0x106   : > { %p11_p5 = scmp.ge.s32.totalorder %s14_s17, 4   ;;  %s1197_s16 = smov %s1199_s18 }
 0x108   :  { %13 = sbr.rel (!%p11_p5) target bundleno = 2 (0x2), region = 83 }

// kernel: pspnet_forward.67
= control target key start
LH: loop header
LB: loop body
LE: loop exit
PB: predicated region body
PF: predicated region fallthrough
CT: control target
= control target key end

     0   :  { %s786_s15 = smov 0   ;;  %s788_s16 = smov 0   ;;  %s856_s0 = inlined_call_operand.vmem [shape: bf16[64,128], index: 0, kind: input, shape index: {}]   ;;  %s857_s1 = inlined_call_operand.vmem [shape: bf16[128,128], index: 1, kind: input, shape index: {}]   ;;  %s858_s2 = inlined_call_operand.vmem [shape: f32[1,128], index: 2, kind: input, shape index: {}]   ;;  %s859_s3 = inlined_call_operand.vmem [shape: f32[1,128], index: 3, kind: input, shape index: {}]   ;;  %s860_s4 = inlined_call_operand.vmem [shape: bf16[64,128], index: 4, kind: output, shape index: {}]  }
   0x1   :  { %s790_s17 = smov 0  }
   0x2 LB: > { %s33_s18 = sadd.s32 1, %s754_s16  ;;  %p634_p0 = scmp.ge.s32.totalorder %s758_s17, 1  ;;  %s758_s17 = sphi %s790_s17, %s14_s17   ;;  %s754_s16 = sphi %s788_s16, %s862_s16   ;;  %s750_s15 = sphi %s786_s15, %s861_s15  }
   0x3   : > { %p35_p1 = scmp.ge.s32.totalorder %s33_s18, 2  ;;  %p221_p2 = scmp.lt.s32.totalorder %s758_s17, 3 }
   0x5   : > { %s864_s18 = smov (%p35_p1, %s33_s18), 0  ;;  %p222_p3 = pnand %p634_p0, %p221_p2 }
   0x6   : > { %s635_s21 = sshll.u32 (!%p222_p3), %s750_s15, 2 }
   0x7   : > { %225 = sbr.rel (%p222_p3) target bundleno = 252 (0xfc), region = 36  ;;  %p268_p4 = scmp.lt.s32.totalorder (!%p222_p3), %s635_s21, 7 }
   0xc   : > { %v726_v0 = vld [vmem:[%s857_s1 + $0x38] sm:$0xff]   ;;  %v727_v1 = vld [vmem:[%s857_s1 + $0x30] sm:$0xff]   ;;  %s866_s21 = smov (!%p268_p4, %s635_s21), 7  ;;  %v728_v2 = vld [vmem:[%s857_s1 + $0x28] sm:$0xff]   ;;  %v475_v10 = vlaneseq  ;;  %v760_v16 = vmov 0  }
   0xd   : > { %681 = vmatprep.subr.bf16.mxu0 %v726_v0  ;;  %s636_s26 = sshll.u32 %s866_s21, 2  ;;  %v729_v3 = vld [vmem:[%s857_s1 + $0x20] sm:$0xff]   ;;  %v730_v5 = vld [vmem:[%s857_s1 + $0x18] sm:$0xff]   ;;  %v731_v6 = vld [vmem:[%s857_s1 + $0x10] sm:$0xff]  }
   0xe   : > { %682 = vmatpush3.bf16.msra.mxu0 %v726_v0  ;;  %s274_s29 = scalar_lea.vmem %s856_s0, %s636_s26  ;;  %v732_v7 = vld [vmem:[%s857_s1 + $0x8] sm:$0xff]   ;;  %v733_v8 = vld [vmem:[%s857_s1] sm:$0xff]   ;;  %v476_v12 = vshrl.u32 %v475_v10, 7  ;;  %s298_s24 = scalar_lea.vmem %s860_s4, %s636_s26 }
   0xf   : > { %683 = vmatprep.subr.bf16.mxu0 %v727_v1  ;;  %v734_v4 = vld [vmem:[%s274_s29] sm:$0xff]   ;;  %v735_v9 = vld [vmem:[%s274_s29 + $0x8] sm:$0xff]  }
  0x10   : > { %697 = vmatprep.mubr.bf16.mxu0 %v734_v4  ;;  %v468_v11 = vld [vmem:[%s859_s3] sm:$0x1]  ;;  %v477_v15 = vsub.s32 0, %v476_v12 }
  0x11   : > { %vm469_vm0 = vcmp.gt.f32.partialorder %v468_v11, 0.5  ;;  %v649_v14 = vld [vmem:[%s858_s2] ss:$0 sm:$0xff] }
  0x12   : > { %684 = vmatpush3.bf16.msra.mxu0 %v727_v1  ;;  %v474_v17 = vsel %vm469_vm0, 1, %v760_v16 }
  0x13   : > { %685 = vmatprep.subr.bf16.mxu0 %v728_v2  ;;  %v478_v22 = vrot.slane %v474_v17, %v477_v15 }
  0x15   : > { %vm479_vm1 = vcmp.eq.s32.totalorder %v478_v22, 1 }
  0x16   : > { %686 = vmatpush3.bf16.msra.mxu0 %v728_v2 }
  0x17   : > { %687 = vmatprep.subr.bf16.mxu0 %v729_v3 }
  0x1a   : > { %688 = vmatpush3.bf16.msra.mxu0 %v729_v3 }
  0x1b   : > { %689 = vmatprep.subr.bf16.mxu0 %v730_v5 }
  0x1e   : > { %690 = vmatpush3.bf16.msra.mxu0 %v730_v5 }
  0x1f   : > { %691 = vmatprep.subr.bf16.mxu0 %v731_v6 }
  0x22   : > { %692 = vmatpush3.bf16.msra.mxu0 %v731_v6 }
  0x23   : > { %693 = vmatprep.subr.bf16.mxu0 %v732_v7 }
  0x26   : > { %694 = vmatpush3.bf16.msra.mxu0 %v732_v7 }
  0x27   : > { %695 = vmatprep.subr.bf16.mxu0 %v733_v8 }
  0x2a   : > { %696 = vmatpush3.bf16.msra.mxu0 %v733_v8 }
  0x2d   : > { %698 = vmatmul.mubr.bf16.vlgmr.msra.gmra.mxu0 %v735_v9 }
  0xed   : > { %v699_v13 = vpop.f32.mrf.mxu0 }
  0xee   : > { %v466_v20 = vadd.f32 %v699_v13, %v649_v14 }
  0xef   : > { %v427_v18 = vpop.f32.mrf.mxu0 }
  0xf0   : > { %v464_v19 = vadd.f32 %v649_v14, %v427_v18  ;;  %v472_v28 = vmax.f32 %v466_v20, 0.0 }
  0xf1   : > { %v700_v21 = vpop.f32.mrf.mxu0 }
  0xf2   : > { %v467_v23 = vadd.f32 %v700_v21, %v649_v14  ;;  %v470_v25 = vmax.f32 %v464_v19, 0.0  ;;  %v482_v33 = vsel %vm479_vm1, %v472_v28, %v466_v20 }
  0xf3   : > { %v430_v24 = vpop.f32.mrf.mxu0 }
  0xf4   : > { %v473_v26 = vmax.f32 %v467_v23, 0.0  ;;  %v465_v27 = vadd.f32 %v649_v14, %v430_v24  ;;  %v480_v31 = vsel %vm479_vm1, %v470_v25, %v464_v19 }
  0xf6   : > { %v471_v29 = vmax.f32 %v465_v27, 0.0  ;;  %v483_v30 = vsel %vm479_vm1, %v473_v26, %v467_v23 }
  0xf7   : > { %v668_v35 = vpack.c.bf16 %v483_v30, %v482_v33 }
  0xf8   : > { %v481_v32 = vsel %vm479_vm1, %v471_v29, %v465_v27 }
  0xf9   : > { %v663_v34 = vpack.c.bf16 %v481_v32, %v480_v31  ;;  %670 = vst [vmem:[%s298_s24 + $0x8] sm:$0xff] %v668_v35  }
  0xfb   : > { %664 = vst [vmem:[%s298_s24] sm:$0xff] %v663_v34  }
  0xfc PF: > { %s14_s17 = sadd.s32 1, %s758_s17   ;;  %s861_s15 = smov %s754_s16 }
  0xfd   : > { %p11_p5 = scmp.ge.s32.totalorder %s14_s17, 4   ;;  %s862_s16 = smov %s864_s18 }
  0xff   :  { %13 = sbr.rel (!%p11_p5) target bundleno = 2 (0x2), region = 83 }

// kernel: pspnet_forward.68
= control target key start
LH: loop header
LB: loop body
LE: loop exit
PB: predicated region body
PF: predicated region fallthrough
CT: control target
= control target key end

     0   :  { %s816_s15 = smov 0   ;;  %s818_s16 = smov 0   ;;  %s884_s0 = inlined_call_operand.vmem [shape: bf16[64,128], index: 0, kind: input, shape index: {}]   ;;  %s885_s1 = inlined_call_operand.vmem [shape: bf16[128,128], index: 1, kind: input, shape index: {}]   ;;  %s886_s2 = inlined_call_operand.vmem [shape: f32[1,128], index: 2, kind: input, shape index: {}]   ;;  %s887_s3 = inlined_call_operand.vmem [shape: bf16[64,128], index: 3, kind: input, shape index: {}]   ;;  %s888_s4 = inlined_call_operand.vmem [shape: bf16[64,128], index: 4, kind: output, shape index: {}]  }
   0x1   :  { %s820_s17 = smov 0  }
   0x2 LB: > { %s33_s18 = sadd.s32 1, %s785_s16  ;;  %p655_p0 = scmp.ge.s32.totalorder %s789_s17, 1  ;;  %s789_s17 = sphi %s820_s17, %s14_s17   ;;  %s785_s16 = sphi %s818_s16, %s890_s16   ;;  %s781_s15 = sphi %s816_s15, %s889_s15  }
   0x3   : > { %p35_p1 = scmp.ge.s32.totalorder %s33_s18, 2  ;;  %p229_p2 = scmp.lt.s32.totalorder %s789_s17, 3 }
   0x5   : > { %s892_s18 = smov (%p35_p1, %s33_s18), 0  ;;  %p230_p3 = pnand %p655_p0, %p229_p2 }
   0x6   : > { %s656_s21 = sshll.u32 (!%p230_p3), %s781_s15, 2 }
   0x7   : > { %233 = sbr.rel (%p230_p3) target bundleno = 253 (0xfd), region = 36  ;;  %p281_p4 = scmp.lt.s32.totalorder (!%p230_p3), %s656_s21, 7 }
   0xc   : > { %v757_v0 = vld [vmem:[%s885_s1 + $0x38] sm:$0xff]   ;;  %v758_v1 = vld [vmem:[%s885_s1 + $0x30] sm:$0xff]   ;;  %s894_s21 = smov (!%p281_p4, %s656_s21), 7  ;;  %v759_v2 = vld [vmem:[%s885_s1 + $0x28] sm:$0xff]  }
   0xd   : > { %713 = vmatprep.subr.bf16.mxu0 %v757_v0  ;;  %s843_s26 = sshll.u32 %s894_s21, 2  ;;  %v760_v3 = vld [vmem:[%s885_s1 + $0x20] sm:$0xff]   ;;  %v761_v5 = vld [vmem:[%s885_s1 + $0x18] sm:$0xff]   ;;  %v762_v6 = vld [vmem:[%s885_s1 + $0x10] sm:$0xff]  }
   0xe   : > { %714 = vmatpush3.bf16.msra.mxu0 %v757_v0  ;;  %s287_s29 = scalar_lea.vmem %s884_s0, %s843_s26  ;;  %v763_v7 = vld [vmem:[%s885_s1 + $0x8] sm:$0xff]   ;;  %v764_v8 = vld [vmem:[%s885_s1] sm:$0xff]   ;;  %s308_s19 = scalar_lea.vmem %s887_s3, %s843_s26 }
   0xf   : > { %715 = vmatprep.subr.bf16.mxu0 %v758_v1  ;;  %v765_v4 = vld [vmem:[%s287_s29] sm:$0xff]   ;;  %v766_v9 = vld [vmem:[%s287_s29 + $0x8] sm:$0xff]   ;;  %s317_s24 = scalar_lea.vmem %s888_s4, %s843_s26 }
  0x10   : > { %729 = vmatprep.mubr.bf16.mxu0 %v765_v4  ;;  %v684_v11 = vld [vmem:[%s308_s19] sm:$0xff]   ;;  %v701_v13 = vld [vmem:[%s308_s19 + $0x8] sm:$0xff]  }
  0x11   : > { %v672_v12 = vld [vmem:[%s886_s2] ss:$0 sm:$0xff]  ;;  %v685_v16 = vunpack.c.l.bf16 %v684_v11  ;;  %v690_v17 = vunpack.c.h.bf16 %v701_v13  ;;  %v689_v19 = vunpack.c.l.bf16 %v701_v13  ;;  %v686_v22 = vunpack.c.h.bf16 %v684_v11 }
  0x12   : > { %716 = vmatpush3.bf16.msra.mxu0 %v758_v1 }
  0x13   : > { %717 = vmatprep.subr.bf16.mxu0 %v759_v2 }
  0x16   : > { %718 = vmatpush3.bf16.msra.mxu0 %v759_v2 }
  0x17   : > { %719 = vmatprep.subr.bf16.mxu0 %v760_v3 }
  0x1a   : > { %720 = vmatpush3.bf16.msra.mxu0 %v760_v3 }
  0x1b   : > { %721 = vmatprep.subr.bf16.mxu0 %v761_v5 }
  0x1e   : > { %722 = vmatpush3.bf16.msra.mxu0 %v761_v5 }
  0x1f   : > { %723 = vmatprep.subr.bf16.mxu0 %v762_v6 }
  0x22   : > { %724 = vmatpush3.bf16.msra.mxu0 %v762_v6 }
  0x23   : > { %725 = vmatprep.subr.bf16.mxu0 %v763_v7 }
  0x26   : > { %726 = vmatpush3.bf16.msra.mxu0 %v763_v7 }
  0x27   : > { %727 = vmatprep.subr.bf16.mxu0 %v764_v8 }
  0x2a   : > { %728 = vmatpush3.bf16.msra.mxu0 %v764_v8 }
  0x2d   : > { %730 = vmatmul.mubr.bf16.vlgmr.msra.gmra.mxu0 %v766_v9 }
  0xed   : > { %v731_v10 = vpop.f32.mrf.mxu0 }
  0xee   : > { %v485_v18 = vadd.f32 %v731_v10, %v672_v12 }
  0xef   : > { %v446_v14 = vpop.f32.mrf.mxu0 }
  0xf0   : > { %v483_v15 = vadd.f32 %v672_v12, %v446_v14  ;;  %v497_v27 = vadd.f32 %v689_v19, %v485_v18 }
  0xf1   : > { %v732_v20 = vpop.f32.mrf.mxu0 }
  0xf2   : > { %v486_v21 = vadd.f32 %v732_v20, %v672_v12  ;;  %v495_v24 = vadd.f32 %v685_v16, %v483_v15  ;;  %v501_v32 = vmax.f32 %v497_v27, 0.0 }
  0xf3   : > { %v449_v23 = vpop.f32.mrf.mxu0 }
  0xf4   : > { %v498_v25 = vadd.f32 %v690_v17, %v486_v21  ;;  %v484_v26 = vadd.f32 %v672_v12, %v449_v23  ;;  %v499_v30 = vmax.f32 %v495_v24, 0.0 }
  0xf6   : > { %v496_v28 = vadd.f32 %v686_v22, %v484_v26  ;;  %v502_v29 = vmax.f32 %v498_v25, 0.0 }
  0xf8   : > { %v500_v31 = vmax.f32 %v496_v28, 0.0  ;;  %v699_v34 = vpack.c.bf16 %v502_v29, %v501_v32 }
  0xfa   : > { %v694_v33 = vpack.c.bf16 %v500_v31, %v499_v30  ;;  %702 = vst [vmem:[%s317_s24 + $0x8] sm:$0xff] %v699_v34  }
  0xfc   : > { %695 = vst [vmem:[%s317_s24] sm:$0xff] %v694_v33  }
  0xfd PF: > { %s14_s17 = sadd.s32 1, %s789_s17   ;;  %s889_s15 = smov %s785_s16 }
  0xfe   : > { %p11_p5 = scmp.ge.s32.totalorder %s14_s17, 4   ;;  %s890_s16 = smov %s892_s18 }
 0x100   :  { %13 = sbr.rel (!%p11_p5) target bundleno = 2 (0x2), region = 83 }

// kernel: pspnet_forward.79
= control target key start
LH: loop header
LB: loop body
LE: loop exit
PB: predicated region body
PF: predicated region fallthrough
CT: control target
= control target key end

     0   :  { %s907_s15 = smov 0   ;;  %s909_s16 = smov 0   ;;  %s998_s0 = inlined_call_operand.vmem [shape: bf16[64,256], index: 0, kind: input, shape index: {}]   ;;  %s999_s1 = inlined_call_operand.vmem [shape: bf16[256,128], index: 1, kind: input, shape index: {}]   ;;  %s1000_s2 = inlined_call_operand.vmem [shape: f32[1,128], index: 2, kind: input, shape index: {}]   ;;  %s1001_s3 = inlined_call_operand.vmem [shape: f32[1,128], index: 3, kind: input, shape index: {}]   ;;  %s1002_s4 = inlined_call_operand.vmem [shape: bf16[64,128], index: 4, kind: output, shape index: {}]  }
   0x1   :  { %s911_s17 = smov 0  }
   0x2 LB: > { %s33_s18 = sadd.s32 1, %s875_s16  ;;  %p717_p0 = scmp.ge.s32.totalorder %s879_s17, 1  ;;  %s879_s17 = sphi %s911_s17, %s14_s17   ;;  %s875_s16 = sphi %s909_s16, %s1004_s16   ;;  %s871_s15 = sphi %s907_s15, %s1003_s15  }
   0x3   : > { %p35_p1 = scmp.ge.s32.totalorder %s33_s18, 2  ;;  %p224_p2 = scmp.lt.s32.totalorder %s879_s17, 3 }
   0x5   : > { %s1006_s18 = smov (%p35_p1, %s33_s18), 0  ;;  %p225_p3 = pnand %p717_p0, %p224_p2 }
   0x6   : > { %s718_s21 = sshll.u32 (!%p225_p3), %s871_s15, 2 }
   0x7   : > { %228 = sbr.rel (%p225_p3) target bundleno = 254 (0xfe), region = 36  ;;  %p274_p4 = scmp.lt.s32.totalorder (!%p225_p3), %s718_s21, 7 }
   0xc   : > { %v835_v0 = vld [vmem:[%s999_s1 + $0x78] sm:$0xff]   ;;  %v837_v2 = vld [vmem:[%s999_s1 + $0x70] sm:$0xff]   ;;  %v839_v4 = vld [vmem:[%s999_s1 + $0x68] sm:$0xff]   ;;  %s1008_s21 = smov (!%p274_p4, %s718_s21), 7  ;;  %v555_v20 = vlaneseq  ;;  %v881_v30 = vmov 0  }
   0xd   : > { %v836_v1 = vld [vmem:[%s999_s1 + $0x38] sm:$0xff]   ;;  %766 = vmatprep.subr.bf16.mxu0 %v835_v0  ;;  %794 = vmatprep.subr.bf16.mxu1 %v835_v0  ;;  %v838_v3 = vld [vmem:[%s999_s1 + $0x30] sm:$0xff]   ;;  %v840_v5 = vld [vmem:[%s999_s1 + $0x28] sm:$0xff]   ;;  %s750_s10 = sshll.u32 %s1008_s21, 3  ;;  %s722_s12 = sshll.u32 %s1008_s21, 2 }
   0xe   : > { %767 = vmatpush3.bf16.msra.mxu0 %v836_v1  ;;  %802 = vmatpush3.bf16.msra.mxu1 %v836_v1  ;;  %v841_v6 = vld [vmem:[%s999_s1 + $0x60] sm:$0xff]   ;;  %v843_v8 = vld [vmem:[%s999_s1 + $0x58] sm:$0xff]   ;;  %s281_s15 = scalar_lea.vmem %s998_s0, %s750_s10  ;;  %v845_v10 = vld [vmem:[%s999_s1 + $0x50] sm:$0xff]   ;;  %v556_v22 = vshrl.u32 %v555_v20, 7 }
   0xf   : > { %768 = vmatprep.subr.bf16.mxu0 %v837_v2  ;;  %795 = vmatprep.subr.bf16.mxu1 %v837_v2  ;;  %v842_v7 = vld [vmem:[%s999_s1 + $0x20] sm:$0xff]   ;;  %v844_v9 = vld [vmem:[%s999_s1 + $0x18] sm:$0xff]   ;;  %v846_v13 = vld [vmem:[%s999_s1 + $0x10] sm:$0xff]  }
  0x10   : > { %v853_v11 = vld [vmem:[%s281_s15 + $0x4] ss:$8 sps:$4 sm:$0xff]   ;;  %v856_v12 = vld [vmem:[%s281_s15 + $0x14] ss:$8 sps:$4 sm:$0xff]   ;;  %v851_v18 = vld [vmem:[%s281_s15] ss:$8 sps:$4 sm:$0xff]  }
  0x11   : > { %v847_v14 = vld [vmem:[%s999_s1 + $0x48] sm:$0xff]   ;;  %505 = vmatprep.mubr.bf16.mxu0 %v853_v11  ;;  %513 = vmatprep.mubr.bf16.mxu1 %v856_v12  ;;  %v849_v16 = vld [vmem:[%s999_s1 + $0x40] sm:$0xff]   ;;  %v854_v19 = vld [vmem:[%s281_s15 + $0x10] ss:$8 sps:$4 sm:$0xff]   ;;  %v557_v27 = vsub.s32 0, %v556_v22  ;;  %s306_s15 = scalar_lea.vmem %s1002_s4, %s722_s12 }
  0x12   : > { %769 = vmatpush3.bf16.msra.mxu0 %v838_v3  ;;  %803 = vmatpush3.bf16.msra.mxu1 %v838_v3  ;;  %v848_v15 = vld [vmem:[%s999_s1 + $0x8] sm:$0xff]   ;;  %v850_v17 = vld [vmem:[%s999_s1] sm:$0xff]  }
  0x13   : > { %770 = vmatprep.subr.bf16.mxu0 %v839_v4  ;;  %796 = vmatprep.subr.bf16.mxu1 %v839_v4  ;;  %v548_v21 = vld [vmem:[%s1001_s3] sm:$0x1] }
  0x14   : > { %vm549_vm0 = vcmp.gt.f32.partialorder %v548_v21, 0.5  ;;  %v743_v26 = vld [vmem:[%s1000_s2] ss:$0 sm:$0xff] }
  0x15   : > { %v554_v31 = vsel %vm549_vm0, 1, %v881_v30 }
  0x16   : > { %771 = vmatpush3.bf16.msra.mxu0 %v840_v5  ;;  %804 = vmatpush3.bf16.msra.mxu1 %v840_v5  ;;  %v558_v37 = vrot.slane %v554_v31, %v557_v27 }
  0x17   : > { %772 = vmatprep.subr.bf16.mxu0 %v841_v6  ;;  %797 = vmatprep.subr.bf16.mxu1 %v841_v6 }
  0x18   : > { %vm559_vm1 = vcmp.eq.s32.totalorder %v558_v37, 1 }
  0x1a   : > { %773 = vmatpush3.bf16.msra.mxu0 %v842_v7  ;;  %805 = vmatpush3.bf16.msra.mxu1 %v842_v7 }
  0x1b   : > { %774 = vmatprep.subr.bf16.mxu0 %v843_v8  ;;  %798 = vmatprep.subr.bf16.mxu1 %v843_v8 }
  0x1e   : > { %775 = vmatpush3.bf16.msra.mxu0 %v844_v9  ;;  %806 = vmatpush3.bf16.msra.mxu1 %v844_v9 }
  0x1f   : > { %776 = vmatprep.subr.bf16.mxu0 %v845_v10  ;;  %799 = vmatprep.subr.bf16.mxu1 %v845_v10 }
  0x22   : > { %777 = vmatpush3.bf16.msra.mxu0 %v846_v13  ;;  %807 = vmatpush3.bf16.msra.mxu1 %v846_v13 }
  0x23   : > { %778 = vmatprep.subr.bf16.mxu0 %v847_v14  ;;  %800 = vmatprep.subr.bf16.mxu1 %v847_v14 }
  0x26   : > { %779 = vmatpush3.bf16.msra.mxu0 %v848_v15  ;;  %808 = vmatpush3.bf16.msra.mxu1 %v848_v15 }
  0x27   : > { %780 = vmatprep.subr.bf16.mxu0 %v849_v16  ;;  %801 = vmatprep.subr.bf16.mxu1 %v849_v16 }
  0x2a   : > { %781 = vmatpush3.bf16.msra.mxu0 %v850_v17  ;;  %809 = vmatpush3.bf16.msra.mxu1 %v850_v17 }
  0x2d   : > { %506 = vmatmul.mubr.bf16.vlgmr.msra.gmra.mxu0 %v851_v18  ;;  %514 = vmatmul.mubr.bf16.vlgmr.msra.gmra.mxu1 %v854_v19 }
  0xed   : > { %v782_v23 = vpop.f32.mrf.mxu0  ;;  %v788_v24 = vpop.f32.mrf.mxu1 }
  0xef   : > { %v783_v25 = vpop.f32.mrf.mxu0  ;;  %v789_v28 = vpop.f32.mrf.mxu1 }
  0xf0   : > { %v784_v29 = vadd.f32 %v783_v25, %v782_v23  ;;  %v790_v32 = vadd.f32 %v789_v28, %v788_v24 }
  0xf1   : > { %v785_v33 = vpop.f32.mrf.mxu0  ;;  %v791_v34 = vpop.f32.mrf.mxu1 }
  0xf2   : > { %v544_v35 = vadd.f32 %v784_v29, %v743_v26  ;;  %v546_v36 = vadd.f32 %v790_v32, %v743_v26 }
  0xf3   : > { %v786_v38 = vpop.f32.mrf.mxu0  ;;  %v792_v39 = vpop.f32.mrf.mxu1 }
  0xf4   : > { %v787_v40 = vadd.f32 %v786_v38, %v785_v33  ;;  %v793_v41 = vadd.f32 %v792_v39, %v791_v34  ;;  %v550_v42 = vmax.f32 %v544_v35, 0.0  ;;  %v552_v43 = vmax.f32 %v546_v36, 0.0 }
  0xf6   : > { %v545_v44 = vadd.f32 %v787_v40, %v743_v26  ;;  %v547_v45 = vadd.f32 %v793_v41, %v743_v26  ;;  %v560_v48 = vsel %vm559_vm1, %v550_v42, %v544_v35  ;;  %v562_v49 = vsel %vm559_vm1, %v552_v43, %v546_v36 }
  0xf8   : > { %v551_v46 = vmax.f32 %v545_v44, 0.0  ;;  %v553_v47 = vmax.f32 %v547_v45, 0.0 }
  0xfa   : > { %v561_v50 = vsel %vm559_vm1, %v551_v46, %v545_v44  ;;  %v563_v51 = vsel %vm559_vm1, %v553_v47, %v547_v45 }
  0xfb   : > { %v758_v52 = vpack.c.bf16 %v561_v50, %v560_v48  ;;  %v763_v53 = vpack.c.bf16 %v563_v51, %v562_v49 }
  0xfd   : > { %759 = vst [vmem:[%s306_s15] sm:$0xff] %v758_v52   ;;  %765 = vst [vmem:[%s306_s15 + $0x8] sm:$0xff] %v763_v53  }
  0xfe PF: > { %s14_s17 = sadd.s32 1, %s879_s17   ;;  %s1003_s15 = smov %s875_s16 }
  0xff   : > { %p11_p5 = scmp.ge.s32.totalorder %s14_s17, 4   ;;  %s1004_s16 = smov %s1006_s18 }
 0x101   :  { %13 = sbr.rel (!%p11_p5) target bundleno = 2 (0x2), region = 83 }

// kernel: pspnet_forward.96
= control target key start
LH: loop header
LB: loop body
LE: loop exit
PB: predicated region body
PF: predicated region fallthrough
CT: control target
= control target key end

     0   :  { %s907_s15 = smov 0   ;;  %s909_s16 = smov 0   ;;  %s1013_s0 = inlined_call_operand.vmem [shape: bf16[64,128], index: 0, kind: input, shape index: {}]   ;;  %s1014_s1 = inlined_call_operand.vmem [shape: bf16[128,256], index: 1, kind: input, shape index: {}]   ;;  %s1015_s2 = inlined_call_operand.vmem [shape: f32[1,256], index: 2, kind: input, shape index: {}]   ;;  %s1016_s3 = inlined_call_operand.vmem [shape: f32[1,256], index: 3, kind: input, shape index: {}]   ;;  %s1017_s4 = inlined_call_operand.vmem [shape: bf16[64,256], index: 4, kind: output, shape index: {}]  }
   0x1   :  { %s911_s17 = smov 0  }
   0x2 LB: > { %s33_s18 = sadd.s32 1, %s875_s16  ;;  %p755_p0 = scmp.ge.s32.totalorder %s879_s17, 1  ;;  %s879_s17 = sphi %s911_s17, %s14_s17   ;;  %s875_s16 = sphi %s909_s16, %s1019_s16   ;;  %s871_s15 = sphi %s907_s15, %s1018_s15  }
   0x3   : > { %p35_p1 = scmp.ge.s32.totalorder %s33_s18, 2  ;;  %p228_p2 = scmp.lt.s32.totalorder %s879_s17, 3 }
   0x5   : > { %s1021_s18 = smov (%p35_p1, %s33_s18), 0  ;;  %p229_p3 = pnand %p755_p0, %p228_p2 }
   0x6   : > { %s756_s21 = sshll.u32 (!%p229_p3), %s871_s15, 2 }
   0x7   : > { %232 = sbr.rel (%p229_p3) target bundleno = 253 (0xfd), region = 36  ;;  %p281_p4 = scmp.lt.s32.totalorder (!%p229_p3), %s756_s21, 7 }
   0xc   : > { %v831_v0 = vld [vmem:[%s1014_s1 + $0x74] ss:$8 sps:$4 sm:$0xff]   ;;  %v833_v1 = vld [vmem:[%s1014_s1 + $0x70] ss:$8 sps:$4 sm:$0xff]   ;;  %v881_v2 = vmov 0   ;;  %s1023_s21 = smov (!%p281_p4, %s756_s21), 7  ;;  %v538_v19 = vlaneseq }
   0xd   : > { %488 = vmatprep.mubr.bf16.mxu0 %v881_v2  ;;  %498 = vmatprep.mubr.bf16.mxu1 %v881_v2  ;;  %v834_v3 = vld [vmem:[%s1014_s1 + $0x64] ss:$8 sps:$4 sm:$0xff]   ;;  %v836_v4 = vld [vmem:[%s1014_s1 + $0x60] ss:$8 sps:$4 sm:$0xff]   ;;  %v837_v5 = vld [vmem:[%s1014_s1 + $0x54] ss:$8 sps:$4 sm:$0xff]  }
   0xe   : > { %456 = vmatprep.subr.bf16.mxu0 %v831_v0  ;;  %790 = vmatprep.subr.bf16.mxu1 %v831_v0  ;;  %v839_v6 = vld [vmem:[%s1014_s1 + $0x50] ss:$8 sps:$4 sm:$0xff]   ;;  %s757_s6 = sshll.u32 %s1023_s21, 2  ;;  %v840_v7 = vld [vmem:[%s1014_s1 + $0x44] ss:$8 sps:$4 sm:$0xff]   ;;  %v539_v20 = vshrl.u32 %v538_v19, 7 }
   0xf   : > { %457 = vmatpush1.bf16.msra.mxu0 %v833_v1  ;;  %798 = vmatpush1.bf16.msra.mxu1 %v833_v1  ;;  %s954_s11 = scalar_lea.vmem %s1013_s0, %s757_s6  ;;  %v842_v8 = vld [vmem:[%s1014_s1 + $0x40] ss:$8 sps:$4 sm:$0xff]   ;;  %v843_v9 = vld [vmem:[%s1014_s1 + $0x34] ss:$8 sps:$4 sm:$0xff]   ;;  %v845_v10 = vld [vmem:[%s1014_s1 + $0x30] ss:$8 sps:$4 sm:$0xff]  }
  0x10   : > { %458 = vmatprep.subr.bf16.mxu0 %v834_v3  ;;  %791 = vmatprep.subr.bf16.mxu1 %v834_v3  ;;  %v846_v11 = vld [vmem:[%s1014_s1 + $0x24] ss:$8 sps:$4 sm:$0xff]   ;;  %v848_v12 = vld [vmem:[%s1014_s1 + $0x20] ss:$8 sps:$4 sm:$0xff]   ;;  %v849_v13 = vld [vmem:[%s1014_s1 + $0x14] ss:$8 sps:$4 sm:$0xff]  }
  0x11   : > { %v851_v14 = vld [vmem:[%s1014_s1 + $0x10] ss:$8 sps:$4 sm:$0xff]   ;;  %v852_v15 = vld [vmem:[%s1014_s1 + $0x4] ss:$8 sps:$4 sm:$0xff]   ;;  %v854_v16 = vld [vmem:[%s1014_s1] ss:$8 sps:$4 sm:$0xff]  }
  0x12   : > { %v855_v17 = vld [vmem:[%s954_s11] sm:$0xff]   ;;  %v856_v18 = vld [vmem:[%s954_s11 + $0x8] sm:$0xff]   ;;  %v540_v22 = vsub.s32 0, %v539_v20  ;;  %v544_v24 = vsub.s32 1, %v539_v20  ;;  %s785_s11 = sshll.u32 %s1023_s21, 3 }
  0x13   : > { %459 = vmatpush1.bf16.msra.mxu0 %v836_v4  ;;  %799 = vmatpush1.bf16.msra.mxu1 %v836_v4  ;;  %v556_v21 = vld [vmem:[%s1016_s3] sm:$0x3]  ;;  %s320_s15 = scalar_lea.vmem %s1017_s4, %s785_s11 }
  0x14   : > { %460 = vmatprep.subr.bf16.mxu0 %v837_v5  ;;  %792 = vmatprep.subr.bf16.mxu1 %v837_v5  ;;  %vm557_vm0 = vcmp.gt.f32.partialorder %v556_v21, 0.5  ;;  %v536_v23 = vld [vmem:[%s1015_s2] sm:$0x3] }
  0x15   : > { %v566_v25 = vsel %vm557_vm0, 1, %v881_v2  ;;  %v541_v26 = vrot.slane %v536_v23, %v540_v22  ;;  %v545_v27 = vrot.slane %v536_v23, %v544_v24 }
  0x16   : > { %v570_v28 = vrot.slane %v566_v25, %v540_v22  ;;  %v574_v29 = vrot.slane %v566_v25, %v544_v24 }
  0x17   : > { %461 = vmatpush1.bf16.msra.mxu0 %v839_v6  ;;  %800 = vmatpush1.bf16.msra.mxu1 %v839_v6 }
  0x18   : > { %462 = vmatprep.subr.bf16.mxu0 %v840_v7  ;;  %793 = vmatprep.subr.bf16.mxu1 %v840_v7  ;;  %vm575_vm1 = vcmp.eq.s32.totalorder %v570_v28, 1  ;;  %vm576_vm2 = vcmp.eq.s32.totalorder %v574_v29, 1 }
  0x1b   : > { %463 = vmatpush1.bf16.msra.mxu0 %v842_v8  ;;  %801 = vmatpush1.bf16.msra.mxu1 %v842_v8 }
  0x1c   : > { %464 = vmatprep.subr.bf16.mxu0 %v843_v9  ;;  %794 = vmatprep.subr.bf16.mxu1 %v843_v9 }
  0x1f   : > { %465 = vmatpush1.bf16.msra.mxu0 %v845_v10  ;;  %802 = vmatpush1.bf16.msra.mxu1 %v845_v10 }
  0x20   : > { %466 = vmatprep.subr.bf16.mxu0 %v846_v11  ;;  %795 = vmatprep.subr.bf16.mxu1 %v846_v11 }
  0x23   : > { %467 = vmatpush1.bf16.msra.mxu0 %v848_v12  ;;  %803 = vmatpush1.bf16.msra.mxu1 %v848_v12 }
  0x24   : > { %468 = vmatprep.subr.bf16.mxu0 %v849_v13  ;;  %796 = vmatprep.subr.bf16.mxu1 %v849_v13 }
  0x27   : > { %469 = vmatpush1.bf16.msra.mxu0 %v851_v14  ;;  %804 = vmatpush1.bf16.msra.mxu1 %v851_v14 }
  0x28   : > { %470 = vmatprep.subr.bf16.mxu0 %v852_v15  ;;  %797 = vmatprep.subr.bf16.mxu1 %v852_v15 }
  0x2b   : > { %471 = vmatpush1.bf16.msra.mxu0 %v854_v16  ;;  %805 = vmatpush1.bf16.msra.mxu1 %v854_v16 }
  0x2e   : > { %489 = vmatmul.mubr.bf16.vlgmr.msra.gmra.mxu0 %v855_v17  ;;  %499 = vmatmul.mubr.bf16.vlgmr.msra.gmra.mxu1 %v856_v18 }
  0xee   : > { %v490_v30 = vpop.f32.mrf.mxu0  ;;  %v500_v31 = vpop.f32.mrf.mxu1 }
  0xef   : > { %v548_v32 = vadd.f32 %v541_v26, %v490_v30  ;;  %v552_v38 = vadd.f32 %v541_v26, %v500_v31 }
  0xf0   : > { %v492_v33 = vpop.f32.mrf.mxu0  ;;  %v502_v34 = vpop.f32.mrf.mxu1 }
  0xf1   : > { %v558_v35 = vmax.f32 %v548_v32, 0.0  ;;  %v549_v36 = vadd.f32 %v545_v27, %v492_v33  ;;  %v553_v37 = vadd.f32 %v545_v27, %v502_v34  ;;  %v562_v51 = vmax.f32 %v552_v38, 0.0 }
  0xf2   : > { %v494_v39 = vpop.f32.mrf.mxu0  ;;  %v504_v40 = vpop.f32.mrf.mxu1 }
  0xf3   : > { %v559_v41 = vmax.f32 %v549_v36, 0.0  ;;  %v563_v42 = vmax.f32 %v553_v37, 0.0  ;;  %v550_v43 = vadd.f32 %v541_v26, %v494_v39  ;;  %v554_v44 = vadd.f32 %v541_v26, %v504_v40 }
  0xf4   : > { %v496_v45 = vpop.f32.mrf.mxu0  ;;  %v506_v46 = vpop.f32.mrf.mxu1  ;;  %v577_v47 = vsel %vm575_vm1, %v558_v35, %v548_v32  ;;  %v581_v61 = vsel %vm575_vm1, %v562_v51, %v552_v38 }
  0xf5   : > { %v578_v48 = vsel %vm576_vm2, %v559_v41, %v549_v36  ;;  %v551_v49 = vadd.f32 %v545_v27, %v496_v45  ;;  %v555_v50 = vadd.f32 %v545_v27, %v506_v46  ;;  %v560_v53 = vmax.f32 %v550_v43, 0.0 }
  0xf6   : > { %v786_v52 = vpack.c.bf16 %v578_v48, %v577_v47  ;;  %v564_v54 = vmax.f32 %v554_v44, 0.0  ;;  %v582_v57 = vsel %vm576_vm2, %v563_v42, %v553_v37 }
  0xf7   : > { %v561_v55 = vmax.f32 %v551_v49, 0.0  ;;  %v565_v56 = vmax.f32 %v555_v50, 0.0  ;;  %v579_v58 = vsel %vm575_vm1, %v560_v53, %v550_v43  ;;  %v788_v63 = vpack.c.bf16 %v582_v57, %v581_v61 }
  0xf8   : > { %609 = vst [vmem:[%s320_s15] sm:$0xff] %v786_v52  ;;  %v583_v0 = vsel %vm575_vm1, %v564_v54, %v554_v44 }
  0xf9   : > { %v580_v59 = vsel %vm576_vm2, %v561_v55, %v551_v49  ;;  %v584_v60 = vsel %vm576_vm2, %v565_v56, %v555_v50  ;;  %611 = vst [vmem:[%s320_s15 + $0x10] sm:$0xff] %v788_v63 }
  0xfa   : > { %v787_v62 = vpack.c.bf16 %v580_v59, %v579_v58  ;;  %v789_v1 = vpack.c.bf16 %v584_v60, %v583_v0 }
  0xfc   : > { %610 = vst [vmem:[%s320_s15 + $0x8] sm:$0xff] %v787_v62  ;;  %612 = vst [vmem:[%s320_s15 + $0x18] sm:$0xff] %v789_v1 }
  0xfd PF: > { %s14_s17 = sadd.s32 1, %s879_s17   ;;  %s1018_s15 = smov %s875_s16 }
  0xfe   : > { %p11_p5 = scmp.ge.s32.totalorder %s14_s17, 4   ;;  %s1019_s16 = smov %s1021_s18 }
 0x100   :  { %13 = sbr.rel (!%p11_p5) target bundleno = 2 (0x2), region = 83 }

// kernel: pspnet_forward.97
= control target key start
LH: loop header
LB: loop body
LE: loop exit
PB: predicated region body
PF: predicated region fallthrough
CT: control target
= control target key end

     0   :  { %s1069_s15 = smov 0   ;;  %s1071_s16 = smov 0   ;;  %s1191_s0 = inlined_call_operand.vmem [shape: bf16[64,384], index: 0, kind: input, shape index: {}]   ;;  %s1192_s1 = inlined_call_operand.vmem [shape: bf16[384,128], index: 1, kind: input, shape index: {}]   ;;  %s1193_s2 = inlined_call_operand.vmem [shape: f32[1,128], index: 2, kind: input, shape index: {}]   ;;  %s1194_s3 = inlined_call_operand.vmem [shape: f32[1,128], index: 3, kind: input, shape index: {}]   ;;  %s1195_s4 = inlined_call_operand.vmem [shape: bf16[64,128], index: 4, kind: output, shape index: {}]  }
   0x1   :  { %s1073_s17 = smov 0  }
   0x2 LB: > { %s33_s18 = sadd.s32 1, %s1037_s16  ;;  %p846_p0 = scmp.ge.s32.totalorder %s1041_s17, 1  ;;  %s1041_s17 = sphi %s1073_s17, %s14_s17   ;;  %s1037_s16 = sphi %s1071_s16, %s1197_s16   ;;  %s1033_s15 = sphi %s1069_s15, %s1196_s15  }
   0x3   : > { %p35_p1 = scmp.ge.s32.totalorder %s33_s18, 2  ;;  %p224_p2 = scmp.lt.s32.totalorder %s1041_s17, 3 }
   0x5   : > { %s1199_s18 = smov (%p35_p1, %s33_s18), 0  ;;  %p225_p3 = pnand %p846_p0, %p224_p2 }
   0x6   : > { %s847_s9 = sshll.u32 (!%p225_p3), %s1033_s15, 2 }
   0x7   : > { %228 = sbr.rel (%p225_p3) target bundleno = 264 (0x108), region = 36  ;;  %p274_p4 = scmp.lt.s32.totalorder (!%p225_p3), %s847_s9, 7 }
   0xc   : > { %v987_v0 = vld [vmem:[%s1192_s1 + $0x78] sm:$0xff]   ;;  %v990_v3 = vld [vmem:[%s1192_s1 + $0x70] sm:$0xff]   ;;  %v993_v6 = vld [vmem:[%s1192_s1 + $0x68] sm:$0xff]   ;;  %s1201_s9 = smov (!%p274_p4, %s847_s9), 7  ;;  %v684_v30 = vlaneseq  ;;  %v1043_v42 = vmov 0  }
   0xd   : > { %v988_v1 = vld [vmem:[%s1192_s1 + $0x38] sm:$0xff]   ;;  %903 = vmatprep.subr.bf16.mxu0 %v987_v0  ;;  %v991_v4 = vld [vmem:[%s1192_s1 + $0x30] sm:$0xff]   ;;  %v994_v7 = vld [vmem:[%s1192_s1 + $0x28] sm:$0xff]   ;;  %s961_s5 = smul.u32 12, %s1201_s9 }
   0xe   : > { %v989_v2 = vld [vmem:[%s1192_s1 + $0xb8] sm:$0xff]   ;;  %904 = vmatpush3.bf16.msra.mxu0 %v988_v1  ;;  %v992_v5 = vld [vmem:[%s1192_s1 + $0xb0] sm:$0xff]   ;;  %v995_v8 = vld [vmem:[%s1192_s1 + $0xa8] sm:$0xff]   ;;  %v685_v33 = vshrl.u32 %v684_v30, 7 }
   0xf   : > { %941 = vmatprep.subr.bf16.mxu1 %v989_v2  ;;  %905 = vmatprep.subr.bf16.mxu0 %v990_v3  ;;  %v996_v9 = vld [vmem:[%s1192_s1 + $0x60] sm:$0xff]   ;;  %v999_v12 = vld [vmem:[%s1192_s1 + $0x58] sm:$0xff]   ;;  %v1002_v15 = vld [vmem:[%s1192_s1 + $0x50] sm:$0xff]   ;;  %s281_s21 = scalar_lea.vmem %s1191_s0, %s961_s5  ;;  %s850_s5 = sshll.u32 %s1201_s9, 2 }
  0x10   : > { %942 = vmatpush3.bf16.msra.mxu1 %v989_v2  ;;  %v997_v10 = vld [vmem:[%s1192_s1 + $0x20] sm:$0xff]   ;;  %v1001_v13 = vld [vmem:[%s1192_s1 + $0x98] sm:$0xff]   ;;  %v1004_v16 = vld [vmem:[%s1192_s1 + $0x90] sm:$0xff]   ;;  %v686_v40 = vsub.s32 0, %v685_v33  ;;  %s306_s8 = scalar_lea.vmem %s1195_s4, %s850_s5 }
  0x11   : > { %943 = vmatprep.subr.bf16.mxu1 %v992_v5  ;;  %v998_v11 = vld [vmem:[%s1192_s1 + $0xa0] sm:$0xff]   ;;  %v1000_v14 = vld [vmem:[%s1192_s1 + $0x18] sm:$0xff]   ;;  %v1003_v17 = vld [vmem:[%s1192_s1 + $0x10] sm:$0xff]  }
  0x12   : > { %906 = vmatpush3.bf16.msra.mxu0 %v991_v4  ;;  %v1005_v18 = vld [vmem:[%s1192_s1 + $0x48] sm:$0xff]   ;;  %v1008_v21 = vld [vmem:[%s1192_s1 + $0x40] sm:$0xff]  }
  0x13   : > { %907 = vmatprep.subr.bf16.mxu0 %v993_v6  ;;  %v1006_v19 = vld [vmem:[%s1192_s1 + $0x8] sm:$0xff]   ;;  %v1010_v22 = vld [vmem:[%s1192_s1 + $0x80] sm:$0xff]  }
  0x14   : > { %944 = vmatpush3.bf16.msra.mxu1 %v992_v5  ;;  %v1007_v20 = vld [vmem:[%s1192_s1 + $0x88] sm:$0xff]   ;;  %v1013_v23 = vld [vmem:[%s281_s21 + $0x4] ss:$12 sps:$4 sm:$0xff]   ;;  %v677_v31 = vld [vmem:[%s1194_s3] sm:$0x1] }
  0x15   : > { %945 = vmatprep.subr.bf16.mxu1 %v995_v8  ;;  %v1014_v24 = vld [vmem:[%s281_s21 + $0x8] ss:$12 sps:$4 sm:$0xff]   ;;  %v1009_v25 = vld [vmem:[%s1192_s1] sm:$0xff]   ;;  %585 = vmatprep.mubr.bf16.mxu0 %v1013_v23  ;;  %vm678_vm0 = vcmp.gt.f32.partialorder %v677_v31, 0.5 }
  0x16   : > { %908 = vmatpush3.bf16.msra.mxu0 %v994_v7  ;;  %957 = vmatprep.mubr.bf16.mxu1 %v1014_v24  ;;  %v1011_v26 = vld [vmem:[%s281_s21] ss:$12 sps:$4 sm:$0xff]   ;;  %v1016_v27 = vld [vmem:[%s281_s21 + $0x1c] ss:$12 sps:$4 sm:$0xff]   ;;  %v1018_v29 = vld [vmem:[%s281_s21 + $0x18] ss:$12 sps:$4 sm:$0xff]  }
  0x17   : > { %909 = vmatprep.subr.bf16.mxu0 %v996_v9  ;;  %v1015_v28 = vld [vmem:[%s281_s21 + $0x20] ss:$12 sps:$4 sm:$0xff]   ;;  %v683_v43 = vsel %vm678_vm0, 1, %v1043_v42 }
  0x18   : > { %946 = vmatpush3.bf16.msra.mxu1 %v995_v8  ;;  %v881_v39 = vld [vmem:[%s1193_s2] ss:$0 sm:$0xff]  ;;  %v687_v48 = vrot.slane %v683_v43, %v686_v40 }
  0x19   : > { %947 = vmatprep.subr.bf16.mxu1 %v998_v11 }
  0x1a   : > { %910 = vmatpush3.bf16.msra.mxu0 %v997_v10  ;;  %vm688_vm1 = vcmp.eq.s32.totalorder %v687_v48, 1 }
  0x1b   : > { %911 = vmatprep.subr.bf16.mxu0 %v999_v12 }
  0x1c   : > { %948 = vmatpush3.bf16.msra.mxu1 %v998_v11 }
  0x1d   : > { %949 = vmatprep.subr.bf16.mxu1 %v1001_v13 }
  0x1e   : > { %912 = vmatpush3.bf16.msra.mxu0 %v1000_v14 }
  0x1f   : > { %913 = vmatprep.subr.bf16.mxu0 %v1002_v15 }
  0x20   : > { %950 = vmatpush3.bf16.msra.mxu1 %v1001_v13 }
  0x21   : > { %951 = vmatprep.subr.bf16.mxu1 %v1004_v16 }
  0x22   : > { %914 = vmatpush3.bf16.msra.mxu0 %v1003_v17 }
  0x23   : > { %915 = vmatprep.subr.bf16.mxu0 %v1005_v18 }
  0x24   : > { %952 = vmatpush3.bf16.msra.mxu1 %v1004_v16 }
  0x25   : > { %953 = vmatprep.subr.bf16.mxu1 %v1007_v20 }
  0x26   : > { %916 = vmatpush3.bf16.msra.mxu0 %v1006_v19 }
  0x27   : > { %917 = vmatprep.subr.bf16.mxu0 %v1008_v21 }
  0x28   : > { %954 = vmatpush3.bf16.msra.mxu1 %v1007_v20 }
  0x29   : > { %955 = vmatprep.subr.bf16.mxu1 %v1010_v22 }
  0x2a   : > { %918 = vmatpush3.bf16.msra.mxu0 %v1009_v25 }
  0x2c   : > { %956 = vmatpush3.bf16.msra.mxu1 %v1010_v22 }
  0x2d   : > { %586 = vmatmul.mubr.bf16.vlgmr.msra.gmra.mxu0 %v1011_v26 }
  0x2e   : > { %593 = vmatprep.mubr.bf16.mxu0 %v1016_v27 }
  0x2f   : > { %958 = vmatmul.mubr.bf16.vlgmr.msra.gmra.mxu1 %v1015_v28 }
  0x35   : > { %594 = vmatmul.mubr.bf16.gmra.mxu0 %v1018_v29 }
  0xed   : > { %v919_v32 = vpop.f32.mrf.mxu0 }
  0xef   : > { %v920_v34 = vpop.f32.mrf.mxu0  ;;  %v959_v35 = vpop.f32.mrf.mxu1 }
  0xf0   : > { %v921_v36 = vadd.f32 %v920_v34, %v919_v32 }
  0xf1   : > { %v922_v37 = vpop.f32.mrf.mxu0  ;;  %v636_v38 = vpop.f32.mrf.mxu1 }
  0xf2   : > { %v637_v41 = vadd.f32 %v921_v36, %v636_v38 }
  0xf3   : > { %v923_v44 = vpop.f32.mrf.mxu0  ;;  %v960_v45 = vpop.f32.mrf.mxu1 }
  0xf4   : > { %v673_v46 = vadd.f32 %v881_v39, %v637_v41  ;;  %v924_v47 = vadd.f32 %v923_v44, %v922_v37 }
  0xf5   : > { %v925_v49 = vpop.f32.mrf.mxu0  ;;  %v639_v50 = vpop.f32.mrf.mxu1 }
  0xf6   : > { %v640_v51 = vadd.f32 %v924_v47, %v639_v50  ;;  %v679_v53 = vmax.f32 %v673_v46, 0.0 }
  0xf7   : > { %v926_v52 = vpop.f32.mrf.mxu0 }
  0xf8   : > { %v674_v54 = vadd.f32 %v881_v39, %v640_v51  ;;  %v927_v55 = vadd.f32 %v926_v52, %v925_v49  ;;  %v689_v60 = vsel %vm688_vm1, %v679_v53, %v673_v46 }
  0xf9   : > { %v928_v56 = vpop.f32.mrf.mxu0 }
  0xfa   : > { %v680_v57 = vmax.f32 %v674_v54, 0.0  ;;  %v645_v58 = vadd.f32 %v959_v35, %v927_v55 }
  0xfb   : > { %v929_v59 = vpop.f32.mrf.mxu0 }
  0xfc   : > { %v690_v61 = vsel %vm688_vm1, %v680_v57, %v674_v54  ;;  %v675_v62 = vadd.f32 %v881_v39, %v645_v58  ;;  %v930_v63 = vadd.f32 %v929_v59, %v928_v56 }
  0xfd   : > { %v895_v0 = vpack.c.bf16 %v690_v61, %v689_v60 }
  0xfe   : > { %v648_v1 = vadd.f32 %v960_v45, %v930_v63  ;;  %v681_v2 = vmax.f32 %v675_v62, 0.0 }
  0xff   : > { %896 = vst [vmem:[%s306_s8] sm:$0xff] %v895_v0  }
 0x100   : > { %v676_v3 = vadd.f32 %v881_v39, %v648_v1  ;;  %v691_v5 = vsel %vm688_vm1, %v681_v2, %v675_v62 }
 0x102   : > { %v682_v4 = vmax.f32 %v676_v3, 0.0 }
 0x104   : > { %v692_v6 = vsel %vm688_vm1, %v682_v4, %v676_v3 }
 0x105   : > { %v900_v7 = vpack.c.bf16 %v692_v6, %v691_v5 }
 0x107   : > { %902 = vst [vmem:[%s306_s8 + $0x8] sm:$0xff] %v900_v7  }
 0x108 PF: > { %s14_s17 = sadd.s32 1, %s1041_s17   ;;  %s1196_s15 = smov %s1037_s16 }
 0x109   : > { %p11_p5 = scmp.ge.s32.totalorder %s14_s17, 4   ;;  %s1197_s16 = smov %s1199_s18 }
 0x10b   :  { %13 = sbr.rel (!%p11_p5) target bundleno = 2 (0x2), region = 83 }

// kernel: pspnet_forward.105
= control target key start
LH: loop header
LB: loop body
LE: loop exit
PB: predicated region body
PF: predicated region fallthrough
CT: control target
= control target key end

     0   :  { %s916_s15 = smov 0   ;;  %s918_s16 = smov 0   ;;  %s1000_s0 = inlined_call_operand.vmem [shape: bf16[128,128], index: 0, kind: input, shape index: {}]   ;;  %s1001_s1 = inlined_call_operand.vmem [shape: bf16[128,128], index: 1, kind: input, shape index: {}]   ;;  %s1002_s2 = inlined_call_operand.vmem [shape: f32[1,128], index: 2, kind: input, shape index: {}]   ;;  %s1003_s3 = inlined_call_operand.vmem [shape: f32[1,128], index: 3, kind: input, shape index: {}]   ;;  %s1004_s4 = inlined_call_operand.vmem [shape: bf16[128,128], index: 4, kind: output, shape index: {}]  }
   0x1   :  { %s920_s17 = smov 0  }
   0x2 LB: > { %s33_s18 = sadd.s32 1, %s884_s16  ;;  %p718_p0 = scmp.ge.s32.totalorder %s888_s17, 1  ;;  %s888_s17 = sphi %s920_s17, %s14_s17   ;;  %s884_s16 = sphi %s918_s16, %s1006_s16   ;;  %s880_s15 = sphi %s916_s15, %s1005_s15  }
   0x3   : > { %p35_p1 = scmp.ge.s32.totalorder %s33_s18, 2  ;;  %p221_p2 = scmp.lt.s32.totalorder %s888_s17, 3 }
   0x5   : > { %s1008_s18 = smov (%p35_p1, %s33_s18), 0  ;;  %p222_p3 = pnand %p718_p0, %p221_p2 }
   0x6   : > { %s719_s21 = sshll.u32 (!%p222_p3), %s880_s15, 3 }
   0x7   : > { %225 = sbr.rel (%p222_p3) target bundleno = 252 (0xfc), region = 36  ;;  %p268_p4 = scmp.lt.s32.totalorder (!%p222_p3), %s719_s21, 15 }
   0xc   : > { %v854_v0 = vld [vmem:[%s1001_s1 + $0x38] sm:$0xff]   ;;  %v855_v1 = vld [vmem:[%s1001_s1 + $0x30] sm:$0xff]   ;;  %s1010_s21 = smov (!%p268_p4, %s719_s21), 15  ;;  %v856_v2 = vld [vmem:[%s1001_s1 + $0x28] sm:$0xff]   ;;  %v535_v12 = vlaneseq  ;;  %v890_v17 = vmov 0  }
   0xd   : > { %789 = vmatprep.subr.bf16.mxu0 %v854_v0  ;;  %813 = vmatprep.subr.bf16.mxu1 %v854_v0  ;;  %s720_s26 = sshll.u32 %s1010_s21, 2  ;;  %v857_v3 = vld [vmem:[%s1001_s1 + $0x20] sm:$0xff]   ;;  %v858_v6 = vld [vmem:[%s1001_s1 + $0x18] sm:$0xff]   ;;  %v859_v7 = vld [vmem:[%s1001_s1 + $0x10] sm:$0xff]  }
   0xe   : > { %790 = vmatpush3.bf16.msra.mxu0 %v854_v0  ;;  %821 = vmatpush3.bf16.msra.mxu1 %v854_v0  ;;  %s951_s29 = scalar_lea.vmem %s1000_s0, %s720_s26  ;;  %v860_v8 = vld [vmem:[%s1001_s1 + $0x8] sm:$0xff]   ;;  %v861_v9 = vld [vmem:[%s1001_s1] sm:$0xff]   ;;  %v536_v14 = vshrl.u32 %v535_v12, 7  ;;  %s298_s24 = scalar_lea.vmem %s1004_s4, %s720_s26 }
   0xf   : > { %791 = vmatprep.subr.bf16.mxu0 %v855_v1  ;;  %814 = vmatprep.subr.bf16.mxu1 %v855_v1  ;;  %v862_v4 = vld [vmem:[%s951_s29] sm:$0xff]   ;;  %v863_v5 = vld [vmem:[%s951_s29 + $0x10] sm:$0xff]   ;;  %v864_v10 = vld [vmem:[%s951_s29 + $0x8] sm:$0xff]  }
  0x10   : > { %805 = vmatprep.mubr.bf16.mxu0 %v862_v4  ;;  %809 = vmatprep.mubr.bf16.mxu1 %v863_v5  ;;  %v865_v11 = vld [vmem:[%s951_s29 + $0x18] sm:$0xff]   ;;  %v524_v13 = vld [vmem:[%s1003_s3] sm:$0x1]  ;;  %v537_v15 = vsub.s32 0, %v536_v14 }
  0x11   : > { %vm525_vm0 = vcmp.gt.f32.partialorder %v524_v13, 0.5  ;;  %v735_v16 = vld [vmem:[%s1002_s2] ss:$0 sm:$0xff] }
  0x12   : > { %792 = vmatpush3.bf16.msra.mxu0 %v855_v1  ;;  %822 = vmatpush3.bf16.msra.mxu1 %v855_v1  ;;  %v534_v18 = vsel %vm525_vm0, 1, %v890_v17 }
  0x13   : > { %793 = vmatprep.subr.bf16.mxu0 %v856_v2  ;;  %815 = vmatprep.subr.bf16.mxu1 %v856_v2  ;;  %v538_v22 = vrot.slane %v534_v18, %v537_v15 }
  0x15   : > { %vm539_vm1 = vcmp.eq.s32.totalorder %v538_v22, 1 }
  0x16   : > { %794 = vmatpush3.bf16.msra.mxu0 %v856_v2  ;;  %823 = vmatpush3.bf16.msra.mxu1 %v856_v2 }
  0x17   : > { %795 = vmatprep.subr.bf16.mxu0 %v857_v3  ;;  %816 = vmatprep.subr.bf16.mxu1 %v857_v3 }
  0x1a   : > { %796 = vmatpush3.bf16.msra.mxu0 %v857_v3  ;;  %824 = vmatpush3.bf16.msra.mxu1 %v857_v3 }
  0x1b   : > { %797 = vmatprep.subr.bf16.mxu0 %v858_v6  ;;  %817 = vmatprep.subr.bf16.mxu1 %v858_v6 }
  0x1e   : > { %798 = vmatpush3.bf16.msra.mxu0 %v858_v6  ;;  %825 = vmatpush3.bf16.msra.mxu1 %v858_v6 }
  0x1f   : > { %799 = vmatprep.subr.bf16.mxu0 %v859_v7  ;;  %818 = vmatprep.subr.bf16.mxu1 %v859_v7 }
  0x22   : > { %800 = vmatpush3.bf16.msra.mxu0 %v859_v7  ;;  %826 = vmatpush3.bf16.msra.mxu1 %v859_v7 }
  0x23   : > { %801 = vmatprep.subr.bf16.mxu0 %v860_v8  ;;  %819 = vmatprep.subr.bf16.mxu1 %v860_v8 }
  0x26   : > { %802 = vmatpush3.bf16.msra.mxu0 %v860_v8  ;;  %827 = vmatpush3.bf16.msra.mxu1 %v860_v8 }
  0x27   : > { %803 = vmatprep.subr.bf16.mxu0 %v861_v9  ;;  %820 = vmatprep.subr.bf16.mxu1 %v861_v9 }
  0x2a   : > { %804 = vmatpush3.bf16.msra.mxu0 %v861_v9  ;;  %828 = vmatpush3.bf16.msra.mxu1 %v861_v9 }
  0x2d   : > { %806 = vmatmul.mubr.bf16.vlgmr.msra.gmra.mxu0 %v864_v10  ;;  %810 = vmatmul.mubr.bf16.vlgmr.msra.gmra.mxu1 %v865_v11 }
  0xed   : > { %v807_v19 = vpop.f32.mrf.mxu0  ;;  %v811_v20 = vpop.f32.mrf.mxu1 }
  0xee   : > { %v518_v21 = vadd.f32 %v807_v19, %v735_v16  ;;  %v522_v23 = vadd.f32 %v811_v20, %v735_v16 }
  0xef   : > { %v451_v24 = vpop.f32.mrf.mxu0  ;;  %v467_v25 = vpop.f32.mrf.mxu1 }
  0xf0   : > { %v516_v26 = vadd.f32 %v735_v16, %v451_v24  ;;  %v520_v27 = vadd.f32 %v735_v16, %v467_v25  ;;  %v528_v30 = vmax.f32 %v518_v21, 0.0  ;;  %v532_v31 = vmax.f32 %v522_v23, 0.0 }
  0xf1   : > { %v808_v28 = vpop.f32.mrf.mxu0  ;;  %v812_v29 = vpop.f32.mrf.mxu1 }
  0xf2   : > { %v526_v32 = vmax.f32 %v516_v26, 0.0  ;;  %v530_v33 = vmax.f32 %v520_v27, 0.0  ;;  %v519_v34 = vadd.f32 %v808_v28, %v735_v16  ;;  %v523_v35 = vadd.f32 %v812_v29, %v735_v16 }
  0xf3   : > { %v454_v36 = vpop.f32.mrf.mxu0  ;;  %v470_v37 = vpop.f32.mrf.mxu1  ;;  %v542_v42 = vsel %vm539_vm1, %v528_v30, %v518_v21  ;;  %v546_v43 = vsel %vm539_vm1, %v532_v31, %v522_v23 }
  0xf4   : > { %v517_v38 = vadd.f32 %v735_v16, %v454_v36  ;;  %v521_v39 = vadd.f32 %v735_v16, %v470_v37  ;;  %v529_v40 = vmax.f32 %v519_v34, 0.0  ;;  %v533_v41 = vmax.f32 %v523_v35, 0.0 }
  0xf5   : > { %v540_v46 = vsel %vm539_vm1, %v526_v32, %v516_v26  ;;  %v544_v47 = vsel %vm539_vm1, %v530_v33, %v520_v27 }
  0xf6   : > { %v527_v44 = vmax.f32 %v517_v38, 0.0  ;;  %v531_v45 = vmax.f32 %v521_v39, 0.0  ;;  %v543_v48 = vsel %vm539_vm1, %v529_v40, %v519_v34  ;;  %v547_v49 = vsel %vm539_vm1, %v533_v41, %v523_v35 }
  0xf7   : > { %v762_v50 = vpack.c.bf16 %v543_v48, %v542_v42  ;;  %v772_v51 = vpack.c.bf16 %v547_v49, %v546_v43 }
  0xf8   : > { %v541_v52 = vsel %vm539_vm1, %v527_v44, %v517_v38  ;;  %v545_v53 = vsel %vm539_vm1, %v531_v45, %v521_v39 }
  0xf9   : > { %v757_v54 = vpack.c.bf16 %v541_v52, %v540_v46  ;;  %v767_v55 = vpack.c.bf16 %v545_v53, %v544_v47  ;;  %774 = vst [vmem:[%s298_s24 + $0x8] sm:$0xff] %v762_v50   ;;  %776 = vst [vmem:[%s298_s24 + $0x18] sm:$0xff] %v772_v51  }
  0xfb   : > { %758 = vst [vmem:[%s298_s24] sm:$0xff] %v757_v54   ;;  %775 = vst [vmem:[%s298_s24 + $0x10] sm:$0xff] %v767_v55  }
  0xfc PF: > { %s14_s17 = sadd.s32 1, %s888_s17   ;;  %s1005_s15 = smov %s884_s16 }
  0xfd   : > { %p11_p5 = scmp.ge.s32.totalorder %s14_s17, 4   ;;  %s1006_s16 = smov %s1008_s18 }
  0xff   :  { %13 = sbr.rel (!%p11_p5) target bundleno = 2 (0x2), region = 83 }

// kernel: pspnet_forward.106
= control target key start
LH: loop header
LB: loop body
LE: loop exit
PB: predicated region body
PF: predicated region fallthrough
CT: control target
= control target key end

     0   :  { %s1258_s15 = smov 0   ;;  %s1260_s16 = smov 0   ;;  %s1406_s0 = inlined_call_operand.vmem [shape: bf16[64,2560], index: 0, kind: input, shape index: {}]   ;;  %s1407_s1 = inlined_call_operand.vmem [shape: bf16[2560,128], index: 1, kind: input, shape index: {}]   ;;  %s1408_s2 = inlined_call_operand.vmem [shape: f32[1,128], index: 2, kind: input, shape index: {}]   ;;  %s1409_s3 = inlined_call_operand.vmem [shape: f32[1,128], index: 3, kind: input, shape index: {}]   ;;  %s1410_s4 = inlined_call_operand.vmem [shape: bf16[64,128], index: 4, kind: output, shape index: {}]  }
   0x1   :  { %s1262_s17 = smov 0   ;;  %s1264_s18 = smov 0  }
   0x2   :  { %s1266_s19 = smov 0   ;;  %s1268_s20 = smov 0  }
   0x3   :  { %s1270_s21 = smov 0  }
   0x4 LB: > { %s26_s22 = sadd.s32 1, %s1221_s19  ;;  %s33_s23 = sadd.s32 1, %s1225_s20  ;;  %s1229_s21 = sphi %s1270_s21, %s14_s21   ;;  %s1225_s20 = sphi %s1268_s20, %s1416_s20   ;;  %s1221_s19 = sphi %s1266_s19, %s1415_s19   ;;  %s1217_s18 = sphi %s1264_s18, %s1414_s18   ;;  %s1213_s17 = sphi %s1262_s17, %s1413_s17   ;;  %s1209_s16 = sphi %s1260_s16, %s1412_s16   ;;  %s1205_s15 = sphi %s1258_s15, %s1411_s15  }
   0x5   : > { %p27_p0 = scmp.ge.s32.totalorder %s26_s22, 5  ;;  %p49_p1 = scmp.ne.s32.totalorder %s1209_s16, %s1205_s15 }
   0x6   : > { %p50_p2 = scmp.eq.s32.totalorder %s1229_s21, 0  ;;  %s42_s27 = sadd.s32 1, %s1209_s16 }
   0x7   : > { %s1418_s22 = smov (%p27_p0, %s26_s22), 0  ;;  %s1420_s23 = smov (!%p27_p0, %s33_s23), %s1225_s20 }
   0x8   : > { %p51_p3 = por %p50_p2, %p49_p1  ;;  %p35_p4 = scmp.ge.s32.totalorder %s1420_s23, 2 }
   0x9   : > { %s38_s24 = ssub.s32 %s1221_s19, %s1418_s22  ;;  %p940_p6 = scmp.ge.s32.totalorder %s1229_s21, 10 }
   0xa   : > { %s1422_s23 = smov (%p35_p4, %s1420_s23), 0 }
   0xb   : > { %s37_s25 = ssub.s32 %s1225_s20, %s1422_s23  ;;  %195 = sbr.rel (%p940_p6) target bundleno = 28 (0x1c), region = 24 }
   0xc   : > { %s39_s26 = sor.u32 %s38_s24, %s37_s25 }
   0xd   : > { %p40_p5 = scmp.eq.s32.totalorder %s39_s26, 0 }
   0xf   : > { %s1309_s28 = scalar_select %p40_p5, %s1209_s16, %s42_s27  }
  0x10   : > { %198 = sbr.rel (!%p51_p3) target bundleno = 28 (0x1c), region = 28  ;;  %s200_s29 = sand.u32 (%p51_p3), 1, %s1209_s16  }
  0x11   : > { %s943_s30 = sshll.u32 (%p51_p3), %s1221_s19, 2  ;;  %s941_s5 = sshll.u32 (%p51_p3), %s200_s29, 6 }
  0x12   : > { %s1072_s6 = smul.u32 (%p51_p3), 80, %s1225_s20  ;;  %s202_s12 = scalar_lea.vmem (%p51_p3), [#allocation3], %s941_s5 }
  0x14   : > { %s206_s7 = sadd.s32 (%p51_p3), %s1072_s6, %s943_s30 }
  0x15   : > { %s945_s8 = sshll.u32 %s206_s7, 2 }
  0x16   : > { %s208_s11 = scalar_lea.vmem %s1406_s0, %s945_s8 }
  0x17   : > { %v221_v0 = vld [vmem:[%s208_s11] sm:$0xff]  ;;  %v223_v1 = vld [vmem:[%s208_s11 + $0x8] sm:$0xff]  ;;  %v225_v2 = vld [vmem:[%s208_s11 + $0x50] sm:$0xff] }
  0x18   : > { %222 = vst [vmem:[%s202_s12] sm:$0xff] %v221_v0  ;;  %224 = vst [vmem:[%s202_s12 + $0x8] sm:$0xff] %v223_v1  ;;  %v227_v3 = vld [vmem:[%s208_s11 + $0x58] sm:$0xff]  ;;  %v229_v4 = vld [vmem:[%s208_s11 + $0xa0] sm:$0xff] }
  0x19   : > { %226 = vst [vmem:[%s202_s12 + $0x10] sm:$0xff] %v225_v2  ;;  %v231_v5 = vld [vmem:[%s208_s11 + $0xa8] sm:$0xff]  ;;  %228 = vst [vmem:[%s202_s12 + $0x18] sm:$0xff] %v227_v3  ;;  %v233_v6 = vld [vmem:[%s208_s11 + $0xf0] sm:$0xff] }
  0x1a   : > { %230 = vst [vmem:[%s202_s12 + $0x20] sm:$0xff] %v229_v4  ;;  %232 = vst [vmem:[%s202_s12 + $0x28] sm:$0xff] %v231_v5  ;;  %v235_v7 = vld [vmem:[%s208_s11 + $0xf8] sm:$0xff] }
  0x1b   : > { %234 = vst [vmem:[%s202_s12 + $0x30] sm:$0xff] %v233_v6  ;;  %236 = vst [vmem:[%s202_s12 + $0x38] sm:$0xff] %v235_v7 }
  0x1c PF: > { %p946_p7 = scmp.ge.s32.totalorder %s1229_s21, 1  ;;  %p253_p8 = scmp.lt.s32.totalorder %s1229_s21, 11 }
  0x1e   : > { %p254_p9 = pnand %p946_p7, %p253_p8 }
  0x1f   : > { %s260_s13 = sand.u32 (!%p254_p9), 1, %s1205_s15   ;;  %s948_s14 = sshll.u32 (!%p254_p9), %s1213_s17, 6 }
  0x20   : > { %257 = sbr.rel (%p254_p9) target bundleno = 312 (0x138), region = 55  ;;  %s947_s24 = sshll.u32 (!%p254_p9), %s260_s13, 6 }
  0x21   : > { %p305_p10 = scmp.lt.s32.totalorder (!%p254_p9), %s948_s14, 319  ;;  %s950_s25 = sshll.u32 (!%p254_p9), %s1217_s18, 2 }
  0x22   : > { %p320_p11 = scmp.lt.s32.totalorder (!%p254_p9), %s950_s25, 7  ;;  %s1333_s15 = scalar_lea.vmem (!%p254_p9), [#allocation3], %s947_s24 }
  0x23   : > { %p952_p12 = scmp.ne.s32.totalorder (!%p254_p9), %s1213_s17, 0 }
  0x25   : > { %s1424_s14 = smov (!%p305_p10, %s948_s14), 319  ;;  %s1426_s25 = smov (!%p320_p11, %s950_s25), 7 }
  0x26   : > { %s949_s26 = sshll.u32 %s1424_s14, 2  ;;  %s951_s5 = sshll.u32 %s1426_s25, 2 }
  0x27   : > { %s1326_s30 = scalar_lea.vmem %s1407_s1, %s949_s26  ;;  %s1331_s8 = scalar_lea.vmem %s1410_s4, %s951_s5 }
  0x28   : > { %332 = sbr.rel (%p952_p12) target bundleno = 48 (0x30), region = 63 }
  0x2d   : > { %v1231_v8 = vmov 0.0  }
  0x2e   : > { %333 = vst [vmem:[#allocation2 + $0x10] sm:$0xff] %v1231_v8  ;;  %334 = vst [vmem:[#allocation2] sm:$0xff] %v1231_v8 }
  0x2f   : > { %335 = vst [vmem:[#allocation2 + $0x18] sm:$0xff] %v1231_v8  ;;  %336 = vst [vmem:[#allocation2 + $0x8] sm:$0xff] %v1231_v8 }
  0x30 PF: > { %v1131_v9 = vld [vmem:[%s1326_s30 + $0x78] sm:$0xff]   ;;  %v1135_v13 = vld [vmem:[%s1326_s30 + $0x70] sm:$0xff]   ;;  %v1139_v17 = vld [vmem:[%s1326_s30 + $0x68] sm:$0xff]   ;;  %p993_p13 = scmp.ne.s32.totalorder %s1213_s17, 4 }
  0x31   : > { %v1132_v10 = vld [vmem:[%s1326_s30 + $0xf8] sm:$0xff]   ;;  %1016 = vmatprep.subr.bf16.mxu0 %v1131_v9  ;;  %v1136_v14 = vld [vmem:[%s1326_s30 + $0xf0] sm:$0xff]   ;;  %v1140_v18 = vld [vmem:[%s1326_s30 + $0xe8] sm:$0xff]  }
  0x32   : > { %v1133_v11 = vld [vmem:[%s1326_s30 + $0x38] sm:$0xff]   ;;  %1044 = vmatprep.subr.bf16.mxu1 %v1132_v10  ;;  %v1137_v15 = vld [vmem:[%s1326_s30 + $0x30] sm:$0xff]   ;;  %v1141_v19 = vld [vmem:[%s1326_s30 + $0x28] sm:$0xff]  }
  0x33   : > { %v1134_v12 = vld [vmem:[%s1326_s30 + $0xb8] sm:$0xff]   ;;  %1017 = vmatpush3.bf16.msra.mxu0 %v1133_v11  ;;  %v1138_v16 = vld [vmem:[%s1326_s30 + $0xb0] sm:$0xff]   ;;  %v1142_v20 = vld [vmem:[%s1326_s30 + $0xa8] sm:$0xff]  }
  0x34   : > { %1045 = vmatpush3.bf16.msra.mxu1 %v1134_v12  ;;  %1018 = vmatprep.subr.bf16.mxu0 %v1135_v13  ;;  %v1143_v21 = vld [vmem:[%s1326_s30 + $0x60] sm:$0xff]   ;;  %v1147_v25 = vld [vmem:[%s1326_s30 + $0x58] sm:$0xff]   ;;  %v1151_v29 = vld [vmem:[%s1326_s30 + $0x50] sm:$0xff]  }
  0x35   : > { %1046 = vmatprep.subr.bf16.mxu1 %v1136_v14  ;;  %v1144_v22 = vld [vmem:[%s1326_s30 + $0xe0] sm:$0xff]   ;;  %v1148_v26 = vld [vmem:[%s1326_s30 + $0xd8] sm:$0xff]   ;;  %v1152_v30 = vld [vmem:[%s1326_s30 + $0xd0] sm:$0xff]  }
  0x36   : > { %v1145_v23 = vld [vmem:[%s1326_s30 + $0x20] sm:$0xff]   ;;  %v1149_v27 = vld [vmem:[%s1326_s30 + $0x18] sm:$0xff]   ;;  %v1153_v31 = vld [vmem:[%s1326_s30 + $0x10] sm:$0xff]  }
  0x37   : > { %1019 = vmatpush3.bf16.msra.mxu0 %v1137_v15  ;;  %v1146_v24 = vld [vmem:[%s1326_s30 + $0xa0] sm:$0xff]   ;;  %v1150_v28 = vld [vmem:[%s1326_s30 + $0x98] sm:$0xff]   ;;  %v1154_v32 = vld [vmem:[%s1326_s30 + $0x90] sm:$0xff]  }
  0x38   : > { %1047 = vmatpush3.bf16.msra.mxu1 %v1138_v16  ;;  %1020 = vmatprep.subr.bf16.mxu0 %v1139_v17  ;;  %v1155_v33 = vld [vmem:[%s1326_s30 + $0x48] sm:$0xff]   ;;  %v1159_v37 = vld [vmem:[%s1326_s30 + $0x40] sm:$0xff]   ;;  %v337_v56 = vld [vmem:[#allocation2 + $0x10] sm:$0xff] }
  0x39   : > { %1048 = vmatprep.subr.bf16.mxu1 %v1140_v18  ;;  %v1156_v34 = vld [vmem:[%s1326_s30 + $0xc8] sm:$0xff]   ;;  %v1160_v38 = vld [vmem:[%s1326_s30 + $0xc0] sm:$0xff]   ;;  %v339_v10 = vld [vmem:[#allocation2 + $0x18] sm:$0xff] }
  0x3a   : > { %v1157_v35 = vld [vmem:[%s1326_s30 + $0x8] sm:$0xff]   ;;  %v1161_v39 = vld [vmem:[%s1326_s30] sm:$0xff]  }
  0x3b   : > { %1021 = vmatpush3.bf16.msra.mxu0 %v1141_v19  ;;  %v1158_v36 = vld [vmem:[%s1326_s30 + $0x88] sm:$0xff]   ;;  %v1162_v40 = vld [vmem:[%s1326_s30 + $0x80] sm:$0xff]  }
  0x3c   : > { %1049 = vmatpush3.bf16.msra.mxu1 %v1142_v20  ;;  %1022 = vmatprep.subr.bf16.mxu0 %v1143_v21  ;;  %v1163_v41 = vld [vmem:[%s1333_s15] ss:$16 sps:$4 sm:$0xff]   ;;  %v1165_v42 = vld [vmem:[%s1333_s15 + $0x4] ss:$16 sps:$4 sm:$0xff]   ;;  %v1166_v43 = vld [vmem:[%s1333_s15 + $0x8] ss:$16 sps:$4 sm:$0xff]  }
  0x3d   : > { %1050 = vmatprep.subr.bf16.mxu1 %v1144_v22  ;;  %v1168_v44 = vld [vmem:[%s1333_s15 + $0xc] ss:$16 sps:$4 sm:$0xff]   ;;  %677 = vmatprep.mubr.bf16.mxu0 %v1165_v42  ;;  %v1169_v45 = vld [vmem:[%s1333_s15 + $0x24] ss:$16 sps:$4 sm:$0xff]   ;;  %v1173_v47 = vld [vmem:[%s1333_s15 + $0x20] ss:$16 sps:$4 sm:$0xff]  }
  0x3e   : > { %726 = vmatprep.mubr.bf16.mxu1 %v1168_v44  ;;  %v1171_v46 = vld [vmem:[%s1333_s15 + $0x2c] ss:$16 sps:$4 sm:$0xff]   ;;  %v1174_v48 = vld [vmem:[%s1333_s15 + $0x28] ss:$16 sps:$4 sm:$0xff]   ;;  %v338_v1 = vld [vmem:[#allocation2] sm:$0xff] }
  0x3f   : > { %1023 = vmatpush3.bf16.msra.mxu0 %v1145_v23  ;;  %v340_v18 = vld [vmem:[#allocation2 + $0x8] sm:$0xff] }
  0x40   : > { %1051 = vmatpush3.bf16.msra.mxu1 %v1146_v24  ;;  %1024 = vmatprep.subr.bf16.mxu0 %v1147_v25 }
  0x41   : > { %1052 = vmatprep.subr.bf16.mxu1 %v1148_v26 }
  0x43   : > { %1025 = vmatpush3.bf16.msra.mxu0 %v1149_v27 }
  0x44   : > { %1053 = vmatpush3.bf16.msra.mxu1 %v1150_v28  ;;  %1026 = vmatprep.subr.bf16.mxu0 %v1151_v29 }
  0x45   : > { %1054 = vmatprep.subr.bf16.mxu1 %v1152_v30 }
  0x47   : > { %1027 = vmatpush3.bf16.msra.mxu0 %v1153_v31 }
  0x48   : > { %1055 = vmatpush3.bf16.msra.mxu1 %v1154_v32  ;;  %1028 = vmatprep.subr.bf16.mxu0 %v1155_v33 }
  0x49   : > { %1056 = vmatprep.subr.bf16.mxu1 %v1156_v34 }
  0x4b   : > { %1029 = vmatpush3.bf16.msra.mxu0 %v1157_v35 }
  0x4c   : > { %1057 = vmatpush3.bf16.msra.mxu1 %v1158_v36  ;;  %1030 = vmatprep.subr.bf16.mxu0 %v1159_v37 }
  0x4d   : > { %1058 = vmatprep.subr.bf16.mxu1 %v1160_v38 }
  0x4f   : > { %1031 = vmatpush3.bf16.msra.mxu0 %v1161_v39 }
  0x50   : > { %1059 = vmatpush3.bf16.msra.mxu1 %v1162_v40 }
  0x52   : > { %678 = vmatmul.mubr.bf16.vlgmr.msra.gmra.mxu0 %v1163_v41 }
  0x53   : > { %727 = vmatmul.mubr.bf16.vlgmr.msra.gmra.mxu1 %v1166_v43  ;;  %685 = vmatprep.mubr.bf16.mxu0 %v1169_v45 }
  0x54   : > { %734 = vmatprep.mubr.bf16.mxu1 %v1171_v46 }
  0x5a   : > { %686 = vmatmul.mubr.bf16.gmra.mxu0 %v1173_v47 }
  0x5b   : > { %735 = vmatmul.mubr.bf16.gmra.mxu1 %v1174_v48 }
 0x112   : > { %v1032_v49 = vpop.f32.mrf.mxu0 }
 0x113   : > { %v1060_v50 = vpop.f32.mrf.mxu1 }
 0x114   : > { %v1033_v51 = vpop.f32.mrf.mxu0 }
 0x115   : > { %v1034_v52 = vadd.f32 %v1033_v51, %v1032_v49  ;;  %v1061_v53 = vpop.f32.mrf.mxu1 }
 0x116   : > { %v1062_v54 = vadd.f32 %v1061_v53, %v1060_v50  ;;  %v1035_v55 = vpop.f32.mrf.mxu0 }
 0x117   : > { %v1063_v57 = vpop.f32.mrf.mxu1 }
 0x118   : > { %v729_v58 = vadd.f32 %v1062_v54, %v1034_v52  ;;  %v1036_v59 = vpop.f32.mrf.mxu0 }
 0x119   : > { %v1037_v60 = vadd.f32 %v1036_v59, %v1035_v55  ;;  %v1064_v61 = vpop.f32.mrf.mxu1 }
 0x11a   : > { %v743_v62 = vadd.f32 %v729_v58, %v337_v56  ;;  %v1065_v63 = vadd.f32 %v1064_v61, %v1063_v57  ;;  %v1038_v0 = vpop.f32.mrf.mxu0 }
 0x11b   : > { %v1066_v2 = vpop.f32.mrf.mxu1 }
 0x11c   : > { %747 = vst [vmem:[#allocation2 + $0x10] sm:$0xff] %v743_v62  ;;  %v732_v3 = vadd.f32 %v1065_v63, %v1037_v60  ;;  %v1039_v4 = vpop.f32.mrf.mxu0 }
 0x11d   : > { %v1040_v5 = vadd.f32 %v1039_v4, %v1038_v0  ;;  %v1067_v6 = vpop.f32.mrf.mxu1 }
 0x11e   : > { %v744_v7 = vadd.f32 %v732_v3, %v338_v1  ;;  %v1068_v8 = vadd.f32 %v1067_v6, %v1066_v2  ;;  %v1041_v9 = vpop.f32.mrf.mxu0 }
 0x11f   : > { %v1069_v11 = vpop.f32.mrf.mxu1 }
 0x120   : > { %748 = vst [vmem:[#allocation2] sm:$0xff] %v744_v7  ;;  %v737_v12 = vadd.f32 %v1068_v8, %v1040_v5  ;;  %v1042_v13 = vpop.f32.mrf.mxu0 }
 0x121   : > { %v1043_v14 = vadd.f32 %v1042_v13, %v1041_v9  ;;  %v1070_v15 = vpop.f32.mrf.mxu1 }
 0x122   : > { %v745_v16 = vadd.f32 %v737_v12, %v339_v10  ;;  %v1071_v17 = vadd.f32 %v1070_v15, %v1069_v11 }
 0x124   : > { %749 = vst [vmem:[#allocation2 + $0x18] sm:$0xff] %v745_v16  ;;  %v740_v19 = vadd.f32 %v1071_v17, %v1043_v14  ;;  %754 = sbr.rel (%p993_p13) target bundleno = 312 (0x138), region = 67 }
 0x126   : > { %v746_v20 = vadd.f32 %v740_v19, %v340_v18 }
 0x128   : > { %750 = vst [vmem:[#allocation2 + $0x8] sm:$0xff] %v746_v20 }
 0x129   : > { %v755_v21 = vld [vmem:[#allocation2 + $0x10] sm:$0xff]  ;;  %v756_v22 = vld [vmem:[#allocation2] sm:$0xff]  ;;  %v777_v24 = vlaneseq  ;;  %v1232_v33 = vmov 0  }
 0x12a   : > { %v994_v23 = vld [vmem:[%s1408_s2] ss:$0 sm:$0xff] }
 0x12b   : > { %v766_v25 = vadd.f32 %v994_v23, %v755_v21  ;;  %v767_v26 = vadd.f32 %v994_v23, %v756_v22  ;;  %v770_v27 = vld [vmem:[%s1409_s3] sm:$0x1]  ;;  %v757_v28 = vld [vmem:[#allocation2 + $0x18] sm:$0xff]  ;;  %v778_v30 = vshrl.u32 %v777_v24, 7 }
 0x12c   : > { %vm771_vm0 = vcmp.gt.f32.partialorder %v770_v27, 0.5  ;;  %v768_v31 = vadd.f32 %v994_v23, %v757_v28 }
 0x12d   : > { %v776_v34 = vsel %vm771_vm0, 1, %v1232_v33  ;;  %v779_v35 = vsub.s32 0, %v778_v30  ;;  %v772_v36 = vmax.f32 %v766_v25, 0.0  ;;  %v773_v37 = vmax.f32 %v767_v26, 0.0 }
 0x12e   : > { %v774_v38 = vmax.f32 %v768_v31, 0.0 }
 0x12f   : > { %v758_v29 = vld [vmem:[#allocation2 + $0x8] sm:$0xff]  ;;  %v780_v40 = vrot.slane %v776_v34, %v779_v35 }
 0x130   : > { %v769_v32 = vadd.f32 %v994_v23, %v758_v29 }
 0x131   : > { %vm781_vm1 = vcmp.eq.s32.totalorder %v780_v40, 1 }
 0x132   : > { %v775_v39 = vmax.f32 %v769_v32, 0.0  ;;  %v782_v41 = vsel %vm781_vm1, %v772_v36, %v766_v25  ;;  %v783_v42 = vsel %vm781_vm1, %v773_v37, %v767_v26  ;;  %v784_v43 = vsel %vm781_vm1, %v774_v38, %v768_v31 }
 0x133   : > { %v1008_v45 = vpack.c.bf16 %v783_v42, %v782_v41 }
 0x134   : > { %v785_v44 = vsel %vm781_vm1, %v775_v39, %v769_v32 }
 0x135   : > { %v1013_v46 = vpack.c.bf16 %v785_v44, %v784_v43  ;;  %1009 = vst [vmem:[%s1331_s8] sm:$0xff] %v1008_v45  }
 0x137   : > { %1015 = vst [vmem:[%s1331_s8 + $0x8] sm:$0xff] %v1013_v46  }
 0x138 PF: > { %s14_s21 = sadd.s32 1, %s1229_s21   ;;  %s1411_s15 = smov %s1209_s16 }
 0x139   : > { %p11_p0 = scmp.ge.s32.totalorder %s14_s21, 12   ;;  %s1412_s16 = smov %s1309_s28 }
 0x13a   : > { %s1413_s17 = smov %s1221_s19  ;;  %s1414_s18 = smov %s1225_s20 }
 0x13b   : > { %s1415_s19 = smov %s1418_s22  ;;  %s1416_s20 = smov %s1422_s23 }
 0x13c   :  { %13 = sbr.rel (!%p11_p0) target bundleno = 4 (0x4), region = 111 }

// kernel: pspnet_forward.107
= control target key start
LH: loop header
LB: loop body
LE: loop exit
PB: predicated region body
PF: predicated region fallthrough
CT: control target
= control target key end

     0   :  { %s751_s15 = smov 0   ;;  %s753_s16 = smov 0   ;;  %s818_s0 = inlined_call_operand.vmem [shape: bf16[64,128], index: 0, kind: input, shape index: {}]   ;;  %s819_s1 = inlined_call_operand.vmem [shape: bf16[128,128], index: 1, kind: input, shape index: {}]   ;;  %s820_s2 = inlined_call_operand.vmem [shape: f32[1,128], index: 2, kind: input, shape index: {}]   ;;  %s821_s3 = inlined_call_operand.vmem [shape: f32[1,128], index: 3, kind: input, shape index: {}]   ;;  %s822_s4 = inlined_call_operand.vmem [shape: f32[64,128], index: 4, kind: output, shape index: {}]  }
   0x1   :  { %s755_s17 = smov 0  }
   0x2 LB: > { %s33_s18 = sadd.s32 1, %s719_s16  ;;  %p618_p0 = scmp.ge.s32.totalorder %s723_s17, 1  ;;  %s723_s17 = sphi %s755_s17, %s14_s17   ;;  %s719_s16 = sphi %s753_s16, %s824_s16   ;;  %s715_s15 = sphi %s751_s15, %s823_s15  }
   0x3   : > { %p35_p1 = scmp.ge.s32.totalorder %s33_s18, 2  ;;  %p221_p2 = scmp.lt.s32.totalorder %s723_s17, 3 }
   0x5   : > { %s826_s18 = smov (%p35_p1, %s33_s18), 0  ;;  %p222_p3 = pnand %p618_p0, %p221_p2 }
   0x6   : > { %s619_s21 = sshll.u32 (!%p222_p3), %s715_s15, 2 }
   0x7   : > { %225 = sbr.rel (%p222_p3) target bundleno = 250 (0xfa), region = 36  ;;  %p268_p4 = scmp.lt.s32.totalorder (!%p222_p3), %s619_s21, 7 }
   0xc   : > { %v691_v0 = vld [vmem:[%s819_s1 + $0x38] sm:$0xff]   ;;  %v692_v1 = vld [vmem:[%s819_s1 + $0x30] sm:$0xff]   ;;  %s828_s21 = smov (!%p268_p4, %s619_s21), 7  ;;  %v693_v2 = vld [vmem:[%s819_s1 + $0x28] sm:$0xff]   ;;  %v475_v10 = vlaneseq  ;;  %v725_v14 = vmov 0  }
   0xd   : > { %646 = vmatprep.subr.bf16.mxu0 %v691_v0  ;;  %s620_s26 = sshll.u32 %s828_s21, 2  ;;  %v694_v3 = vld [vmem:[%s819_s1 + $0x20] sm:$0xff]   ;;  %v695_v5 = vld [vmem:[%s819_s1 + $0x18] sm:$0xff]   ;;  %v696_v6 = vld [vmem:[%s819_s1 + $0x10] sm:$0xff]   ;;  %s622_s22 = sshll.u32 %s828_s21, 3 }
   0xe   : > { %647 = vmatpush3.bf16.msra.mxu0 %v691_v0  ;;  %s274_s29 = scalar_lea.vmem %s818_s0, %s620_s26  ;;  %v697_v7 = vld [vmem:[%s819_s1 + $0x8] sm:$0xff]   ;;  %v698_v8 = vld [vmem:[%s819_s1] sm:$0xff]   ;;  %v476_v12 = vshrl.u32 %v475_v10, 7  ;;  %s298_s25 = scalar_lea.vmem %s822_s4, %s622_s22 }
   0xf   : > { %648 = vmatprep.subr.bf16.mxu0 %v692_v1  ;;  %v699_v4 = vld [vmem:[%s274_s29] sm:$0xff]   ;;  %v700_v9 = vld [vmem:[%s274_s29 + $0x8] sm:$0xff]  }
  0x10   : > { %662 = vmatprep.mubr.bf16.mxu0 %v699_v4  ;;  %v468_v11 = vld [vmem:[%s821_s3] sm:$0x1]  ;;  %v477_v13 = vsub.s32 0, %v476_v12 }
  0x11   : > { %vm469_vm0 = vcmp.gt.f32.partialorder %v468_v11, 0.5  ;;  %v633_v17 = vld [vmem:[%s820_s2] ss:$0 sm:$0xff] }
  0x12   : > { %649 = vmatpush3.bf16.msra.mxu0 %v692_v1  ;;  %v474_v15 = vsel %vm469_vm0, 1, %v725_v14 }
  0x13   : > { %650 = vmatprep.subr.bf16.mxu0 %v693_v2  ;;  %v478_v18 = vrot.slane %v474_v15, %v477_v13 }
  0x15   : > { %vm479_vm1 = vcmp.eq.s32.totalorder %v478_v18, 1 }
  0x16   : > { %651 = vmatpush3.bf16.msra.mxu0 %v693_v2 }
  0x17   : > { %652 = vmatprep.subr.bf16.mxu0 %v694_v3 }
  0x1a   : > { %653 = vmatpush3.bf16.msra.mxu0 %v694_v3 }
  0x1b   : > { %654 = vmatprep.subr.bf16.mxu0 %v695_v5 }
  0x1e   : > { %655 = vmatpush3.bf16.msra.mxu0 %v695_v5 }
  0x1f   : > { %656 = vmatprep.subr.bf16.mxu0 %v696_v6 }
  0x22   : > { %657 = vmatpush3.bf16.msra.mxu0 %v696_v6 }
  0x23   : > { %658 = vmatprep.subr.bf16.mxu0 %v697_v7 }
  0x26   : > { %659 = vmatpush3.bf16.msra.mxu0 %v697_v7 }
  0x27   : > { %660 = vmatprep.subr.bf16.mxu0 %v698_v8 }
  0x2a   : > { %661 = vmatpush3.bf16.msra.mxu0 %v698_v8 }
  0x2d   : > { %663 = vmatmul.mubr.bf16.vlgmr.msra.gmra.mxu0 %v700_v9 }
  0xed   : > { %v664_v16 = vpop.f32.mrf.mxu0 }
  0xee   : > { %v466_v21 = vadd.f32 %v664_v16, %v633_v17 }
  0xef   : > { %v427_v19 = vpop.f32.mrf.mxu0 }
  0xf0   : > { %v464_v20 = vadd.f32 %v633_v17, %v427_v19  ;;  %v472_v28 = vmax.f32 %v466_v21, 0.0 }
  0xf1   : > { %v665_v22 = vpop.f32.mrf.mxu0 }
  0xf2   : > { %v470_v23 = vmax.f32 %v464_v20, 0.0  ;;  %v467_v24 = vadd.f32 %v665_v22, %v633_v17  ;;  %v482_v32 = vsel %vm479_vm1, %v472_v28, %v466_v21 }
  0xf3   : > { %v430_v25 = vpop.f32.mrf.mxu0  ;;  %486 = vst [vmem:[%s298_s25 + $0x10] sm:$0xff] %v482_v32 }
  0xf4   : > { %v480_v26 = vsel %vm479_vm1, %v470_v23, %v464_v20  ;;  %v465_v27 = vadd.f32 %v633_v17, %v430_v25  ;;  %v473_v29 = vmax.f32 %v467_v24, 0.0 }
  0xf5   : > { %484 = vst [vmem:[%s298_s25] sm:$0xff] %v480_v26 }
  0xf6   : > { %v471_v30 = vmax.f32 %v465_v27, 0.0  ;;  %v483_v33 = vsel %vm479_vm1, %v473_v29, %v467_v24 }
  0xf7   : > { %487 = vst [vmem:[%s298_s25 + $0x18] sm:$0xff] %v483_v33 }
  0xf8   : > { %v481_v31 = vsel %vm479_vm1, %v471_v30, %v465_v27 }
  0xf9   : > { %485 = vst [vmem:[%s298_s25 + $0x8] sm:$0xff] %v481_v31 }
  0xfa PF: > { %s14_s17 = sadd.s32 1, %s723_s17   ;;  %s823_s15 = smov %s719_s16 }
  0xfb   : > { %p11_p5 = scmp.ge.s32.totalorder %s14_s17, 4   ;;  %s824_s16 = smov %s826_s18 }
  0xfd   :  { %13 = sbr.rel (!%p11_p5) target bundleno = 2 (0x2), region = 83 }

</bundles_post_ra>
